<compile_context>
chip_gen: v7x
topology: tpu7x:2x2x1
jax: 0.10.0
libtpu: 0.0.40
codegen_flags: <defaults>
</compile_context>

<pallas_src>
import functools
import math

import jax
import jax.numpy as jnp
import numpy as np
from jax.experimental import pallas as pl
from jax.experimental.pallas import tpu as pltpu

LN_EPS = 1e-5  # nn.LayerNorm default


# ----------------------------- in-kernel helpers -----------------------------

def _layer_norm(x, ln_ref):
    """x: (N, D) f32; ln_ref: (2, D) VMEM ref, row0 = gamma, row1 = beta."""
    p = ln_ref[...]
    gamma = p[0:1]
    beta = p[1:2]
    mu = jnp.mean(x, axis=-1, keepdims=True)
    xc = x - mu
    var = jnp.mean(xc * xc, axis=-1, keepdims=True)
    return xc * jax.lax.rsqrt(var + LN_EPS) * gamma + beta


def _softmax_rows(s, approx):
    m = jnp.max(s, axis=-1, keepdims=True)
    e = jnp.exp(s - m)
    den = jnp.sum(e, axis=-1, keepdims=True)
    if approx:
        return e * pl.reciprocal(den, approx=True)     # EUP slot, free next to exp
    return e / den


def _attend(q, k, v, *, nhead, bblk, tq, tk, approx, cd):
    """Scaled-dot-product attention on already-projected q/k/v.

    q: (Bblk*Tq, D) f32; k, v: (Bblk*Tk, D) f32.  Returns (Bblk*Tq, D) f32
    with heads concatenated in PyTorch order (ready for the fused out-proj matmul).
    """
    d = q.shape[-1]
    hd = d // nhead
    scale = 1.0 / math.sqrt(hd)
    outs = []
    for h in range(nhead):                              # per-head structure is inherent here
        lo, hi = h * hd, (h + 1) * hd
        qh = q[:, lo:hi].reshape(bblk, tq, hd).astype(cd)
        kh = k[:, lo:hi].reshape(bblk, tk, hd).astype(cd)
        vh = v[:, lo:hi].reshape(bblk, tk, hd).astype(cd)
        s = jnp.einsum('bqd,bkd->bqk', qh, kh,
                       preferred_element_type=jnp.float32) * scale
        p = _softmax_rows(s, approx)
        oh = jnp.einsum('bqk,bkd->bqd', p.astype(cd), vh,
                        preferred_element_type=jnp.float32)
        outs.append(oh)
    o = jnp.concatenate(outs, axis=-1)                  # (Bblk, Tq, D), head-major lanes
    return o.reshape(bblk * tq, d)


# --------------------------------- the kernel ---------------------------------

def decoder_layer_kernel(tgt_ref, mem_ref,
                         sa_wqkv_ref, sa_bqkv_ref, sa_wo_ref, sa_bo_ref,
                         ca_wq_ref, ca_bq_ref, ca_wkv_ref, ca_bkv_ref,
                         ca_wo_ref, ca_bo_ref,
                         ln1_ref, ln2_ref, ln3_ref,
                         w1_ref, b1_ref, w2_ref, b2_ref,
                         out_ref, *, nhead, approx_recip):
    bblk, tq, d = tgt_ref.shape
    tk = mem_ref.shape[1]
    cd = sa_wqkv_ref.dtype                              # MXU operand dtype (f32 or bf16)

    # Flatten token-parallel work over (Bblk*T, D); keep residual path in f32.
    x = tgt_ref[...].astype(jnp.float32).reshape(bblk * tq, d)
    mem = mem_ref[...].reshape(bblk * tk, d).astype(cd)

    # --- self-attention: single fused (D, 3D) QKV matmul; dropout1 = identity ---
    qkv = jnp.dot(x.astype(cd), sa_wqkv_ref[...],
                  preferred_element_type=jnp.float32) + sa_bqkv_ref[...]
    o = _attend(qkv[:, 0:d], qkv[:, d:2 * d], qkv[:, 2 * d:3 * d],
                nhead=nhead, bblk=bblk, tq=tq, tk=tq, approx=approx_recip, cd=cd)
    sa = jnp.dot(o.astype(cd), sa_wo_ref[...],
                 preferred_element_type=jnp.float32) + sa_bo_ref[...]
    x = _layer_norm(x + sa, ln1_ref)

    # --- cross-attention: Q from x (D->D), fused KV from memory (D->2D); dropout2 = id ---
    q = jnp.dot(x.astype(cd), ca_wq_ref[...],
                preferred_element_type=jnp.float32) + ca_bq_ref[...]
    kv = jnp.dot(mem, ca_wkv_ref[...],
                 preferred_element_type=jnp.float32) + ca_bkv_ref[...]
    o = _attend(q, kv[:, 0:d], kv[:, d:2 * d],
                nhead=nhead, bblk=bblk, tq=tq, tk=tk, approx=approx_recip, cd=cd)
    ca = jnp.dot(o.astype(cd), ca_wo_ref[...],
                 preferred_element_type=jnp.float32) + ca_bo_ref[...]
    x = _layer_norm(x + ca, ln2_ref)

    # --- feed-forward: linear2(relu(linear1(x))); dropout/dropout3 = identity ---
    h = jnp.dot(x.astype(cd), w1_ref[...],
                preferred_element_type=jnp.float32) + b1_ref[...]
    h = jnp.maximum(h, 0.0)
    ff = jnp.dot(h.astype(cd), w2_ref[...],
                 preferred_element_type=jnp.float32) + b2_ref[...]
    x = _layer_norm(x + ff, ln3_ref)

    out_ref[...] = x.reshape(bblk, tq, d).astype(out_ref.dtype)


# ----------------------- one-time parameter preparation -----------------------

def prepare_params(params, nhead, compute_dtype=jnp.bfloat16):
    """Re-pack PyTorch-layout weights into lane-dense kernel layout. Call ONCE at
    parameter-load time (hoisted off the per-forward hot path).

    compute_dtype: dtype of MXU weight operands (bf16 recommended on v6e/v7x; also fine
    on v5e since softmax/LN stay f32). Biases / LN params stay f32.
    """
    (sa_in_w, sa_in_b, sa_out_w, sa_out_b,
     ca_in_w, ca_in_b, ca_out_w, ca_out_b,
     ln1_g, ln1_b, ln2_g, ln2_b, ln3_g, ln3_b,
     w1, b1, w2, b2) = params
    d = sa_out_w.shape[0]
    f32 = lambda a: jnp.asarray(a, jnp.float32)
    wd = lambda a: jnp.asarray(a, jnp.float32).astype(compute_dtype)

    # self-attn: in_proj (3D, D) rows = [q; k; v] -> one lane-dense (D, 3D) weight.
    sa_wqkv = wd(f32(sa_in_w).T)                        # (D, 3D) = [Wq^T | Wk^T | Wv^T]
    sa_bqkv = f32(sa_in_b).reshape(1, 3 * d)
    sa_wo = wd(f32(sa_out_w).T)                         # (D, D)
    sa_bo = f32(sa_out_b).reshape(1, d)

    # cross-attn: q takes the target, k/v take memory -> split (D, D) + (D, 2D).
    ca_in_w_t = f32(ca_in_w).T                          # (D, 3D)
    ca_wq = wd(ca_in_w_t[:, 0:d])
    ca_wkv = wd(ca_in_w_t[:, d:3 * d])
    ca_bq = f32(ca_in_b)[0:d].reshape(1, d)
    ca_bkv = f32(ca_in_b)[d:3 * d].reshape(1, 2 * d)
    ca_wo = wd(f32(ca_out_w).T)
    ca_bo = f32(ca_out_b).reshape(1, d)

    ln1 = jnp.stack([f32(ln1_g), f32(ln1_b)])           # (2, D)
    ln2 = jnp.stack([f32(ln2_g), f32(ln2_b)])
    ln3 = jnp.stack([f32(ln3_g), f32(ln3_b)])

    w1p = wd(f32(w1).T)                                 # (D, F)
    b1p = f32(b1).reshape(1, -1)                        # (1, F)
    w2p = wd(f32(w2).T)                                 # (F, D)
    b2p = f32(b2).reshape(1, -1)                        # (1, D)

    return (sa_wqkv, sa_bqkv, sa_wo, sa_bo,
            ca_wq, ca_bq, ca_wkv, ca_bkv, ca_wo, ca_bo,
            ln1, ln2, ln3, w1p, b1p, w2p, b2p)


# --------------------------------- the wrapper ---------------------------------

def _pick_block_b(b):
    """Largest divisor of b that is <= 8 while keeping >= 2 grid steps when possible
    (so both TensorCores can be used on v7x under dimension_semantics=('parallel',))."""
    if b <= 1:
        return 1
    upper = max(1, min(8, b // 2))
    for cand in range(upper, 0, -1):
        if b % cand == 0:
            return cand
    return 1


def decoder_layer_forward(tgt, memory, prep, nhead, *, approx_recip=True,
                          block_b=None, single_buffer_weights=False):
    """tgt: (B, Tq, D); memory: (B, Tk, D). prep = prepare_params(...)."""
    b_sz, tq, d = tgt.shape
    tk = memory.shape[1]
    if block_b is None:
        block_b = _pick_block_b(b_sz)
    assert b_sz % block_b == 0, (b_sz, block_b)
    grid = (b_sz // block_b,)

    weight_kwargs = {}
    if single_buffer_weights:
        # Constant-index weight blocks never change -> a second pipeline buffer is waste.
        # Recommended on v7x (64 MiB VMEM) with large d_model / dim_feedforward.
        weight_kwargs = dict(pipeline_mode=pl.Buffered(1))

    def full(a):  # weights resident in VMEM across the whole batch grid
        nd = a.ndim
        return pl.BlockSpec(a.shape, lambda i, nd=nd: (0,) * nd, **weight_kwargs)

    kernel = functools.partial(decoder_layer_kernel, nhead=nhead,
                               approx_recip=approx_recip)
    return pl.pallas_call(
        kernel,
        out_shape=jax.ShapeDtypeStruct((b_sz, tq, d), tgt.dtype),
        grid=grid,
        in_specs=[
            pl.BlockSpec((block_b, tq, d), lambda i: (i, 0, 0)),
            pl.BlockSpec((block_b, tk, d), lambda i: (i, 0, 0)),
            *[full(a) for a in prep],
        ],
        out_specs=pl.BlockSpec((block_b, tq, d), lambda i: (i, 0, 0)),
        compiler_params=pltpu.CompilerParams(
            dimension_semantics=("parallel",),
            # v5e's default scoped VMEM is only 16 MiB; raise it so resident weights at
            # realistic d_model/dim_feedforward still fit. Stays within v7x's 64 MiB.
            vmem_limit_bytes=64 * 1024 * 1024),
    )(tgt, memory, *prep)


# ------------------------------ pure-JAX reference ------------------------------

def _mha_reference(x_q, x_kv, in_w, in_b, out_w, out_b, nhead):
    d = x_q.shape[-1]
    hd = d // nhead
    wq, wk, wv = jnp.split(in_w, 3, axis=0)
    bq, bk, bv = jnp.split(in_b, 3)
    q = x_q @ wq.T + bq
    k = x_kv @ wk.T + bk
    v = x_kv @ wv.T + bv
    b_sz, tq, _ = q.shape
    tk = k.shape[1]
    q = q.reshape(b_sz, tq, nhead, hd).transpose(0, 2, 1, 3)
    k = k.reshape(b_sz, tk, nhead, hd).transpose(0, 2, 1, 3)
    v = v.reshape(b_sz, tk, nhead, hd).transpose(0, 2, 1, 3)
    s = jnp.einsum('bhqd,bhkd->bhqk', q, k) * (1.0 / math.sqrt(hd))
    p = jax.nn.softmax(s, axis=-1)
    o = jnp.einsum('bhqk,bhkd->bhqd', p, v)
    o = o.transpose(0, 2, 1, 3).reshape(b_sz, tq, d)
    return o @ out_w.T + out_b


def _ln_reference(x, g, b):
    mu = x.mean(-1, keepdims=True)
    var = ((x - mu) ** 2).mean(-1, keepdims=True)
    return (x - mu) / jnp.sqrt(var + LN_EPS) * g + b


def decoder_layer_reference(tgt, memory, params, nhead):
    (sa_in_w, sa_in_b, sa_out_w, sa_out_b,
     ca_in_w, ca_in_b, ca_out_w, ca_out_b,
     ln1_g, ln1_b, ln2_g, ln2_b, ln3_g, ln3_b,
     w1, b1, w2, b2) = params
    x = tgt
    sa = _mha_reference(x, x, sa_in_w, sa_in_b, sa_out_w, sa_out_b, nhead)
    x = _ln_reference(x + sa, ln1_g, ln1_b)
    ca = _mha_reference(x, memory, ca_in_w, ca_in_b, ca_out_w, ca_out_b, nhead)
    x = _ln_reference(x + ca, ln2_g, ln2_b)
    ff = jax.nn.relu(x @ w1.T + b1) @ w2.T + b2
    x = _ln_reference(x + ff, ln3_g, ln3_b)
    return x


# -------------------------------------- main --------------------------------------

if __name__ == "__main__":
    # Make f32 matmuls true f32 on both the reference and the kernel so the precise
    # self-check can stay tight.
    jax.config.update("jax_default_matmul_precision", "highest")

    # Small shapes consistent with the module: batch=2, tgt seq=8, memory seq=16,
    # d_model=32, nhead=4, dim_feedforward=64.
    B, TQ, TK, D, H, F = 2, 8, 16, 32, 4, 64

    key = jax.random.PRNGKey(0)
    ks = jax.random.split(key, 20)
    init = lambda k, shape, s=0.1: s * jax.random.normal(k, shape, jnp.float32)

    # PyTorch parameter layouts: MHA in_proj (3D, D)/(3D,), out_proj (D, D)/(D,);
    # Linear1 (F, D)/(F,); Linear2 (D, F)/(D,); LayerNorm gamma/beta (D,).
    params = (
        init(ks[0], (3 * D, D)), init(ks[1], (3 * D,)),        # self-attn in_proj
        init(ks[2], (D, D)), init(ks[3], (D,)),                 # self-attn out_proj
        init(ks[4], (3 * D, D)), init(ks[5], (3 * D,)),         # cross-attn in_proj
        init(ks[6], (D, D)), init(ks[7], (D,)),                 # cross-attn out_proj
        1.0 + init(ks[8], (D,)), init(ks[9], (D,)),             # norm1
        1.0 + init(ks[10], (D,)), init(ks[11], (D,)),           # norm2
        1.0 + init(ks[12], (D,)), init(ks[13], (D,)),           # norm3
        init(ks[14], (F, D)), init(ks[15], (F,)),               # linear1
        init(ks[16], (D, F)), init(ks[17], (D,)),               # linear2
    )
    tgt = jax.random.normal(ks[18], (B, TQ, D), jnp.float32)
    memory = jax.random.normal(ks[19], (B, TK, D), jnp.float32)

    ref = decoder_layer_reference(tgt, memory, params, H)

    # 1) Precise path: f32 MXU operands + exact softmax divide — tight numerics check.
    prep_f32 = prepare_params(params, H, compute_dtype=jnp.float32)
    out_f32 = decoder_layer_forward(tgt, memory, prep_f32, H, approx_recip=False)
    jax.block_until_ready(out_f32)
    assert out_f32.shape == ref.shape, (out_f32.shape, ref.shape)
    np.testing.assert_allclose(np.asarray(out_f32), np.asarray(ref), rtol=1e-4, atol=1e-4)

    # 2) Fast path (production config): bf16 MXU operands, f32 accumulation, f32
    #    LayerNorm/softmax, EUP approx reciprocal — looser tolerance for bf16 operands.
    prep_bf16 = prepare_params(params, H, compute_dtype=jnp.bfloat16)
    out_bf16 = decoder_layer_forward(tgt, memory, prep_bf16, H, approx_recip=True)
    jax.block_until_ready(out_bf16)
    np.testing.assert_allclose(np.asarray(out_bf16), np.asarray(ref), rtol=3e-2, atol=3e-2)

    # TODO(synk): optional attn_mask / key_padding_mask, pos / query_pos embeddings,
    # train-mode dropout RNG, return_cross_attn, the normalize_before=True (pre-norm)
    # branch, and an fp8 weight path for v7x are not exercised here (defaults / eval).
    print("KERNEL_OK")
</pallas_src>

<mosaic_0001>
module attributes {stable_mosaic.version = 11 : i64} {
  func.func @decoder_layer_kernel(%arg0: i32, %arg1: memref<1x8x32xf32, #tpu.memory_space<vmem>>, %arg2: memref<1x16x32xf32, #tpu.memory_space<vmem>>, %arg3: memref<32x96xf32, #tpu.memory_space<vmem>>, %arg4: memref<1x96xf32, #tpu.memory_space<vmem>>, %arg5: memref<32x32xf32, #tpu.memory_space<vmem>>, %arg6: memref<1x32xf32, #tpu.memory_space<vmem>>, %arg7: memref<32x32xf32, #tpu.memory_space<vmem>>, %arg8: memref<1x32xf32, #tpu.memory_space<vmem>>, %arg9: memref<32x64xf32, #tpu.memory_space<vmem>>, %arg10: memref<1x64xf32, #tpu.memory_space<vmem>>, %arg11: memref<32x32xf32, #tpu.memory_space<vmem>>, %arg12: memref<1x32xf32, #tpu.memory_space<vmem>>, %arg13: memref<2x32xf32, #tpu.memory_space<vmem>>, %arg14: memref<2x32xf32, #tpu.memory_space<vmem>>, %arg15: memref<2x32xf32, #tpu.memory_space<vmem>>, %arg16: memref<32x64xf32, #tpu.memory_space<vmem>>, %arg17: memref<1x64xf32, #tpu.memory_space<vmem>>, %arg18: memref<64x32xf32, #tpu.memory_space<vmem>>, %arg19: memref<1x32xf32, #tpu.memory_space<vmem>>, %arg20: memref<1x8x32xf32, #tpu.memory_space<vmem>>) attributes {dimension_semantics = [#tpu.dimension_semantics<parallel>], iteration_bounds = array<i64: 2>, scalar_prefetch = 0 : i64, scratch_operands = 0 : i64, tpu.core_type = #tpu.core_type<tc>, window_params = [{transform_indices = @transform_0, window_bounds = array<i64: 1, 8, 32>}, {transform_indices = @transform_1, window_bounds = array<i64: 1, 16, 32>}, {pipeline_mode = #tpu.pipeline_mode<synchronous>, transform_indices = @transform_2, window_bounds = array<i64: 32, 96>}, {pipeline_mode = #tpu.pipeline_mode<synchronous>, transform_indices = @transform_3, window_bounds = array<i64: 1, 96>}, {pipeline_mode = #tpu.pipeline_mode<synchronous>, transform_indices = @transform_4, window_bounds = array<i64: 32, 32>}, {pipeline_mode = #tpu.pipeline_mode<synchronous>, transform_indices = @transform_5, window_bounds = array<i64: 1, 32>}, {pipeline_mode = #tpu.pipeline_mode<synchronous>, transform_indices = @transform_6, window_bounds = array<i64: 32, 32>}, {pipeline_mode = #tpu.pipeline_mode<synchronous>, transform_indices = @transform_7, window_bounds = array<i64: 1, 32>}, {pipeline_mode = #tpu.pipeline_mode<synchronous>, transform_indices = @transform_8, window_bounds = array<i64: 32, 64>}, {pipeline_mode = #tpu.pipeline_mode<synchronous>, transform_indices = @transform_9, window_bounds = array<i64: 1, 64>}, {pipeline_mode = #tpu.pipeline_mode<synchronous>, transform_indices = @transform_10, window_bounds = array<i64: 32, 32>}, {pipeline_mode = #tpu.pipeline_mode<synchronous>, transform_indices = @transform_11, window_bounds = array<i64: 1, 32>}, {pipeline_mode = #tpu.pipeline_mode<synchronous>, transform_indices = @transform_12, window_bounds = array<i64: 2, 32>}, {pipeline_mode = #tpu.pipeline_mode<synchronous>, transform_indices = @transform_13, window_bounds = array<i64: 2, 32>}, {pipeline_mode = #tpu.pipeline_mode<synchronous>, transform_indices = @transform_14, window_bounds = array<i64: 2, 32>}, {pipeline_mode = #tpu.pipeline_mode<synchronous>, transform_indices = @transform_15, window_bounds = array<i64: 32, 64>}, {pipeline_mode = #tpu.pipeline_mode<synchronous>, transform_indices = @transform_16, window_bounds = array<i64: 1, 64>}, {pipeline_mode = #tpu.pipeline_mode<synchronous>, transform_indices = @transform_17, window_bounds = array<i64: 64, 32>}, {pipeline_mode = #tpu.pipeline_mode<synchronous>, transform_indices = @transform_18, window_bounds = array<i64: 1, 32>}, {transform_indices = @transform_19, window_bounds = array<i64: 1, 8, 32>}]} {
    %c0 = arith.constant 0 : index
    %c0_0 = arith.constant 0 : index
    %c0_1 = arith.constant 0 : index
    %0 = vector.load %arg1[%c0, %c0_0, %c0_1] : memref<1x8x32xf32, #tpu.memory_space<vmem>>, vector<1x8x32xf32>
    %1 = vector.shape_cast %0 : vector<1x8x32xf32> to vector<8x32xf32>
    %c0_2 = arith.constant 0 : index
    %c0_3 = arith.constant 0 : index
    %c0_4 = arith.constant 0 : index
    %2 = vector.load %arg2[%c0_2, %c0_3, %c0_4] : memref<1x16x32xf32, #tpu.memory_space<vmem>>, vector<1x16x32xf32>
    %3 = vector.shape_cast %2 : vector<1x16x32xf32> to vector<16x32xf32>
    %c0_5 = arith.constant 0 : index
    %c0_6 = arith.constant 0 : index
    %4 = vector.load %arg3[%c0_5, %c0_6] : memref<32x96xf32, #tpu.memory_space<vmem>>, vector<32x96xf32>
    %cst = arith.constant dense<0.000000e+00> : vector<8x96xf32>
    %5 = tpu.matmul %1, %4, %cst {dimension_numbers = #tpu.dot_dimension_numbers<[1], [0], [0], [1], [0, 0, 1, 1], [], []>, precision = #tpu.contract_precision<fp32>} : vector<8x32xf32>, vector<32x96xf32>, vector<8x96xf32> -> vector<8x96xf32>
    %c0_7 = arith.constant 0 : index
    %c0_8 = arith.constant 0 : index
    %6 = vector.load %arg4[%c0_7, %c0_8] : memref<1x96xf32, #tpu.memory_space<vmem>>, vector<1x96xf32>
    %7 = vector.broadcast %6 : vector<1x96xf32> to vector<8x96xf32>
    %8 = arith.addf %5, %7 : vector<8x96xf32>
    %9 = vector.extract_strided_slice %8 {offsets = [0, 0], sizes = [8, 32], strides = [1, 1]} : vector<8x96xf32> to vector<8x32xf32>
    %10 = vector.extract_strided_slice %8 {offsets = [0, 32], sizes = [8, 32], strides = [1, 1]} : vector<8x96xf32> to vector<8x32xf32>
    %11 = vector.extract_strided_slice %8 {offsets = [0, 64], sizes = [8, 32], strides = [1, 1]} : vector<8x96xf32> to vector<8x32xf32>
    %12 = vector.extract_strided_slice %9 {offsets = [0, 0], sizes = [8, 8], strides = [1, 1]} : vector<8x32xf32> to vector<8x8xf32>
    %13 = vector.shape_cast %12 : vector<8x8xf32> to vector<1x8x8xf32>
    %14 = vector.extract_strided_slice %10 {offsets = [0, 0], sizes = [8, 8], strides = [1, 1]} : vector<8x32xf32> to vector<8x8xf32>
    %15 = vector.shape_cast %14 : vector<8x8xf32> to vector<1x8x8xf32>
    %16 = vector.extract_strided_slice %11 {offsets = [0, 0], sizes = [8, 8], strides = [1, 1]} : vector<8x32xf32> to vector<8x8xf32>
    %17 = vector.shape_cast %16 : vector<8x8xf32> to vector<1x8x8xf32>
    "tpu.trace_start"() <{level = 10 : i32, message = "bqd,bkd->bqk"}> : () -> ()
    %cst_9 = arith.constant dense<0.000000e+00> : vector<1x8x8xf32>
    %18 = tpu.matmul %13, %15, %cst_9 {dimension_numbers = #tpu.dot_dimension_numbers<[2], [2], [1], [1], [0, 0, 0, 1, 1, 1], [0], [0]>, precision = #tpu.contract_precision<fp32>} : vector<1x8x8xf32>, vector<1x8x8xf32>, vector<1x8x8xf32> -> vector<1x8x8xf32>
    "tpu.trace_stop"() : () -> ()
    %cst_10 = arith.constant 0.353553385 : f32
    %19 = vector.broadcast %cst_10 : f32 to vector<1x8x8xf32>
    %20 = arith.mulf %18, %19 : vector<1x8x8xf32>
    %cst_11 = arith.constant dense<0xFF800000> : vector<1x8xf32>
    %21 = vector.multi_reduction <maximumf>, %20, %cst_11 [2] : vector<1x8x8xf32> to vector<1x8xf32>
    %22 = vector.shape_cast %21 : vector<1x8xf32> to vector<1x8x1xf32>
    %23 = vector.broadcast %22 : vector<1x8x1xf32> to vector<1x8x8xf32>
    %24 = arith.subf %20, %23 : vector<1x8x8xf32>
    %25 = math.exp %24 : vector<1x8x8xf32>
    %cst_12 = arith.constant dense<0.000000e+00> : vector<1x8xf32>
    %26 = vector.multi_reduction <add>, %25, %cst_12 [2] : vector<1x8x8xf32> to vector<1x8xf32>
    %27 = vector.shape_cast %26 : vector<1x8xf32> to vector<1x8x1xf32>
    %28 = vector.broadcast %27 : vector<1x8x1xf32> to vector<1x8x8xf32>
    %29 = arith.divf %25, %28 : vector<1x8x8xf32>
    "tpu.trace_start"() <{level = 10 : i32, message = "bqk,bkd->bqd"}> : () -> ()
    %cst_13 = arith.constant dense<0.000000e+00> : vector<1x8x8xf32>
    %30 = tpu.matmul %29, %17, %cst_13 {dimension_numbers = #tpu.dot_dimension_numbers<[2], [1], [1], [2], [0, 0, 0, 1, 1, 2], [0], [0]>, precision = #tpu.contract_precision<fp32>} : vector<1x8x8xf32>, vector<1x8x8xf32>, vector<1x8x8xf32> -> vector<1x8x8xf32>
    "tpu.trace_stop"() : () -> ()
    %31 = vector.extract_strided_slice %9 {offsets = [0, 8], sizes = [8, 8], strides = [1, 1]} : vector<8x32xf32> to vector<8x8xf32>
    %32 = vector.shape_cast %31 : vector<8x8xf32> to vector<1x8x8xf32>
    %33 = vector.extract_strided_slice %10 {offsets = [0, 8], sizes = [8, 8], strides = [1, 1]} : vector<8x32xf32> to vector<8x8xf32>
    %34 = vector.shape_cast %33 : vector<8x8xf32> to vector<1x8x8xf32>
    %35 = vector.extract_strided_slice %11 {offsets = [0, 8], sizes = [8, 8], strides = [1, 1]} : vector<8x32xf32> to vector<8x8xf32>
    %36 = vector.shape_cast %35 : vector<8x8xf32> to vector<1x8x8xf32>
    "tpu.trace_start"() <{level = 10 : i32, message = "bqd,bkd->bqk"}> : () -> ()
    %cst_14 = arith.constant dense<0.000000e+00> : vector<1x8x8xf32>
    %37 = tpu.matmul %32, %34, %cst_14 {dimension_numbers = #tpu.dot_dimension_numbers<[2], [2], [1], [1], [0, 0, 0, 1, 1, 1], [0], [0]>, precision = #tpu.contract_precision<fp32>} : vector<1x8x8xf32>, vector<1x8x8xf32>, vector<1x8x8xf32> -> vector<1x8x8xf32>
    "tpu.trace_stop"() : () -> ()
    %cst_15 = arith.constant 0.353553385 : f32
    %38 = vector.broadcast %cst_15 : f32 to vector<1x8x8xf32>
    %39 = arith.mulf %37, %38 : vector<1x8x8xf32>
    %cst_16 = arith.constant dense<0xFF800000> : vector<1x8xf32>
    %40 = vector.multi_reduction <maximumf>, %39, %cst_16 [2] : vector<1x8x8xf32> to vector<1x8xf32>
    %41 = vector.shape_cast %40 : vector<1x8xf32> to vector<1x8x1xf32>
    %42 = vector.broadcast %41 : vector<1x8x1xf32> to vector<1x8x8xf32>
    %43 = arith.subf %39, %42 : vector<1x8x8xf32>
    %44 = math.exp %43 : vector<1x8x8xf32>
    %cst_17 = arith.constant dense<0.000000e+00> : vector<1x8xf32>
    %45 = vector.multi_reduction <add>, %44, %cst_17 [2] : vector<1x8x8xf32> to vector<1x8xf32>
    %46 = vector.shape_cast %45 : vector<1x8xf32> to vector<1x8x1xf32>
    %47 = vector.broadcast %46 : vector<1x8x1xf32> to vector<1x8x8xf32>
    %48 = arith.divf %44, %47 : vector<1x8x8xf32>
    "tpu.trace_start"() <{level = 10 : i32, message = "bqk,bkd->bqd"}> : () -> ()
    %cst_18 = arith.constant dense<0.000000e+00> : vector<1x8x8xf32>
    %49 = tpu.matmul %48, %36, %cst_18 {dimension_numbers = #tpu.dot_dimension_numbers<[2], [1], [1], [2], [0, 0, 0, 1, 1, 2], [0], [0]>, precision = #tpu.contract_precision<fp32>} : vector<1x8x8xf32>, vector<1x8x8xf32>, vector<1x8x8xf32> -> vector<1x8x8xf32>
    "tpu.trace_stop"() : () -> ()
    %50 = vector.extract_strided_slice %9 {offsets = [0, 16], sizes = [8, 8], strides = [1, 1]} : vector<8x32xf32> to vector<8x8xf32>
    %51 = vector.shape_cast %50 : vector<8x8xf32> to vector<1x8x8xf32>
    %52 = vector.extract_strided_slice %10 {offsets = [0, 16], sizes = [8, 8], strides = [1, 1]} : vector<8x32xf32> to vector<8x8xf32>
    %53 = vector.shape_cast %52 : vector<8x8xf32> to vector<1x8x8xf32>
    %54 = vector.extract_strided_slice %11 {offsets = [0, 16], sizes = [8, 8], strides = [1, 1]} : vector<8x32xf32> to vector<8x8xf32>
    %55 = vector.shape_cast %54 : vector<8x8xf32> to vector<1x8x8xf32>
    "tpu.trace_start"() <{level = 10 : i32, message = "bqd,bkd->bqk"}> : () -> ()
    %cst_19 = arith.constant dense<0.000000e+00> : vector<1x8x8xf32>
    %56 = tpu.matmul %51, %53, %cst_19 {dimension_numbers = #tpu.dot_dimension_numbers<[2], [2], [1], [1], [0, 0, 0, 1, 1, 1], [0], [0]>, precision = #tpu.contract_precision<fp32>} : vector<1x8x8xf32>, vector<1x8x8xf32>, vector<1x8x8xf32> -> vector<1x8x8xf32>
    "tpu.trace_stop"() : () -> ()
    %cst_20 = arith.constant 0.353553385 : f32
    %57 = vector.broadcast %cst_20 : f32 to vector<1x8x8xf32>
    %58 = arith.mulf %56, %57 : vector<1x8x8xf32>
    %cst_21 = arith.constant dense<0xFF800000> : vector<1x8xf32>
    %59 = vector.multi_reduction <maximumf>, %58, %cst_21 [2] : vector<1x8x8xf32> to vector<1x8xf32>
    %60 = vector.shape_cast %59 : vector<1x8xf32> to vector<1x8x1xf32>
    %61 = vector.broadcast %60 : vector<1x8x1xf32> to vector<1x8x8xf32>
    %62 = arith.subf %58, %61 : vector<1x8x8xf32>
    %63 = math.exp %62 : vector<1x8x8xf32>
    %cst_22 = arith.constant dense<0.000000e+00> : vector<1x8xf32>
    %64 = vector.multi_reduction <add>, %63, %cst_22 [2] : vector<1x8x8xf32> to vector<1x8xf32>
    %65 = vector.shape_cast %64 : vector<1x8xf32> to vector<1x8x1xf32>
    %66 = vector.broadcast %65 : vector<1x8x1xf32> to vector<1x8x8xf32>
    %67 = arith.divf %63, %66 : vector<1x8x8xf32>
    "tpu.trace_start"() <{level = 10 : i32, message = "bqk,bkd->bqd"}> : () -> ()
    %cst_23 = arith.constant dense<0.000000e+00> : vector<1x8x8xf32>
    %68 = tpu.matmul %67, %55, %cst_23 {dimension_numbers = #tpu.dot_dimension_numbers<[2], [1], [1], [2], [0, 0, 0, 1, 1, 2], [0], [0]>, precision = #tpu.contract_precision<fp32>} : vector<1x8x8xf32>, vector<1x8x8xf32>, vector<1x8x8xf32> -> vector<1x8x8xf32>
    "tpu.trace_stop"() : () -> ()
    %69 = vector.extract_strided_slice %9 {offsets = [0, 24], sizes = [8, 8], strides = [1, 1]} : vector<8x32xf32> to vector<8x8xf32>
    %70 = vector.shape_cast %69 : vector<8x8xf32> to vector<1x8x8xf32>
    %71 = vector.extract_strided_slice %10 {offsets = [0, 24], sizes = [8, 8], strides = [1, 1]} : vector<8x32xf32> to vector<8x8xf32>
    %72 = vector.shape_cast %71 : vector<8x8xf32> to vector<1x8x8xf32>
    %73 = vector.extract_strided_slice %11 {offsets = [0, 24], sizes = [8, 8], strides = [1, 1]} : vector<8x32xf32> to vector<8x8xf32>
    %74 = vector.shape_cast %73 : vector<8x8xf32> to vector<1x8x8xf32>
    "tpu.trace_start"() <{level = 10 : i32, message = "bqd,bkd->bqk"}> : () -> ()
    %cst_24 = arith.constant dense<0.000000e+00> : vector<1x8x8xf32>
    %75 = tpu.matmul %70, %72, %cst_24 {dimension_numbers = #tpu.dot_dimension_numbers<[2], [2], [1], [1], [0, 0, 0, 1, 1, 1], [0], [0]>, precision = #tpu.contract_precision<fp32>} : vector<1x8x8xf32>, vector<1x8x8xf32>, vector<1x8x8xf32> -> vector<1x8x8xf32>
    "tpu.trace_stop"() : () -> ()
    %cst_25 = arith.constant 0.353553385 : f32
    %76 = vector.broadcast %cst_25 : f32 to vector<1x8x8xf32>
    %77 = arith.mulf %75, %76 : vector<1x8x8xf32>
    %cst_26 = arith.constant dense<0xFF800000> : vector<1x8xf32>
    %78 = vector.multi_reduction <maximumf>, %77, %cst_26 [2] : vector<1x8x8xf32> to vector<1x8xf32>
    %79 = vector.shape_cast %78 : vector<1x8xf32> to vector<1x8x1xf32>
    %80 = vector.broadcast %79 : vector<1x8x1xf32> to vector<1x8x8xf32>
    %81 = arith.subf %77, %80 : vector<1x8x8xf32>
    %82 = math.exp %81 : vector<1x8x8xf32>
    %cst_27 = arith.constant dense<0.000000e+00> : vector<1x8xf32>
    %83 = vector.multi_reduction <add>, %82, %cst_27 [2] : vector<1x8x8xf32> to vector<1x8xf32>
    %84 = vector.shape_cast %83 : vector<1x8xf32> to vector<1x8x1xf32>
    %85 = vector.broadcast %84 : vector<1x8x1xf32> to vector<1x8x8xf32>
    %86 = arith.divf %82, %85 : vector<1x8x8xf32>
    "tpu.trace_start"() <{level = 10 : i32, message = "bqk,bkd->bqd"}> : () -> ()
    %cst_28 = arith.constant dense<0.000000e+00> : vector<1x8x8xf32>
    %87 = tpu.matmul %86, %74, %cst_28 {dimension_numbers = #tpu.dot_dimension_numbers<[2], [1], [1], [2], [0, 0, 0, 1, 1, 2], [0], [0]>, precision = #tpu.contract_precision<fp32>} : vector<1x8x8xf32>, vector<1x8x8xf32>, vector<1x8x8xf32> -> vector<1x8x8xf32>
    "tpu.trace_stop"() : () -> ()
    %88 = tpu.concatenate %30, %49, %68, %87 in 2 : vector<1x8x8xf32>, vector<1x8x8xf32>, vector<1x8x8xf32>, vector<1x8x8xf32> -> vector<1x8x32xf32>
    %89 = vector.shape_cast %88 : vector<1x8x32xf32> to vector<8x32xf32>
    %c0_29 = arith.constant 0 : index
    %c0_30 = arith.constant 0 : index
    %90 = vector.load %arg5[%c0_29, %c0_30] : memref<32x32xf32, #tpu.memory_space<vmem>>, vector<32x32xf32>
    %cst_31 = arith.constant dense<0.000000e+00> : vector<8x32xf32>
    %91 = tpu.matmul %89, %90, %cst_31 {dimension_numbers = #tpu.dot_dimension_numbers<[1], [0], [0], [1], [0, 0, 1, 1], [], []>, precision = #tpu.contract_precision<fp32>} : vector<8x32xf32>, vector<32x32xf32>, vector<8x32xf32> -> vector<8x32xf32>
    %c0_32 = arith.constant 0 : index
    %c0_33 = arith.constant 0 : index
    %92 = vector.load %arg6[%c0_32, %c0_33] : memref<1x32xf32, #tpu.memory_space<vmem>>, vector<1x32xf32>
    %93 = vector.broadcast %92 : vector<1x32xf32> to vector<8x32xf32>
    %94 = arith.addf %91, %93 : vector<8x32xf32>
    %95 = arith.addf %1, %94 : vector<8x32xf32>
    %c0_34 = arith.constant 0 : index
    %c0_35 = arith.constant 0 : index
    %96 = vector.load %arg13[%c0_34, %c0_35] : memref<2x32xf32, #tpu.memory_space<vmem>>, vector<2x32xf32>
    %97 = vector.extract_strided_slice %96 {offsets = [0, 0], sizes = [1, 32], strides = [1, 1]} : vector<2x32xf32> to vector<1x32xf32>
    %98 = vector.extract_strided_slice %96 {offsets = [1, 0], sizes = [1, 32], strides = [1, 1]} : vector<2x32xf32> to vector<1x32xf32>
    %cst_36 = arith.constant dense<0.000000e+00> : vector<8xf32>
    %99 = vector.multi_reduction <add>, %95, %cst_36 [1] : vector<8x32xf32> to vector<8xf32>
    %100 = vector.shape_cast %99 : vector<8xf32> to vector<8x1xf32>
    %cst_37 = arith.constant 3.200000e+01 : f32
    %101 = vector.broadcast %cst_37 : f32 to vector<8x1xf32>
    %102 = arith.divf %100, %101 : vector<8x1xf32>
    %103 = vector.broadcast %102 : vector<8x1xf32> to vector<8x32xf32>
    %104 = arith.subf %95, %103 : vector<8x32xf32>
    %105 = arith.mulf %104, %104 : vector<8x32xf32>
    %cst_38 = arith.constant dense<0.000000e+00> : vector<8xf32>
    %106 = vector.multi_reduction <add>, %105, %cst_38 [1] : vector<8x32xf32> to vector<8xf32>
    %107 = vector.shape_cast %106 : vector<8xf32> to vector<8x1xf32>
    %cst_39 = arith.constant 3.200000e+01 : f32
    %108 = vector.broadcast %cst_39 : f32 to vector<8x1xf32>
    %109 = arith.divf %107, %108 : vector<8x1xf32>
    %cst_40 = arith.constant 9.99999974E-6 : f32
    %110 = vector.broadcast %cst_40 : f32 to vector<8x1xf32>
    %111 = arith.addf %109, %110 : vector<8x1xf32>
    %112 = math.rsqrt %111 : vector<8x1xf32>
    %113 = vector.broadcast %112 : vector<8x1xf32> to vector<8x32xf32>
    %114 = arith.mulf %104, %113 : vector<8x32xf32>
    %115 = vector.broadcast %97 : vector<1x32xf32> to vector<8x32xf32>
    %116 = arith.mulf %114, %115 : vector<8x32xf32>
    %117 = vector.broadcast %98 : vector<1x32xf32> to vector<8x32xf32>
    %118 = arith.addf %116, %117 : vector<8x32xf32>
    %c0_41 = arith.constant 0 : index
    %c0_42 = arith.constant 0 : index
    %119 = vector.load %arg7[%c0_41, %c0_42] : memref<32x32xf32, #tpu.memory_space<vmem>>, vector<32x32xf32>
    %cst_43 = arith.constant dense<0.000000e+00> : vector<8x32xf32>
    %120 = tpu.matmul %118, %119, %cst_43 {dimension_numbers = #tpu.dot_dimension_numbers<[1], [0], [0], [1], [0, 0, 1, 1], [], []>, precision = #tpu.contract_precision<fp32>} : vector<8x32xf32>, vector<32x32xf32>, vector<8x32xf32> -> vector<8x32xf32>
    %c0_44 = arith.constant 0 : index
    %c0_45 = arith.constant 0 : index
    %121 = vector.load %arg8[%c0_44, %c0_45] : memref<1x32xf32, #tpu.memory_space<vmem>>, vector<1x32xf32>
    %122 = vector.broadcast %121 : vector<1x32xf32> to vector<8x32xf32>
    %123 = arith.addf %120, %122 : vector<8x32xf32>
    %c0_46 = arith.constant 0 : index
    %c0_47 = arith.constant 0 : index
    %124 = vector.load %arg9[%c0_46, %c0_47] : memref<32x64xf32, #tpu.memory_space<vmem>>, vector<32x64xf32>
    %cst_48 = arith.constant dense<0.000000e+00> : vector<16x64xf32>
    %125 = tpu.matmul %3, %124, %cst_48 {dimension_numbers = #tpu.dot_dimension_numbers<[1], [0], [0], [1], [0, 0, 1, 1], [], []>, precision = #tpu.contract_precision<fp32>} : vector<16x32xf32>, vector<32x64xf32>, vector<16x64xf32> -> vector<16x64xf32>
    %c0_49 = arith.constant 0 : index
    %c0_50 = arith.constant 0 : index
    %126 = vector.load %arg10[%c0_49, %c0_50] : memref<1x64xf32, #tpu.memory_space<vmem>>, vector<1x64xf32>
    %127 = vector.broadcast %126 : vector<1x64xf32> to vector<16x64xf32>
    %128 = arith.addf %125, %127 : vector<16x64xf32>
    %129 = vector.extract_strided_slice %128 {offsets = [0, 0], sizes = [16, 32], strides = [1, 1]} : vector<16x64xf32> to vector<16x32xf32>
    %130 = vector.extract_strided_slice %128 {offsets = [0, 32], sizes = [16, 32], strides = [1, 1]} : vector<16x64xf32> to vector<16x32xf32>
    %131 = vector.extract_strided_slice %123 {offsets = [0, 0], sizes = [8, 8], strides = [1, 1]} : vector<8x32xf32> to vector<8x8xf32>
    %132 = vector.shape_cast %131 : vector<8x8xf32> to vector<1x8x8xf32>
    %133 = vector.extract_strided_slice %129 {offsets = [0, 0], sizes = [16, 8], strides = [1, 1]} : vector<16x32xf32> to vector<16x8xf32>
    %134 = vector.shape_cast %133 : vector<16x8xf32> to vector<1x16x8xf32>
    %135 = vector.extract_strided_slice %130 {offsets = [0, 0], sizes = [16, 8], strides = [1, 1]} : vector<16x32xf32> to vector<16x8xf32>
    %136 = vector.shape_cast %135 : vector<16x8xf32> to vector<1x16x8xf32>
    "tpu.trace_start"() <{level = 10 : i32, message = "bqd,bkd->bqk"}> : () -> ()
    %cst_51 = arith.constant dense<0.000000e+00> : vector<1x8x16xf32>
    %137 = tpu.matmul %132, %134, %cst_51 {dimension_numbers = #tpu.dot_dimension_numbers<[2], [2], [1], [1], [0, 0, 0, 1, 1, 1], [0], [0]>, precision = #tpu.contract_precision<fp32>} : vector<1x8x8xf32>, vector<1x16x8xf32>, vector<1x8x16xf32> -> vector<1x8x16xf32>
    "tpu.trace_stop"() : () -> ()
    %cst_52 = arith.constant 0.353553385 : f32
    %138 = vector.broadcast %cst_52 : f32 to vector<1x8x16xf32>
    %139 = arith.mulf %137, %138 : vector<1x8x16xf32>
    %cst_53 = arith.constant dense<0xFF800000> : vector<1x8xf32>
    %140 = vector.multi_reduction <maximumf>, %139, %cst_53 [2] : vector<1x8x16xf32> to vector<1x8xf32>
    %141 = vector.shape_cast %140 : vector<1x8xf32> to vector<1x8x1xf32>
    %142 = vector.broadcast %141 : vector<1x8x1xf32> to vector<1x8x16xf32>
    %143 = arith.subf %139, %142 : vector<1x8x16xf32>
    %144 = math.exp %143 : vector<1x8x16xf32>
    %cst_54 = arith.constant dense<0.000000e+00> : vector<1x8xf32>
    %145 = vector.multi_reduction <add>, %144, %cst_54 [2] : vector<1x8x16xf32> to vector<1x8xf32>
    %146 = vector.shape_cast %145 : vector<1x8xf32> to vector<1x8x1xf32>
    %147 = vector.broadcast %146 : vector<1x8x1xf32> to vector<1x8x16xf32>
    %148 = arith.divf %144, %147 : vector<1x8x16xf32>
    "tpu.trace_start"() <{level = 10 : i32, message = "bqk,bkd->bqd"}> : () -> ()
    %cst_55 = arith.constant dense<0.000000e+00> : vector<1x8x8xf32>
    %149 = tpu.matmul %148, %136, %cst_55 {dimension_numbers = #tpu.dot_dimension_numbers<[2], [1], [1], [2], [0, 0, 0, 1, 1, 2], [0], [0]>, precision = #tpu.contract_precision<fp32>} : vector<1x8x16xf32>, vector<1x16x8xf32>, vector<1x8x8xf32> -> vector<1x8x8xf32>
    "tpu.trace_stop"() : () -> ()
    %150 = vector.extract_strided_slice %123 {offsets = [0, 8], sizes = [8, 8], strides = [1, 1]} : vector<8x32xf32> to vector<8x8xf32>
    %151 = vector.shape_cast %150 : vector<8x8xf32> to vector<1x8x8xf32>
    %152 = vector.extract_strided_slice %129 {offsets = [0, 8], sizes = [16, 8], strides = [1, 1]} : vector<16x32xf32> to vector<16x8xf32>
    %153 = vector.shape_cast %152 : vector<16x8xf32> to vector<1x16x8xf32>
    %154 = vector.extract_strided_slice %130 {offsets = [0, 8], sizes = [16, 8], strides = [1, 1]} : vector<16x32xf32> to vector<16x8xf32>
    %155 = vector.shape_cast %154 : vector<16x8xf32> to vector<1x16x8xf32>
    "tpu.trace_start"() <{level = 10 : i32, message = "bqd,bkd->bqk"}> : () -> ()
    %cst_56 = arith.constant dense<0.000000e+00> : vector<1x8x16xf32>
    %156 = tpu.matmul %151, %153, %cst_56 {dimension_numbers = #tpu.dot_dimension_numbers<[2], [2], [1], [1], [0, 0, 0, 1, 1, 1], [0], [0]>, precision = #tpu.contract_precision<fp32>} : vector<1x8x8xf32>, vector<1x16x8xf32>, vector<1x8x16xf32> -> vector<1x8x16xf32>
    "tpu.trace_stop"() : () -> ()
    %cst_57 = arith.constant 0.353553385 : f32
    %157 = vector.broadcast %cst_57 : f32 to vector<1x8x16xf32>
    %158 = arith.mulf %156, %157 : vector<1x8x16xf32>
    %cst_58 = arith.constant dense<0xFF800000> : vector<1x8xf32>
    %159 = vector.multi_reduction <maximumf>, %158, %cst_58 [2] : vector<1x8x16xf32> to vector<1x8xf32>
    %160 = vector.shape_cast %159 : vector<1x8xf32> to vector<1x8x1xf32>
    %161 = vector.broadcast %160 : vector<1x8x1xf32> to vector<1x8x16xf32>
    %162 = arith.subf %158, %161 : vector<1x8x16xf32>
    %163 = math.exp %162 : vector<1x8x16xf32>
    %cst_59 = arith.constant dense<0.000000e+00> : vector<1x8xf32>
    %164 = vector.multi_reduction <add>, %163, %cst_59 [2] : vector<1x8x16xf32> to vector<1x8xf32>
    %165 = vector.shape_cast %164 : vector<1x8xf32> to vector<1x8x1xf32>
    %166 = vector.broadcast %165 : vector<1x8x1xf32> to vector<1x8x16xf32>
    %167 = arith.divf %163, %166 : vector<1x8x16xf32>
    "tpu.trace_start"() <{level = 10 : i32, message = "bqk,bkd->bqd"}> : () -> ()
    %cst_60 = arith.constant dense<0.000000e+00> : vector<1x8x8xf32>
    %168 = tpu.matmul %167, %155, %cst_60 {dimension_numbers = #tpu.dot_dimension_numbers<[2], [1], [1], [2], [0, 0, 0, 1, 1, 2], [0], [0]>, precision = #tpu.contract_precision<fp32>} : vector<1x8x16xf32>, vector<1x16x8xf32>, vector<1x8x8xf32> -> vector<1x8x8xf32>
    "tpu.trace_stop"() : () -> ()
    %169 = vector.extract_strided_slice %123 {offsets = [0, 16], sizes = [8, 8], strides = [1, 1]} : vector<8x32xf32> to vector<8x8xf32>
    %170 = vector.shape_cast %169 : vector<8x8xf32> to vector<1x8x8xf32>
    %171 = vector.extract_strided_slice %129 {offsets = [0, 16], sizes = [16, 8], strides = [1, 1]} : vector<16x32xf32> to vector<16x8xf32>
    %172 = vector.shape_cast %171 : vector<16x8xf32> to vector<1x16x8xf32>
    %173 = vector.extract_strided_slice %130 {offsets = [0, 16], sizes = [16, 8], strides = [1, 1]} : vector<16x32xf32> to vector<16x8xf32>
    %174 = vector.shape_cast %173 : vector<16x8xf32> to vector<1x16x8xf32>
    "tpu.trace_start"() <{level = 10 : i32, message = "bqd,bkd->bqk"}> : () -> ()
    %cst_61 = arith.constant dense<0.000000e+00> : vector<1x8x16xf32>
    %175 = tpu.matmul %170, %172, %cst_61 {dimension_numbers = #tpu.dot_dimension_numbers<[2], [2], [1], [1], [0, 0, 0, 1, 1, 1], [0], [0]>, precision = #tpu.contract_precision<fp32>} : vector<1x8x8xf32>, vector<1x16x8xf32>, vector<1x8x16xf32> -> vector<1x8x16xf32>
    "tpu.trace_stop"() : () -> ()
    %cst_62 = arith.constant 0.353553385 : f32
    %176 = vector.broadcast %cst_62 : f32 to vector<1x8x16xf32>
    %177 = arith.mulf %175, %176 : vector<1x8x16xf32>
    %cst_63 = arith.constant dense<0xFF800000> : vector<1x8xf32>
    %178 = vector.multi_reduction <maximumf>, %177, %cst_63 [2] : vector<1x8x16xf32> to vector<1x8xf32>
    %179 = vector.shape_cast %178 : vector<1x8xf32> to vector<1x8x1xf32>
    %180 = vector.broadcast %179 : vector<1x8x1xf32> to vector<1x8x16xf32>
    %181 = arith.subf %177, %180 : vector<1x8x16xf32>
    %182 = math.exp %181 : vector<1x8x16xf32>
    %cst_64 = arith.constant dense<0.000000e+00> : vector<1x8xf32>
    %183 = vector.multi_reduction <add>, %182, %cst_64 [2] : vector<1x8x16xf32> to vector<1x8xf32>
    %184 = vector.shape_cast %183 : vector<1x8xf32> to vector<1x8x1xf32>
    %185 = vector.broadcast %184 : vector<1x8x1xf32> to vector<1x8x16xf32>
    %186 = arith.divf %182, %185 : vector<1x8x16xf32>
    "tpu.trace_start"() <{level = 10 : i32, message = "bqk,bkd->bqd"}> : () -> ()
    %cst_65 = arith.constant dense<0.000000e+00> : vector<1x8x8xf32>
    %187 = tpu.matmul %186, %174, %cst_65 {dimension_numbers = #tpu.dot_dimension_numbers<[2], [1], [1], [2], [0, 0, 0, 1, 1, 2], [0], [0]>, precision = #tpu.contract_precision<fp32>} : vector<1x8x16xf32>, vector<1x16x8xf32>, vector<1x8x8xf32> -> vector<1x8x8xf32>
    "tpu.trace_stop"() : () -> ()
    %188 = vector.extract_strided_slice %123 {offsets = [0, 24], sizes = [8, 8], strides = [1, 1]} : vector<8x32xf32> to vector<8x8xf32>
    %189 = vector.shape_cast %188 : vector<8x8xf32> to vector<1x8x8xf32>
    %190 = vector.extract_strided_slice %129 {offsets = [0, 24], sizes = [16, 8], strides = [1, 1]} : vector<16x32xf32> to vector<16x8xf32>
    %191 = vector.shape_cast %190 : vector<16x8xf32> to vector<1x16x8xf32>
    %192 = vector.extract_strided_slice %130 {offsets = [0, 24], sizes = [16, 8], strides = [1, 1]} : vector<16x32xf32> to vector<16x8xf32>
    %193 = vector.shape_cast %192 : vector<16x8xf32> to vector<1x16x8xf32>
    "tpu.trace_start"() <{level = 10 : i32, message = "bqd,bkd->bqk"}> : () -> ()
    %cst_66 = arith.constant dense<0.000000e+00> : vector<1x8x16xf32>
    %194 = tpu.matmul %189, %191, %cst_66 {dimension_numbers = #tpu.dot_dimension_numbers<[2], [2], [1], [1], [0, 0, 0, 1, 1, 1], [0], [0]>, precision = #tpu.contract_precision<fp32>} : vector<1x8x8xf32>, vector<1x16x8xf32>, vector<1x8x16xf32> -> vector<1x8x16xf32>
    "tpu.trace_stop"() : () -> ()
    %cst_67 = arith.constant 0.353553385 : f32
    %195 = vector.broadcast %cst_67 : f32 to vector<1x8x16xf32>
    %196 = arith.mulf %194, %195 : vector<1x8x16xf32>
    %cst_68 = arith.constant dense<0xFF800000> : vector<1x8xf32>
    %197 = vector.multi_reduction <maximumf>, %196, %cst_68 [2] : vector<1x8x16xf32> to vector<1x8xf32>
    %198 = vector.shape_cast %197 : vector<1x8xf32> to vector<1x8x1xf32>
    %199 = vector.broadcast %198 : vector<1x8x1xf32> to vector<1x8x16xf32>
    %200 = arith.subf %196, %199 : vector<1x8x16xf32>
    %201 = math.exp %200 : vector<1x8x16xf32>
    %cst_69 = arith.constant dense<0.000000e+00> : vector<1x8xf32>
    %202 = vector.multi_reduction <add>, %201, %cst_69 [2] : vector<1x8x16xf32> to vector<1x8xf32>
    %203 = vector.shape_cast %202 : vector<1x8xf32> to vector<1x8x1xf32>
    %204 = vector.broadcast %203 : vector<1x8x1xf32> to vector<1x8x16xf32>
    %205 = arith.divf %201, %204 : vector<1x8x16xf32>
    "tpu.trace_start"() <{level = 10 : i32, message = "bqk,bkd->bqd"}> : () -> ()
    %cst_70 = arith.constant dense<0.000000e+00> : vector<1x8x8xf32>
    %206 = tpu.matmul %205, %193, %cst_70 {dimension_numbers = #tpu.dot_dimension_numbers<[2], [1], [1], [2], [0, 0, 0, 1, 1, 2], [0], [0]>, precision = #tpu.contract_precision<fp32>} : vector<1x8x16xf32>, vector<1x16x8xf32>, vector<1x8x8xf32> -> vector<1x8x8xf32>
    "tpu.trace_stop"() : () -> ()
    %207 = tpu.concatenate %149, %168, %187, %206 in 2 : vector<1x8x8xf32>, vector<1x8x8xf32>, vector<1x8x8xf32>, vector<1x8x8xf32> -> vector<1x8x32xf32>
    %208 = vector.shape_cast %207 : vector<1x8x32xf32> to vector<8x32xf32>
    %c0_71 = arith.constant 0 : index
    %c0_72 = arith.constant 0 : index
    %209 = vector.load %arg11[%c0_71, %c0_72] : memref<32x32xf32, #tpu.memory_space<vmem>>, vector<32x32xf32>
    %cst_73 = arith.constant dense<0.000000e+00> : vector<8x32xf32>
    %210 = tpu.matmul %208, %209, %cst_73 {dimension_numbers = #tpu.dot_dimension_numbers<[1], [0], [0], [1], [0, 0, 1, 1], [], []>, precision = #tpu.contract_precision<fp32>} : vector<8x32xf32>, vector<32x32xf32>, vector<8x32xf32> -> vector<8x32xf32>
    %c0_74 = arith.constant 0 : index
    %c0_75 = arith.constant 0 : index
    %211 = vector.load %arg12[%c0_74, %c0_75] : memref<1x32xf32, #tpu.memory_space<vmem>>, vector<1x32xf32>
    %212 = vector.broadcast %211 : vector<1x32xf32> to vector<8x32xf32>
    %213 = arith.addf %210, %212 : vector<8x32xf32>
    %214 = arith.addf %118, %213 : vector<8x32xf32>
    %c0_76 = arith.constant 0 : index
    %c0_77 = arith.constant 0 : index
    %215 = vector.load %arg14[%c0_76, %c0_77] : memref<2x32xf32, #tpu.memory_space<vmem>>, vector<2x32xf32>
    %216 = vector.extract_strided_slice %215 {offsets = [0, 0], sizes = [1, 32], strides = [1, 1]} : vector<2x32xf32> to vector<1x32xf32>
    %217 = vector.extract_strided_slice %215 {offsets = [1, 0], sizes = [1, 32], strides = [1, 1]} : vector<2x32xf32> to vector<1x32xf32>
    %cst_78 = arith.constant dense<0.000000e+00> : vector<8xf32>
    %218 = vector.multi_reduction <add>, %214, %cst_78 [1] : vector<8x32xf32> to vector<8xf32>
    %219 = vector.shape_cast %218 : vector<8xf32> to vector<8x1xf32>
    %cst_79 = arith.constant 3.200000e+01 : f32
    %220 = vector.broadcast %cst_79 : f32 to vector<8x1xf32>
    %221 = arith.divf %219, %220 : vector<8x1xf32>
    %222 = vector.broadcast %221 : vector<8x1xf32> to vector<8x32xf32>
    %223 = arith.subf %214, %222 : vector<8x32xf32>
    %224 = arith.mulf %223, %223 : vector<8x32xf32>
    %cst_80 = arith.constant dense<0.000000e+00> : vector<8xf32>
    %225 = vector.multi_reduction <add>, %224, %cst_80 [1] : vector<8x32xf32> to vector<8xf32>
    %226 = vector.shape_cast %225 : vector<8xf32> to vector<8x1xf32>
    %cst_81 = arith.constant 3.200000e+01 : f32
    %227 = vector.broadcast %cst_81 : f32 to vector<8x1xf32>
    %228 = arith.divf %226, %227 : vector<8x1xf32>
    %cst_82 = arith.constant 9.99999974E-6 : f32
    %229 = vector.broadcast %cst_82 : f32 to vector<8x1xf32>
    %230 = arith.addf %228, %229 : vector<8x1xf32>
    %231 = math.rsqrt %230 : vector<8x1xf32>
    %232 = vector.broadcast %231 : vector<8x1xf32> to vector<8x32xf32>
    %233 = arith.mulf %223, %232 : vector<8x32xf32>
    %234 = vector.broadcast %216 : vector<1x32xf32> to vector<8x32xf32>
    %235 = arith.mulf %233, %234 : vector<8x32xf32>
    %236 = vector.broadcast %217 : vector<1x32xf32> to vector<8x32xf32>
    %237 = arith.addf %235, %236 : vector<8x32xf32>
    %c0_83 = arith.constant 0 : index
    %c0_84 = arith.constant 0 : index
    %238 = vector.load %arg16[%c0_83, %c0_84] : memref<32x64xf32, #tpu.memory_space<vmem>>, vector<32x64xf32>
    %cst_85 = arith.constant dense<0.000000e+00> : vector<8x64xf32>
    %239 = tpu.matmul %237, %238, %cst_85 {dimension_numbers = #tpu.dot_dimension_numbers<[1], [0], [0], [1], [0, 0, 1, 1], [], []>, precision = #tpu.contract_precision<fp32>} : vector<8x32xf32>, vector<32x64xf32>, vector<8x64xf32> -> vector<8x64xf32>
    %c0_86 = arith.constant 0 : index
    %c0_87 = arith.constant 0 : index
    %240 = vector.load %arg17[%c0_86, %c0_87] : memref<1x64xf32, #tpu.memory_space<vmem>>, vector<1x64xf32>
    %241 = vector.broadcast %240 : vector<1x64xf32> to vector<8x64xf32>
    %242 = arith.addf %239, %241 : vector<8x64xf32>
    %cst_88 = arith.constant 0.000000e+00 : f32
    %243 = vector.broadcast %cst_88 : f32 to vector<8x64xf32>
    %244 = arith.maximumf %242, %243 : vector<8x64xf32>
    %c0_89 = arith.constant 0 : index
    %c0_90 = arith.constant 0 : index
    %245 = vector.load %arg18[%c0_89, %c0_90] : memref<64x32xf32, #tpu.memory_space<vmem>>, vector<64x32xf32>
    %cst_91 = arith.constant dense<0.000000e+00> : vector<8x32xf32>
    %246 = tpu.matmul %244, %245, %cst_91 {dimension_numbers = #tpu.dot_dimension_numbers<[1], [0], [0], [1], [0, 0, 1, 1], [], []>, precision = #tpu.contract_precision<fp32>} : vector<8x64xf32>, vector<64x32xf32>, vector<8x32xf32> -> vector<8x32xf32>
    %c0_92 = arith.constant 0 : index
    %c0_93 = arith.constant 0 : index
    %247 = vector.load %arg19[%c0_92, %c0_93] : memref<1x32xf32, #tpu.memory_space<vmem>>, vector<1x32xf32>
    %248 = vector.broadcast %247 : vector<1x32xf32> to vector<8x32xf32>
    %249 = arith.addf %246, %248 : vector<8x32xf32>
    %250 = arith.addf %237, %249 : vector<8x32xf32>
    %c0_94 = arith.constant 0 : index
    %c0_95 = arith.constant 0 : index
    %251 = vector.load %arg15[%c0_94, %c0_95] : memref<2x32xf32, #tpu.memory_space<vmem>>, vector<2x32xf32>
    %252 = vector.extract_strided_slice %251 {offsets = [0, 0], sizes = [1, 32], strides = [1, 1]} : vector<2x32xf32> to vector<1x32xf32>
    %253 = vector.extract_strided_slice %251 {offsets = [1, 0], sizes = [1, 32], strides = [1, 1]} : vector<2x32xf32> to vector<1x32xf32>
    %cst_96 = arith.constant dense<0.000000e+00> : vector<8xf32>
    %254 = vector.multi_reduction <add>, %250, %cst_96 [1] : vector<8x32xf32> to vector<8xf32>
    %255 = vector.shape_cast %254 : vector<8xf32> to vector<8x1xf32>
    %cst_97 = arith.constant 3.200000e+01 : f32
    %256 = vector.broadcast %cst_97 : f32 to vector<8x1xf32>
    %257 = arith.divf %255, %256 : vector<8x1xf32>
    %258 = vector.broadcast %257 : vector<8x1xf32> to vector<8x32xf32>
    %259 = arith.subf %250, %258 : vector<8x32xf32>
    %260 = arith.mulf %259, %259 : vector<8x32xf32>
    %cst_98 = arith.constant dense<0.000000e+00> : vector<8xf32>
    %261 = vector.multi_reduction <add>, %260, %cst_98 [1] : vector<8x32xf32> to vector<8xf32>
    %262 = vector.shape_cast %261 : vector<8xf32> to vector<8x1xf32>
    %cst_99 = arith.constant 3.200000e+01 : f32
    %263 = vector.broadcast %cst_99 : f32 to vector<8x1xf32>
    %264 = arith.divf %262, %263 : vector<8x1xf32>
    %cst_100 = arith.constant 9.99999974E-6 : f32
    %265 = vector.broadcast %cst_100 : f32 to vector<8x1xf32>
    %266 = arith.addf %264, %265 : vector<8x1xf32>
    %267 = math.rsqrt %266 : vector<8x1xf32>
    %268 = vector.broadcast %267 : vector<8x1xf32> to vector<8x32xf32>
    %269 = arith.mulf %259, %268 : vector<8x32xf32>
    %270 = vector.broadcast %252 : vector<1x32xf32> to vector<8x32xf32>
    %271 = arith.mulf %269, %270 : vector<8x32xf32>
    %272 = vector.broadcast %253 : vector<1x32xf32> to vector<8x32xf32>
    %273 = arith.addf %271, %272 : vector<8x32xf32>
    %274 = vector.shape_cast %273 : vector<8x32xf32> to vector<1x8x32xf32>
    %c0_101 = arith.constant 0 : index
    %c0_102 = arith.constant 0 : index
    %c0_103 = arith.constant 0 : index
    %275 = vector.load %arg20[%c0_101, %c0_102, %c0_103] : memref<1x8x32xf32, #tpu.memory_space<vmem>>, vector<1x8x32xf32>
    tpu.vector_store %arg20[%c0_101, %c0_102, %c0_103], %274 {strides = array<i32>} : memref<1x8x32xf32, #tpu.memory_space<vmem>>, vector<1x8x32xf32>,
    return
  }
  func.func @transform_0(%arg0: i32) -> (i32, i32, i32) {
    %c0_i32 = arith.constant 0 : i32
    %c0_i32_0 = arith.constant 0 : i32
    %c0_i32_1 = arith.constant 0 : i32
    return %arg0, %c0_i32, %c0_i32_0 : i32, i32, i32
  }
  func.func @transform_1(%arg0: i32) -> (i32, i32, i32) {
    %c0_i32 = arith.constant 0 : i32
    %c0_i32_0 = arith.constant 0 : i32
    %c0_i32_1 = arith.constant 0 : i32
    return %arg0, %c0_i32, %c0_i32_0 : i32, i32, i32
  }
  func.func @transform_2(%arg0: i32) -> (i32, i32) {
    %c0_i32 = arith.constant 0 : i32
    %c0_i32_0 = arith.constant 0 : i32
    %c0_i32_1 = arith.constant 0 : i32
    return %c0_i32, %c0_i32_0 : i32, i32
  }
  func.func @transform_3(%arg0: i32) -> (i32, i32) {
    %c0_i32 = arith.constant 0 : i32
    %c0_i32_0 = arith.constant 0 : i32
    %c0_i32_1 = arith.constant 0 : i32
    return %c0_i32, %c0_i32_0 : i32, i32
  }
  func.func @transform_4(%arg0: i32) -> (i32, i32) {
    %c0_i32 = arith.constant 0 : i32
    %c0_i32_0 = arith.constant 0 : i32
    %c0_i32_1 = arith.constant 0 : i32
    return %c0_i32, %c0_i32_0 : i32, i32
  }
  func.func @transform_5(%arg0: i32) -> (i32, i32) {
    %c0_i32 = arith.constant 0 : i32
    %c0_i32_0 = arith.constant 0 : i32
    %c0_i32_1 = arith.constant 0 : i32
    return %c0_i32, %c0_i32_0 : i32, i32
  }
  func.func @transform_6(%arg0: i32) -> (i32, i32) {
    %c0_i32 = arith.constant 0 : i32
    %c0_i32_0 = arith.constant 0 : i32
    %c0_i32_1 = arith.constant 0 : i32
    return %c0_i32, %c0_i32_0 : i32, i32
  }
  func.func @transform_7(%arg0: i32) -> (i32, i32) {
    %c0_i32 = arith.constant 0 : i32
    %c0_i32_0 = arith.constant 0 : i32
    %c0_i32_1 = arith.constant 0 : i32
    return %c0_i32, %c0_i32_0 : i32, i32
  }
  func.func @transform_8(%arg0: i32) -> (i32, i32) {
    %c0_i32 = arith.constant 0 : i32
    %c0_i32_0 = arith.constant 0 : i32
    %c0_i32_1 = arith.constant 0 : i32
    return %c0_i32, %c0_i32_0 : i32, i32
  }
  func.func @transform_9(%arg0: i32) -> (i32, i32) {
    %c0_i32 = arith.constant 0 : i32
    %c0_i32_0 = arith.constant 0 : i32
    %c0_i32_1 = arith.constant 0 : i32
    return %c0_i32, %c0_i32_0 : i32, i32
  }
  func.func @transform_10(%arg0: i32) -> (i32, i32) {
    %c0_i32 = arith.constant 0 : i32
    %c0_i32_0 = arith.constant 0 : i32
    %c0_i32_1 = arith.constant 0 : i32
    return %c0_i32, %c0_i32_0 : i32, i32
  }
  func.func @transform_11(%arg0: i32) -> (i32, i32) {
    %c0_i32 = arith.constant 0 : i32
    %c0_i32_0 = arith.constant 0 : i32
    %c0_i32_1 = arith.constant 0 : i32
    return %c0_i32, %c0_i32_0 : i32, i32
  }
  func.func @transform_12(%arg0: i32) -> (i32, i32) {
    %c0_i32 = arith.constant 0 : i32
    %c0_i32_0 = arith.constant 0 : i32
    %c0_i32_1 = arith.constant 0 : i32
    return %c0_i32, %c0_i32_0 : i32, i32
  }
  func.func @transform_13(%arg0: i32) -> (i32, i32) {
    %c0_i32 = arith.constant 0 : i32
    %c0_i32_0 = arith.constant 0 : i32
    %c0_i32_1 = arith.constant 0 : i32
    return %c0_i32, %c0_i32_0 : i32, i32
  }
  func.func @transform_14(%arg0: i32) -> (i32, i32) {
    %c0_i32 = arith.constant 0 : i32
    %c0_i32_0 = arith.constant 0 : i32
    %c0_i32_1 = arith.constant 0 : i32
    return %c0_i32, %c0_i32_0 : i32, i32
  }
  func.func @transform_15(%arg0: i32) -> (i32, i32) {
    %c0_i32 = arith.constant 0 : i32
    %c0_i32_0 = arith.constant 0 : i32
    %c0_i32_1 = arith.constant 0 : i32
    return %c0_i32, %c0_i32_0 : i32, i32
  }
  func.func @transform_16(%arg0: i32) -> (i32, i32) {
    %c0_i32 = arith.constant 0 : i32
    %c0_i32_0 = arith.constant 0 : i32
    %c0_i32_1 = arith.constant 0 : i32
    return %c0_i32, %c0_i32_0 : i32, i32
  }
  func.func @transform_17(%arg0: i32) -> (i32, i32) {
    %c0_i32 = arith.constant 0 : i32
    %c0_i32_0 = arith.constant 0 : i32
    %c0_i32_1 = arith.constant 0 : i32
    return %c0_i32, %c0_i32_0 : i32, i32
  }
  func.func @transform_18(%arg0: i32) -> (i32, i32) {
    %c0_i32 = arith.constant 0 : i32
    %c0_i32_0 = arith.constant 0 : i32
    %c0_i32_1 = arith.constant 0 : i32
    return %c0_i32, %c0_i32_0 : i32, i32
  }
  func.func @transform_19(%arg0: i32) -> (i32, i32, i32) {
    %c0_i32 = arith.constant 0 : i32
    %c0_i32_0 = arith.constant 0 : i32
    %c0_i32_1 = arith.constant 0 : i32
    return %arg0, %c0_i32, %c0_i32_0 : i32, i32, i32
  }
}

</mosaic_0001>

<bundles_post_ra>
// kernel: tpu_custom_call.1
= control target key start
LH: loop header
LB: loop body
LE: loop exit
PB: predicated region body
PF: predicated region fallthrough
CT: control target
= control target key end

     0   :  { %s17065_s0 = inlined_call_operand.hbm [shape: f32[2,8,32], index: 0, kind: input, shape index: {}]   ;;  %s17066_s1 = inlined_call_operand.hbm [shape: f32[2,16,32], index: 1, kind: input, shape index: {}]   ;;  %s17067_s2 = inlined_call_operand.hbm [shape: f32[32,96], index: 2, kind: input, shape index: {}]   ;;  %s17068_s3 = inlined_call_operand.hbm [shape: f32[1,96], index: 3, kind: input, shape index: {}]   ;;  %s17069_s4 = inlined_call_operand.hbm [shape: f32[32,32], index: 4, kind: input, shape index: {}]   ;;  %s17070_s5 = inlined_call_operand.hbm [shape: f32[1,32], index: 5, kind: input, shape index: {}]   ;;  %s17071_s6 = inlined_call_operand.hbm [shape: f32[32,32], index: 6, kind: input, shape index: {}]   ;;  %s17072_s7 = inlined_call_operand.hbm [shape: f32[1,32], index: 7, kind: input, shape index: {}]   ;;  %s17073_s8 = inlined_call_operand.hbm [shape: f32[32,64], index: 8, kind: input, shape index: {}]   ;;  %s17074_s9 = inlined_call_operand.hbm [shape: f32[1,64], index: 9, kind: input, shape index: {}]   ;;  %s17075_s10 = inlined_call_operand.hbm [shape: f32[32,32], index: 10, kind: input, shape index: {}]   ;;  %s17076_s11 = inlined_call_operand.hbm [shape: f32[1,32], index: 11, kind: input, shape index: {}]   ;;  %s17077_s12 = inlined_call_operand.hbm [shape: f32[2,32], index: 12, kind: input, shape index: {}]   ;;  %s17078_s13 = inlined_call_operand.hbm [shape: f32[2,32], index: 13, kind: input, shape index: {}]   ;;  %s17079_s14 = inlined_call_operand.hbm [shape: f32[2,32], index: 14, kind: input, shape index: {}]   ;;  %s17080_s15 = inlined_call_operand.hbm [shape: f32[32,64], index: 15, kind: input, shape index: {}]   ;;  %s17081_s16 = inlined_call_operand.hbm [shape: f32[1,64], index: 16, kind: input, shape index: {}]   ;;  %s17082_s17 = inlined_call_operand.hbm [shape: f32[64,32], index: 17, kind: input, shape index: {}]   ;;  %s17083_s18 = inlined_call_operand.hbm [shape: f32[1,32], index: 18, kind: input, shape index: {}]   ;;  %s17084_s19 = inlined_call_operand.hbm [shape: f32[2,8,32], index: 19, kind: output, shape index: {}]  }
   0x1   :  { %17107 = sst [smem:[#allocation51_spill]] %s17065_s0 }
   0x2   :  { %17108 = sst [smem:[#allocation52_spill]] %s17066_s1 }
   0x3   :  { %17109 = sst [smem:[#allocation53_spill]] %s17067_s2 }
   0x4   :  { %17110 = sst [smem:[#allocation54_spill]] %s17068_s3 }
   0x5   :  { %17111 = sst [smem:[#allocation55_spill]] %s17069_s4 }
   0x6   :  { %17112 = sst [smem:[#allocation56_spill]] %s17070_s5 }
   0x7   :  { %17113 = sst [smem:[#allocation57_spill]] %s17071_s6 }
   0x8   :  { %17114 = sst [smem:[#allocation58_spill]] %s17072_s7 }
   0x9   :  { %17115 = sst [smem:[#allocation59_spill]] %s17073_s8 }
   0xa   :  { %17116 = sst [smem:[#allocation60_spill]] %s17074_s9 }
   0xb   :  { %17117 = sst [smem:[#allocation61_spill]] %s17075_s10 }
   0xc   :  { %17118 = sst [smem:[#allocation62_spill]] %s17076_s11 }
   0xd   :  { %17119 = sst [smem:[#allocation63_spill]] %s17079_s14 }
   0xe   :  { %17120 = sst [smem:[#allocation64_spill]] %s17081_s16 }
   0xf   :  { %17121 = sst [smem:[#allocation65_spill]] %s17083_s18 }
  0x10   :  { %17122 = sst [smem:[#allocation66_spill]] %s17084_s19 }
  0x11   :  { %24 = vsyncpa [#allocation3], 0 }
  0x12   :  { %26 = vsyncpa [#allocation3 + $0x1], 0 }
  0x13   :  { %27 = vsyncpa [#allocation6], 0 }
  0x14   :  { %29 = vsyncpa [#allocation6 + $0x1], 0 }
  0x15   :  { %30 = vsyncpa [#allocation9], 0 }
  0x16   :  { %31 = vsyncpa [#allocation12], 0 }
  0x17   :  { %32 = vsyncpa [#allocation15], 0 }
  0x18   :  { %33 = vsyncpa [#allocation18], 0 }
  0x19   :  { %34 = vsyncpa [#allocation21], 0 }
  0x1a   :  { %35 = vsyncpa [#allocation24], 0 }
  0x1b   :  { %36 = vsyncpa [#allocation27], 0 }
  0x1c   :  { %37 = vsyncpa [#allocation30], 0 }
  0x1d   :  { %38 = vsyncpa [#allocation4], 0 }
  0x1e   :  { %40 = vsyncpa [#allocation4 + $0x1], 0  ;;  %s15670_s0 = smov 0   ;;  %s15672_s30 = smov 0  }
  0x1f   :  { %s15674_s20 = smov 0   ;;  %s15676_s21 = smov 0  }
  0x20 LB: > { %17123 = sst [smem:[#allocation45_spill]] %s15517_s0  ;;  %s15531_s1 = smov [#allocation7]   ;;  %s15529_s21 = sphi %s15676_s21, %s17193_s21   ;;  %s15525_s20 = sphi %s15674_s20, %s17192_s20   ;;  %s15521_s30 = sphi %s15672_s30, %s17191_s30   ;;  %s15517_s0 = sphi %s15670_s0, %s17190_s0  }
  0x21   : > { %17124 = sst [smem:[#allocation46_spill]] %s15521_s30  ;;  %s498_s22 = sshll.u32 %s15531_s1, 4  ;;  %s15696_s22 = int_to_ptr.vmem [resolvable:$true] %s498_s22 }
  0x22   : > { %17125 = sst [smem:[#allocation47_spill]] %s15525_s20  ;;  %s15691_s2 = sadd.s32 4294967295, %s15529_s21  }
  0x23   : > { %17126 = sst [smem:[#allocation48_spill]] %s15529_s21  ;;  %p12336_p0 = scmp.ge.s32.totalorder %s15529_s21, 1 }
  0x24   : > { %17127 = sst [smem:[#allocation49_spill]] %s15691_s2  ;;  %p17101_p1 = scmp.eq.s32.totalorder %s15691_s2, 0 }
  0x25   : > { %p486_p2 = scmp.lt.s32.totalorder %s15529_s21, 3  ;;  %s15532_s24 = smov [#allocation8]  }
  0x26   : > { %s512_s25 = sshll.u32 %s15532_s24, 4  ;;  %s15533_s26 = smov [#allocation11]   ;;  %s15711_s25 = int_to_ptr.vmem [resolvable:$true] %s512_s25 }
  0x27   : > { %p15698_p3 = pnand %p12336_p0, %p486_p2  ;;  %s536_s27 = sshll.u32 %s15533_s26, 4  ;;  %s15713_s27 = int_to_ptr.vmem [resolvable:$true] %s536_s27 }
  0x28   : > { %s17131_s1 = sld [smem:[#allocation53_spill]] }
  0x29   : > { %s17128_s23 = scalar_select %p15698_p3, 1, 0 }
  0x2a   : > { %p14681_p5 = pneg %p15698_p3 }
  0x2b   : > { %17129 = sst [smem:[#allocation50_spill]] %s17128_s23 }
  0x2c   : > { %p15707_p6 = pnand %p14681_p5, %p17101_p1 }
  0x2e   : > { %s14887_s19 = scalar_lea.hbm %s17131_s1, 512  ;;  %p15723_p8 = pneg %p15707_p6 }
  0x2f   : > { %p14888_p7 = scmp.ne.s32.totalorder %s17131_s1, %s14887_s19  ;;  %p14894_p11 = scmp.lt.u32.totalorder %s14887_s19, %s17131_s1 }
  0x31   : > { %p14890_p9 = pnand %p15723_p8, %p14888_p7 }
  0x33   : > { %p14891_p10 = pneg %p14890_p9 }
  0x35   : > { %p14896_p12 = pnand %p14894_p11, %p14891_p10 }
  0x37   : > { %14899 = shalt.err (!%p14896_p12)
}
  0x38   : > { %s14900_s0 = scalar_lea.vmem %s15696_s22, 512  ;;  %p14908_p5 = scmp.lt.s32.totalorder %s15696_s22, %s15696_s22 }
  0x39   : > { %p14901_p13 = scmp.ne.s32.totalorder %s15696_s22, %s14900_s0  ;;  %p14909_p4 = scmp.lt.s32.totalorder %s14900_s0, %s14900_s0 }
  0x3b   : > { %p14903_p0 = pnand %p14901_p13, %p15723_p8  ;;  %p14910_p7 = por %p14909_p4, %p14908_p5 }
  0x3d   : > { %p14904_p2 = pneg %p14903_p0 }
  0x3f   : > { %p14911_p9 = pnand %p14910_p7, %p14904_p2 }
  0x41   : > { %14914 = shalt.err (!%p14911_p9)
}
  0x42   : > { %s17103_s23 = smov 128   ;;  %s17104_s19 = smov 8  }
  0x43   : > { %14684 = dma.hbm_to_vmem [thread:$0]  (!%p15707_p6), %s17131_s1, 512, %s15696_s22, [#allocation6], %s17103_s23, %s17103_s23, %s17104_s19  }
  0x44   : > { %s17133_s30 = sld [smem:[#allocation54_spill]] }
  0x4a   : > { %s17134_s18 = smov %s17133_s30  ;;  %s14915_s0 = scalar_lea.hbm %s17133_s30, 16 }
  0x4b   : > { %p14916_p4 = scmp.ne.s32.totalorder %s17134_s18, %s14915_s0  ;;  %p14922_p12 = scmp.lt.u32.totalorder %s14915_s0, %s17134_s18 }
  0x4d   : > { %p14918_p10 = pnand %p14916_p4, %p15723_p8 }
  0x4f   : > { %p14919_p11 = pneg %p14918_p10 }
  0x51   : > { %p14924_p13 = pnand %p14922_p12, %p14919_p11 }
  0x53   : > { %14927 = shalt.err (!%p14924_p13)
}
  0x54   : > { %s14928_s22 = scalar_lea.vmem %s15711_s25, 16  ;;  %s14935_s30 = scalar_lea.vmem %s15711_s25, 32 }
  0x55   : > { %p14929_p0 = scmp.ne.s32.totalorder %s15711_s25, %s14928_s22  ;;  %p14936_p7 = scmp.lt.s32.totalorder %s15711_s25, %s15711_s25 }
  0x56   : > { %p14937_p9 = scmp.lt.s32.totalorder %s14935_s30, %s14928_s22 }
  0x57   : > { %p14931_p2 = pnand %p14929_p0, %p15723_p8 }
  0x58   : > { %p14938_p4 = por %p14937_p9, %p14936_p7 }
  0x59   : > { %p14932_p5 = pneg %p14931_p2 }
  0x5b   : > { %p14939_p10 = pnand %p14938_p4, %p14932_p5 }
  0x5d   : > { %14942 = shalt.err (!%p14939_p10)
}
  0x5e   : > { %14687 = dma.hbm_to_vmem [thread:$0]  (!%p15707_p6), %s17134_s18, 16, %s15711_s25, [#allocation9]  }
  0x5f   : > { %s17135_s5 = sld [smem:[#allocation56_spill]] }
  0x65   : > { %s14943_s2 = scalar_lea.hbm %s17135_s5, 16 }
  0x66   : > { %p14944_p11 = scmp.ne.s32.totalorder %s17135_s5, %s14943_s2  ;;  %p14950_p0 = scmp.lt.u32.totalorder %s14943_s2, %s17135_s5 }
  0x68   : > { %p14946_p12 = pnand %p14944_p11, %p15723_p8 }
  0x6a   : > { %p14947_p13 = pneg %p14946_p12 }
  0x6c   : > { %p14952_p2 = pnand %p14950_p0, %p14947_p13 }
  0x6e   : > { %14955 = shalt.err (!%p14952_p2)
}
  0x6f   : > { %s14956_s25 = scalar_lea.vmem %s15713_s27, 16  ;;  %s14963_s22 = scalar_lea.vmem %s15713_s27, 32 }
  0x70   : > { %p14957_p5 = scmp.ne.s32.totalorder %s15713_s27, %s14956_s25  ;;  %p14964_p4 = scmp.lt.s32.totalorder %s15713_s27, %s15713_s27 }
  0x71   : > { %p14965_p10 = scmp.lt.s32.totalorder %s14963_s22, %s14956_s25 }
  0x72   : > { %p14959_p7 = pnand %p14957_p5, %p15723_p8 }
  0x73   : > { %p14966_p11 = por %p14965_p10, %p14964_p4 }
  0x74   : > { %p14960_p9 = pneg %p14959_p7 }
  0x76   : > { %p14967_p12 = pnand %p14966_p11, %p14960_p9 }
  0x78   : > { %14970 = shalt.err (!%p14967_p12)
}
  0x79   : > { %14693 = dma.hbm_to_vmem [thread:$0]  (!%p15707_p6), %s17135_s5, 16, %s15713_s27, [#allocation12]  }
  0x7a   : > { %s15536_s16 = smov [#allocation14]   ;;  %s15537_s21 = smov [#allocation17]  }
  0x7b   : > { %s560_s20 = sshll.u32 %s15536_s16, 4  ;;  %s584_s2 = sshll.u32 %s15537_s21, 4  ;;  %s561_s20 = int_to_ptr.vmem [resolvable:$true] %s560_s20  ;;  %s585_s2 = int_to_ptr.vmem [resolvable:$true] %s584_s2 }
  0x7c   : > { %s17136_s7 = sld [smem:[#allocation58_spill]] }
  0x82   : > { %s14971_s26 = scalar_lea.hbm %s17136_s7, 16 }
  0x83   : > { %p14972_p13 = scmp.ne.s32.totalorder %s17136_s7, %s14971_s26  ;;  %p14978_p5 = scmp.lt.u32.totalorder %s14971_s26, %s17136_s7 }
  0x85   : > { %p14974_p0 = pnand %p14972_p13, %p15723_p8 }
  0x87   : > { %p14975_p2 = pneg %p14974_p0 }
  0x89   : > { %p14980_p7 = pnand %p14978_p5, %p14975_p2 }
  0x8b   : > { %14983 = shalt.err (!%p14980_p7)
}
  0x8c   : > { %s14984_s27 = scalar_lea.vmem %s561_s20, 16  ;;  %s14991_s14 = scalar_lea.vmem %s561_s20, 32 }
  0x8d   : > { %p14985_p9 = scmp.ne.s32.totalorder %s561_s20, %s14984_s27  ;;  %p14992_p11 = scmp.lt.s32.totalorder %s561_s20, %s561_s20 }
  0x8e   : > { %p14993_p12 = scmp.lt.s32.totalorder %s14991_s14, %s14984_s27 }
  0x8f   : > { %p14987_p4 = pnand %p14985_p9, %p15723_p8 }
  0x90   : > { %p14994_p1 = por %p14993_p12, %p14992_p11 }
  0x91   : > { %p14988_p10 = pneg %p14987_p4 }
  0x93   : > { %p14995_p3 = pnand %p14994_p1, %p14988_p10 }
  0x95   : > { %14998 = shalt.err (!%p14995_p3)
}
  0x96   : > { %14699 = dma.hbm_to_vmem [thread:$0]  (!%p15707_p6), %s17136_s7, 16, %s561_s20, [#allocation15]  }
  0x97   : > { %s17137_s9 = sld [smem:[#allocation60_spill]] }
  0x9d   : > { %s14999_s26 = scalar_lea.hbm %s17137_s9, 16 }
  0x9e   : > { %p15000_p13 = scmp.ne.s32.totalorder %s17137_s9, %s14999_s26  ;;  %p15006_p3 = scmp.lt.u32.totalorder %s14999_s26, %s17137_s9 }
  0xa0   : > { %p15002_p0 = pnand %p15000_p13, %p15723_p8 }
  0xa2   : > { %p15003_p1 = pneg %p15002_p0 }
  0xa4   : > { %p15008_p2 = pnand %p15006_p3, %p15003_p1 }
  0xa6   : > { %15011 = shalt.err (!%p15008_p2)
}
  0xa7   : > { %s15012_s27 = scalar_lea.vmem %s585_s2, 16  ;;  %s15019_s20 = scalar_lea.vmem %s585_s2, 32 }
  0xa8   : > { %p15013_p5 = scmp.ne.s32.totalorder %s585_s2, %s15012_s27  ;;  %p15020_p4 = scmp.lt.s32.totalorder %s585_s2, %s585_s2 }
  0xa9   : > { %p15021_p10 = scmp.lt.s32.totalorder %s15019_s20, %s15012_s27 }
  0xaa   : > { %p15015_p7 = pnand %p15013_p5, %p15723_p8 }
  0xab   : > { %p15022_p11 = por %p15021_p10, %p15020_p4 }
  0xac   : > { %p15016_p9 = pneg %p15015_p7 }
  0xae   : > { %p15023_p12 = pnand %p15022_p11, %p15016_p9 }
  0xb0   : > { %15026 = shalt.err (!%p15023_p12)
}
  0xb1   : > { %14705 = dma.hbm_to_vmem [thread:$0]  (!%p15707_p6), %s17137_s9, 16, %s585_s2, [#allocation18]  }
  0xb2   : > { %s15538_s21 = smov [#allocation20]   ;;  %s15539_s29 = smov [#allocation23]  }
  0xb3   : > { %s608_s28 = sshll.u32 %s15538_s21, 4  ;;  %s630_s26 = sshll.u32 %s15539_s29, 4  ;;  %s609_s28 = int_to_ptr.vmem [resolvable:$true] %s608_s28  ;;  %s631_s26 = int_to_ptr.vmem [resolvable:$true] %s630_s26 }
  0xb4   : > { %s17138_s11 = sld [smem:[#allocation62_spill]] }
  0xba   : > { %s15027_s22 = scalar_lea.hbm %s17138_s11, 16 }
  0xbb   : > { %p15028_p13 = scmp.ne.s32.totalorder %s17138_s11, %s15027_s22  ;;  %p15034_p3 = scmp.lt.u32.totalorder %s15027_s22, %s17138_s11 }
  0xbd   : > { %p15030_p0 = pnand %p15028_p13, %p15723_p8 }
  0xbf   : > { %p15031_p1 = pneg %p15030_p0 }
  0xc1   : > { %p15036_p2 = pnand %p15034_p3, %p15031_p1 }
  0xc3   : > { %15039 = shalt.err (!%p15036_p2)
}
  0xc4   : > { %s15040_s2 = scalar_lea.vmem %s609_s28, 16  ;;  %s15047_s16 = scalar_lea.vmem %s609_s28, 32 }
  0xc5   : > { %p15041_p5 = scmp.ne.s32.totalorder %s609_s28, %s15040_s2  ;;  %p15048_p4 = scmp.lt.s32.totalorder %s609_s28, %s609_s28 }
  0xc6   : > { %p15049_p10 = scmp.lt.s32.totalorder %s15047_s16, %s15040_s2 }
  0xc7   : > { %p15043_p7 = pnand %p15041_p5, %p15723_p8 }
  0xc8   : > { %p15050_p11 = por %p15049_p10, %p15048_p4 }
  0xc9   : > { %p15044_p9 = pneg %p15043_p7 }
  0xcb   : > { %p15051_p12 = pnand %p15050_p11, %p15044_p9 }
  0xcd   : > { %15054 = shalt.err (!%p15051_p12)
}
  0xce   : > { %14711 = dma.hbm_to_vmem [thread:$0]  (!%p15707_p6), %s17138_s11, 16, %s609_s28, [#allocation21]  }
  0xcf   : > { %s15055_s22 = scalar_lea.hbm %s17078_s13, 32 }
  0xd0   : > { %p15056_p13 = scmp.ne.s32.totalorder %s17078_s13, %s15055_s22  ;;  %p15062_p3 = scmp.lt.u32.totalorder %s15055_s22, %s17078_s13 }
  0xd2   : > { %p15058_p0 = pnand %p15056_p13, %p15723_p8 }
  0xd4   : > { %p15059_p1 = pneg %p15058_p0 }
  0xd6   : > { %p15064_p2 = pnand %p15062_p3, %p15059_p1 }
  0xd8   : > { %15067 = shalt.err (!%p15064_p2)
}
  0xd9   : > { %s15068_s2 = scalar_lea.vmem %s631_s26, 32  ;;  %p15076_p4 = scmp.lt.s32.totalorder %s631_s26, %s631_s26 }
  0xda   : > { %p15069_p5 = scmp.ne.s32.totalorder %s631_s26, %s15068_s2  ;;  %p15077_p10 = scmp.lt.s32.totalorder %s15068_s2, %s15068_s2 }
  0xdc   : > { %p15071_p7 = pnand %p15069_p5, %p15723_p8  ;;  %p15078_p11 = por %p15077_p10, %p15076_p4 }
  0xde   : > { %p15072_p9 = pneg %p15071_p7 }
  0xe0   : > { %p15079_p12 = pnand %p15078_p11, %p15072_p9 }
  0xe2   : > { %15082 = shalt.err (!%p15079_p12)
}
  0xe3   : > { %14717 = dma.hbm_to_vmem [thread:$0]  (!%p15707_p6), %s17078_s13, 32, %s631_s26, [#allocation24]  }
  0xe4   : > { %s15540_s21 = smov [#allocation26]   ;;  %s15541_s0 = smov [#allocation29]  }
  0xe5   : > { %s651_s29 = sshll.u32 %s15540_s21, 4  ;;  %s675_s25 = sshll.u32 %s15541_s0, 4  ;;  %s652_s29 = int_to_ptr.vmem [resolvable:$true] %s651_s29  ;;  %s676_s25 = int_to_ptr.vmem [resolvable:$true] %s675_s25 }
  0xe6   : > { %s15083_s27 = scalar_lea.hbm %s17080_s15, 512 }
  0xe7   : > { %p15084_p13 = scmp.ne.s32.totalorder %s17080_s15, %s15083_s27  ;;  %p15090_p3 = scmp.lt.u32.totalorder %s15083_s27, %s17080_s15 }
  0xe9   : > { %p15086_p0 = pnand %p15084_p13, %p15723_p8 }
  0xeb   : > { %p15087_p1 = pneg %p15086_p0 }
  0xed   : > { %p15092_p2 = pnand %p15090_p3, %p15087_p1 }
  0xef   : > { %15095 = shalt.err (!%p15092_p2)
}
  0xf0   : > { %s15096_s26 = scalar_lea.vmem %s652_s29, 512  ;;  %p15104_p4 = scmp.lt.s32.totalorder %s652_s29, %s652_s29 }
  0xf1   : > { %p15097_p5 = scmp.ne.s32.totalorder %s652_s29, %s15096_s26  ;;  %p15105_p10 = scmp.lt.s32.totalorder %s15096_s26, %s15096_s26 }
  0xf3   : > { %p15099_p7 = pnand %p15097_p5, %p15723_p8  ;;  %p15106_p11 = por %p15105_p10, %p15104_p4 }
  0xf5   : > { %p15100_p9 = pneg %p15099_p7 }
  0xf7   : > { %p15107_p12 = pnand %p15106_p11, %p15100_p9 }
  0xf9   : > { %15110 = shalt.err (!%p15107_p12)
}
  0xfa   : > { %14723 = dma.hbm_to_vmem [thread:$0]  (!%p15707_p6), %s17080_s15, 512, %s652_s29, [#allocation27], %s17103_s23, %s17103_s23, %s17104_s19  }
  0xfb   : > { %s15111_s30 = scalar_lea.hbm %s17082_s17, 1024 }
  0xfc   : > { %p15112_p13 = scmp.ne.s32.totalorder %s17082_s17, %s15111_s30  ;;  %p15118_p3 = scmp.lt.u32.totalorder %s15111_s30, %s17082_s17 }
  0xfe   : > { %p15114_p0 = pnand %p15112_p13, %p15723_p8 }
 0x100   : > { %p15115_p1 = pneg %p15114_p0 }
 0x102   : > { %p15120_p2 = pnand %p15118_p3, %p15115_p1 }
 0x104   : > { %15123 = shalt.err (!%p15120_p2)
}
 0x105   : > { %s15124_s28 = scalar_lea.vmem %s676_s25, 1024  ;;  %p15132_p4 = scmp.lt.s32.totalorder %s676_s25, %s676_s25 }
 0x106   : > { %p15125_p5 = scmp.ne.s32.totalorder %s676_s25, %s15124_s28  ;;  %p15133_p10 = scmp.lt.s32.totalorder %s15124_s28, %s15124_s28 }
 0x108   : > { %p15127_p7 = pnand %p15125_p5, %p15723_p8  ;;  %p15134_p11 = por %p15133_p10, %p15132_p4 }
 0x10a   : > { %p15128_p9 = pneg %p15127_p7 }
 0x10c   : > { %p15135_p12 = pnand %p15134_p11, %p15128_p9 }
 0x10e   : > { %15138 = shalt.err (!%p15135_p12)
}
 0x10f   : > { %14729 = dma.hbm_to_vmem [thread:$0]  (!%p15707_p6), %s17082_s17, 1024, %s676_s25, [#allocation30], %s17103_s23, %s17103_s23, %s17104_s19  }
 0x110   : > { %s15542_s16 = smov [#allocation10]   ;;  %s15543_s0 = smov [#allocation13]  }
 0x111   : > { %s522_s21 = sshll.u32 %s15542_s16, 4  ;;  %s546_s22 = sshll.u32 %s15543_s0, 4  ;;  %s523_s21 = int_to_ptr.vmem [resolvable:$true] %s522_s21  ;;  %s547_s22 = int_to_ptr.vmem [resolvable:$true] %s546_s22 }
 0x112   : > { %s17139_s4 = sld [smem:[#allocation55_spill]] }
 0x118   : > { %s15139_s20 = scalar_lea.hbm %s17139_s4, 512 }
 0x119   : > { %p15140_p13 = scmp.ne.s32.totalorder %s17139_s4, %s15139_s20  ;;  %p15146_p3 = scmp.lt.u32.totalorder %s15139_s20, %s17139_s4 }
 0x11b   : > { %p15142_p0 = pnand %p15140_p13, %p15723_p8 }
 0x11d   : > { %p15143_p1 = pneg %p15142_p0 }
 0x11f   : > { %p15148_p2 = pnand %p15146_p3, %p15143_p1 }
 0x121   : > { %15151 = shalt.err (!%p15148_p2)
}
 0x122   : > { %s15152_s25 = scalar_lea.vmem %s523_s21, 512  ;;  %p15160_p4 = scmp.lt.s32.totalorder %s523_s21, %s523_s21 }
 0x123   : > { %p15153_p5 = scmp.ne.s32.totalorder %s523_s21, %s15152_s25  ;;  %p15161_p10 = scmp.lt.s32.totalorder %s15152_s25, %s15152_s25 }
 0x125   : > { %p15155_p7 = pnand %p15153_p5, %p15723_p8  ;;  %p15162_p11 = por %p15161_p10, %p15160_p4 }
 0x127   : > { %p15156_p9 = pneg %p15155_p7 }
 0x129   : > { %p15163_p12 = pnand %p15162_p11, %p15156_p9 }
 0x12b   : > { %15166 = shalt.err (!%p15163_p12)
}
 0x12c   : > { %14690 = dma.hbm_to_vmem [thread:$0]  (!%p15707_p6), %s17139_s4, 512, %s523_s21, [#allocation9], %s17103_s23, %s17103_s23, %s17104_s19  }
 0x12d   : > { %s17140_s6 = sld [smem:[#allocation57_spill]] }
 0x133   : > { %s15167_s27 = scalar_lea.hbm %s17140_s6, 512 }
 0x134   : > { %p15168_p13 = scmp.ne.s32.totalorder %s17140_s6, %s15167_s27  ;;  %p15174_p3 = scmp.lt.u32.totalorder %s15167_s27, %s17140_s6 }
 0x136   : > { %p15170_p0 = pnand %p15168_p13, %p15723_p8 }
 0x138   : > { %p15171_p1 = pneg %p15170_p0 }
 0x13a   : > { %p15176_p2 = pnand %p15174_p3, %p15171_p1 }
 0x13c   : > { %15179 = shalt.err (!%p15176_p2)
}
 0x13d   : > { %s15180_s29 = scalar_lea.vmem %s547_s22, 512  ;;  %p15188_p4 = scmp.lt.s32.totalorder %s547_s22, %s547_s22 }
 0x13e   : > { %p15181_p5 = scmp.ne.s32.totalorder %s547_s22, %s15180_s29  ;;  %p15189_p10 = scmp.lt.s32.totalorder %s15180_s29, %s15180_s29 }
 0x140   : > { %p15183_p7 = pnand %p15181_p5, %p15723_p8  ;;  %p15190_p11 = por %p15189_p10, %p15188_p4 }
 0x142   : > { %p15184_p9 = pneg %p15183_p7 }
 0x144   : > { %p15191_p12 = pnand %p15190_p11, %p15184_p9 }
 0x146   : > { %15194 = shalt.err (!%p15191_p12)
}
 0x147   : > { %14696 = dma.hbm_to_vmem [thread:$0]  (!%p15707_p6), %s17140_s6, 512, %s547_s22, [#allocation12], %s17103_s23, %s17103_s23, %s17104_s19  }
 0x148   : > { %s15544_s26 = smov [#allocation16]   ;;  %s15545_s0 = smov [#allocation19]  }
 0x149   : > { %s570_s16 = sshll.u32 %s15544_s26, 4  ;;  %s594_s30 = sshll.u32 %s15545_s0, 4  ;;  %s571_s16 = int_to_ptr.vmem [resolvable:$true] %s570_s16  ;;  %s595_s30 = int_to_ptr.vmem [resolvable:$true] %s594_s30 }
 0x14a   : > { %s17141_s8 = sld [smem:[#allocation59_spill]] }
 0x150   : > { %s15195_s14 = scalar_lea.hbm %s17141_s8, 512 }
 0x151   : > { %p15196_p13 = scmp.ne.s32.totalorder %s17141_s8, %s15195_s14  ;;  %p15202_p3 = scmp.lt.u32.totalorder %s15195_s14, %s17141_s8 }
 0x153   : > { %p15198_p0 = pnand %p15196_p13, %p15723_p8 }
 0x155   : > { %p15199_p1 = pneg %p15198_p0 }
 0x157   : > { %p15204_p2 = pnand %p15202_p3, %p15199_p1 }
 0x159   : > { %15207 = shalt.err (!%p15204_p2)
}
 0x15a   : > { %s15208_s22 = scalar_lea.vmem %s571_s16, 512  ;;  %p15216_p4 = scmp.lt.s32.totalorder %s571_s16, %s571_s16 }
 0x15b   : > { %p15209_p5 = scmp.ne.s32.totalorder %s571_s16, %s15208_s22  ;;  %p15217_p10 = scmp.lt.s32.totalorder %s15208_s22, %s15208_s22 }
 0x15d   : > { %p15211_p7 = pnand %p15209_p5, %p15723_p8  ;;  %p15218_p11 = por %p15217_p10, %p15216_p4 }
 0x15f   : > { %p15212_p9 = pneg %p15211_p7 }
 0x161   : > { %p15219_p12 = pnand %p15218_p11, %p15212_p9 }
 0x163   : > { %15222 = shalt.err (!%p15219_p12)
}
 0x164   : > { %14702 = dma.hbm_to_vmem [thread:$0]  (!%p15707_p6), %s17141_s8, 512, %s571_s16, [#allocation15], %s17103_s23, %s17103_s23, %s17104_s19  }
 0x165   : > { %s17142_s10 = sld [smem:[#allocation61_spill]] }
 0x16b   : > { %s15223_s20 = scalar_lea.hbm %s17142_s10, 512 }
 0x16c   : > { %p15224_p13 = scmp.ne.s32.totalorder %s17142_s10, %s15223_s20  ;;  %p15230_p3 = scmp.lt.u32.totalorder %s15223_s20, %s17142_s10 }
 0x16e   : > { %p15226_p0 = pnand %p15224_p13, %p15723_p8 }
 0x170   : > { %p15227_p1 = pneg %p15226_p0 }
 0x172   : > { %p15232_p2 = pnand %p15230_p3, %p15227_p1 }
 0x174   : > { %15235 = shalt.err (!%p15232_p2)
}
 0x175   : > { %s15236_s21 = scalar_lea.vmem %s595_s30, 512  ;;  %p15244_p4 = scmp.lt.s32.totalorder %s595_s30, %s595_s30 }
 0x176   : > { %p15237_p5 = scmp.ne.s32.totalorder %s595_s30, %s15236_s21  ;;  %p15245_p10 = scmp.lt.s32.totalorder %s15236_s21, %s15236_s21 }
 0x178   : > { %p15239_p7 = pnand %p15237_p5, %p15723_p8  ;;  %p15246_p11 = por %p15245_p10, %p15244_p4 }
 0x17a   : > { %p15240_p9 = pneg %p15239_p7 }
 0x17c   : > { %p15247_p12 = pnand %p15246_p11, %p15240_p9 }
 0x17e   : > { %15250 = shalt.err (!%p15247_p12)
}
 0x17f   : > { %14708 = dma.hbm_to_vmem [thread:$0]  (!%p15707_p6), %s17142_s10, 512, %s595_s30, [#allocation18], %s17103_s23, %s17103_s23, %s17104_s19  }
 0x180   : > { %s15546_s25 = smov [#allocation22]   ;;  %s15547_s0 = smov [#allocation25]  }
 0x181   : > { %s619_s26 = sshll.u32 %s15546_s25, 4  ;;  %s641_s27 = sshll.u32 %s15547_s0, 4  ;;  %s620_s26 = int_to_ptr.vmem [resolvable:$true] %s619_s26  ;;  %s642_s27 = int_to_ptr.vmem [resolvable:$true] %s641_s27 }
 0x182   : > { %s15251_s2 = scalar_lea.hbm %s17077_s12, 32 }
 0x183   : > { %p15252_p13 = scmp.ne.s32.totalorder %s17077_s12, %s15251_s2  ;;  %p15258_p3 = scmp.lt.u32.totalorder %s15251_s2, %s17077_s12 }
 0x185   : > { %p15254_p0 = pnand %p15252_p13, %p15723_p8 }
 0x187   : > { %p15255_p1 = pneg %p15254_p0 }
 0x189   : > { %p15260_p2 = pnand %p15258_p3, %p15255_p1 }
 0x18b   : > { %15263 = shalt.err (!%p15260_p2)
}
 0x18c   : > { %s15264_s30 = scalar_lea.vmem %s620_s26, 32  ;;  %p15272_p4 = scmp.lt.s32.totalorder %s620_s26, %s620_s26 }
 0x18d   : > { %p15265_p5 = scmp.ne.s32.totalorder %s620_s26, %s15264_s30  ;;  %p15273_p10 = scmp.lt.s32.totalorder %s15264_s30, %s15264_s30 }
 0x18f   : > { %p15267_p7 = pnand %p15265_p5, %p15723_p8  ;;  %p15274_p11 = por %p15273_p10, %p15272_p4 }
 0x191   : > { %p15268_p9 = pneg %p15267_p7 }
 0x193   : > { %p15275_p12 = pnand %p15274_p11, %p15268_p9 }
 0x195   : > { %15278 = shalt.err (!%p15275_p12)
}
 0x196   : > { %14714 = dma.hbm_to_vmem [thread:$0]  (!%p15707_p6), %s17077_s12, 32, %s620_s26, [#allocation21]  }
 0x197   : > { %s17143_s14 = sld [smem:[#allocation63_spill]] }
 0x19d   : > { %s15279_s2 = scalar_lea.hbm %s17143_s14, 32 }
 0x19e   : > { %p15280_p13 = scmp.ne.s32.totalorder %s17143_s14, %s15279_s2  ;;  %p15286_p3 = scmp.lt.u32.totalorder %s15279_s2, %s17143_s14 }
 0x1a0   : > { %p15282_p0 = pnand %p15280_p13, %p15723_p8 }
 0x1a2   : > { %p15283_p1 = pneg %p15282_p0 }
 0x1a4   : > { %p15288_p2 = pnand %p15286_p3, %p15283_p1 }
 0x1a6   : > { %15291 = shalt.err (!%p15288_p2)
}
 0x1a7   : > { %s15292_s30 = scalar_lea.vmem %s642_s27, 32  ;;  %p15300_p4 = scmp.lt.s32.totalorder %s642_s27, %s642_s27 }
 0x1a8   : > { %p15293_p5 = scmp.ne.s32.totalorder %s642_s27, %s15292_s30  ;;  %p15301_p10 = scmp.lt.s32.totalorder %s15292_s30, %s15292_s30 }
 0x1aa   : > { %p15295_p7 = pnand %p15293_p5, %p15723_p8  ;;  %p15302_p11 = por %p15301_p10, %p15300_p4 }
 0x1ac   : > { %p15296_p9 = pneg %p15295_p7 }
 0x1ae   : > { %p15303_p12 = pnand %p15302_p11, %p15296_p9 }
 0x1b0   : > { %15306 = shalt.err (!%p15303_p12)
}
 0x1b1   : > { %14720 = dma.hbm_to_vmem [thread:$0]  (!%p15707_p6), %s17143_s14, 32, %s642_s27, [#allocation24]  }
 0x1b2   : > { %s15548_s25 = smov [#allocation28]   ;;  %s15549_s20 = smov [#allocation31]  }
 0x1b3   : > { %s665_s0 = sshll.u32 %s15548_s25, 4  ;;  %s689_s2 = sshll.u32 %s15549_s20, 4  ;;  %s666_s0 = int_to_ptr.vmem [resolvable:$true] %s665_s0  ;;  %s690_s2 = int_to_ptr.vmem [resolvable:$true] %s689_s2 }
 0x1b4   : > { %s17144_s21 = sld [smem:[#allocation64_spill]] }
 0x1ba   : > { %s17145_s16 = smov %s17144_s21  ;;  %s15307_s23 = scalar_lea.hbm %s17144_s21, 16 }
 0x1bb   : > { %p15308_p13 = scmp.ne.s32.totalorder %s17145_s16, %s15307_s23  ;;  %p15314_p3 = scmp.lt.u32.totalorder %s15307_s23, %s17145_s16 }
 0x1bd   : > { %p15310_p0 = pnand %p15308_p13, %p15723_p8 }
 0x1bf   : > { %p15311_p1 = pneg %p15310_p0 }
 0x1c1   : > { %p15316_p2 = pnand %p15314_p3, %p15311_p1 }
 0x1c3   : > { %15319 = shalt.err (!%p15316_p2)
}
 0x1c4   : > { %s15320_s27 = scalar_lea.vmem %s666_s0, 16  ;;  %s15327_s22 = scalar_lea.vmem %s666_s0, 32 }
 0x1c5   : > { %p15321_p5 = scmp.ne.s32.totalorder %s666_s0, %s15320_s27  ;;  %p15328_p4 = scmp.lt.s32.totalorder %s666_s0, %s666_s0 }
 0x1c6   : > { %p15329_p10 = scmp.lt.s32.totalorder %s15327_s22, %s15320_s27 }
 0x1c7   : > { %p15323_p7 = pnand %p15321_p5, %p15723_p8 }
 0x1c8   : > { %p15330_p11 = por %p15329_p10, %p15328_p4 }
 0x1c9   : > { %p15324_p9 = pneg %p15323_p7 }
 0x1cb   : > { %p15331_p12 = pnand %p15330_p11, %p15324_p9 }
 0x1cd   : > { %15334 = shalt.err (!%p15331_p12)
}
 0x1ce   : > { %14726 = dma.hbm_to_vmem [thread:$0]  (!%p15707_p6), %s17145_s16, 16, %s666_s0, [#allocation27]  }
 0x1cf   : > { %s17146_s20 = sld [smem:[#allocation65_spill]] }
 0x1d5   : > { %s17147_s28 = smov %s17146_s20  ;;  %s15335_s29 = scalar_lea.hbm %s17146_s20, 16 }
 0x1d6   : > { %p15336_p13 = scmp.ne.s32.totalorder %s17147_s28, %s15335_s29  ;;  %p15342_p3 = scmp.lt.u32.totalorder %s15335_s29, %s17147_s28 }
 0x1d8   : > { %p15338_p0 = pnand %p15336_p13, %p15723_p8 }
 0x1da   : > { %p15339_p1 = pneg %p15338_p0 }
 0x1dc   : > { %p15344_p2 = pnand %p15342_p3, %p15339_p1 }
 0x1de   : > { %15347 = shalt.err (!%p15344_p2)
}
 0x1df   : > { %s15348_s22 = scalar_lea.vmem %s690_s2, 16  ;;  %s15355_s0 = scalar_lea.vmem %s690_s2, 32 }
 0x1e0   : > { %p15349_p5 = scmp.ne.s32.totalorder %s690_s2, %s15348_s22  ;;  %p15356_p4 = scmp.lt.s32.totalorder %s690_s2, %s690_s2 }
 0x1e1   : > { %p15357_p10 = scmp.lt.s32.totalorder %s15355_s0, %s15348_s22 }
 0x1e2   : > { %p15351_p7 = pnand %p15349_p5, %p15723_p8 }
 0x1e3   : > { %p15358_p11 = por %p15357_p10, %p15356_p4 }
 0x1e4   : > { %p15352_p9 = pneg %p15351_p7 }
 0x1e6   : > { %p15359_p12 = pnand %p15358_p11, %p15352_p9 }
 0x1e8   : > { %15362 = shalt.err (!%p15359_p12)
}
 0x1e9   : > { %s17148_s1 = sld [smem:[#allocation48_spill]]  ;;  %s17149_s23 = sld [smem:[#allocation47_spill]] }
 0x1ea   : > { %s17150_s20 = sld [smem:[#allocation46_spill]]  ;;  %s17151_s24 = sld [smem:[#allocation45_spill]] }
 0x1eb   : > { %s17152_s29 = sld [smem:[#allocation49_spill]] }
 0x1ec   : > { %14732 = dma.hbm_to_vmem [thread:$0]  (!%p15707_p6), %s17147_s28, 16, %s690_s2, [#allocation30]  }
 0x1ef   : > { %s12335_s21 = sadd.s32 4294967294, %s17148_s1   ;;  %s16067_s3 = sadd.s32 1, %s17148_s1  }
 0x1f0   : > { %s53_s30 = sadd.s32 1, %s17149_s23  ;;  %s50_s26 = ssub.s32 %s17148_s1, %s16067_s3 }
 0x1f1   : > { %p60_p8 = scmp.ne.s32.totalorder %s17149_s23, %s17150_s20  ;;  %p51_p13 = scmp.eq.s32.totalorder %s50_s26, 0 }
 0x1f2   : > { %p61_p0 = scmp.eq.s32.totalorder %s17148_s1, 0  ;;  %p66_p1 = scmp.ne.s32.totalorder %s17150_s20, %s17151_s24 }
 0x1f3   : > { %p473_p3 = scmp.eq.s32.totalorder %s17152_s29, 1  ;;  %p17153_p5 = scmp.eq.s32.totalorder %s17152_s29, 0 }
 0x1f4   : > { %s16079_s27 = scalar_select %p51_p13, %s17149_s23, %s53_s30  }
 0x1f5   : > { %p62_p2 = por %p61_p0, %p60_p8  ;;  %p16083_p7 = por %p17153_p5, %p66_p1 }
 0x1f6   : > { %p16087_p6 = por %p473_p3, %p60_p8  ;;  %p479_p9 = scmp.eq.s32.totalorder %s12335_s21, 1 }
 0x1f7   : > { %p14761_p4 = scmp.lt.s32.totalorder %s17148_s1, 2  ;;  %s16093_s0 = sand.u32 1, %s17149_s23  }
 0x1f8   : > { %s17155_s2 = scalar_select %p16087_p6, 1, 0 }
 0x1f9   : > { %p16095_p10 = por %p479_p9, %p66_p1  ;;  %s12355_s25 = sshll.u32 %s16093_s0, 3 }
 0x1fa   : > { %s12356_s20 = sshll.u32 %s17148_s1, 7  ;;  %s17157_s30 = sld [smem:[#allocation51_spill]] }
 0x1fb   : > { %s17156_s19 = scalar_select %p16095_p10, 1, 0 }
 0x1fc   : > { %s704_s23 = scalar_lea.vmem [#allocation2], %s12355_s25  ;;  %p16106_p11 = pnand %p14761_p4, %p62_p2 }
 0x1fd   : > { %s711_s21 = sshll.u32 %s704_s23, 4  ;;  %s12357_s6 = sshll.u32 %s16093_s0, 4  ;;  %s16110_s21 = int_to_ptr.vmem [resolvable:$true] %s711_s21 }
 0x1fe   : > { %s701_s7 = scalar_lea.sflag [#allocation3], %s16093_s0  ;;  %p15365_p8 = pneg %p16106_p11 }
 0x200   : > { %s17158_s26 = smov %s17157_s30  ;;  %s16104_s4 = scalar_lea.hbm %s17157_s30, %s12356_s20 }
 0x201   : > { %s15363_s8 = scalar_lea.hbm %s16104_s4, 128  ;;  %s15368_s24 = scalar_lea.hbm %s17158_s26, 256 }
 0x202   : > { %p15364_p12 = scmp.ne.s32.totalorder %s16104_s4, %s15363_s8  ;;  %p15369_p1 = scmp.lt.u32.totalorder %s16104_s4, %s17158_s26 }
 0x203   : > { %p15370_p3 = scmp.lt.u32.totalorder %s15368_s24, %s15363_s8  ;;  %p15372_p5 = scmp.lt.u32.totalorder %s15363_s8, %s16104_s4 }
 0x204   : > { %p15366_p13 = pnand %p15365_p8, %p15364_p12 }
 0x205   : > { %p15371_p2 = por %p15370_p3, %p15369_p1 }
 0x206   : > { %p15367_p0 = pneg %p15366_p13 }
 0x207   : > { %p15373_p9 = por %p15372_p5, %p15371_p2 }
 0x209   : > { %p15374_p4 = pnand %p15373_p9, %p15367_p0 }
 0x20b   : > { %15377 = shalt.err (!%p15374_p4)
}
 0x20c   : > { %s15378_s23 = scalar_lea.vmem %s16110_s21, 128  ;;  %s15550_s25 = smov [#allocation2]  }
 0x20d   : > { %p15379_p12 = scmp.ne.s32.totalorder %s16110_s21, %s15378_s23  ;;  %s15383_s20 = sshll.u32 %s15550_s25, 4  ;;  %s15384_s20 = int_to_ptr.vmem [resolvable:$false] %s15383_s20 }
 0x20e   : > { %s15385_s29 = scalar_lea.vmem %s15384_s20, 256  ;;  %p15386_p6 = scmp.lt.s32.totalorder %s16110_s21, %s15384_s20 }
 0x20f   : > { %p15381_p13 = pnand %p15379_p12, %p15365_p8  ;;  %p15387_p1 = scmp.lt.s32.totalorder %s15385_s29, %s15378_s23 }
 0x211   : > { %p15382_p10 = pneg %p15381_p13  ;;  %p15388_p3 = por %p15387_p1, %p15386_p6 }
 0x213   : > { %p15389_p2 = pnand %p15388_p3, %p15382_p10 }
 0x215   : > { %15392 = shalt.err (!%p15389_p2)
}
 0x216   : > { %14736 = dma.hbm_to_vmem [thread:$0]  (!%p16106_p11), %s16104_s4, 128, %s16110_s21, %s701_s7  }
 0x217   : > { %s722_s8 = scalar_lea.vmem [#allocation5], %s12357_s6  ;;  %s718_s30 = sand.u32 1, %s17148_s1  }
 0x218   : > { %s729_s24 = sshll.u32 %s722_s8, 4  ;;  %s12392_s25 = sshll.u32 %s17148_s1, 8  ;;  %s16142_s24 = int_to_ptr.vmem [resolvable:$true] %s729_s24 }
 0x219   : > { %s17160_s29 = sld [smem:[#allocation52_spill]]  ;;  %s16150_s10 = scalar_lea.sflag [#allocation6], %s718_s30 }
 0x21f   : > { %s16148_s9 = scalar_lea.hbm %s17160_s29, %s12392_s25  ;;  %s15398_s7 = scalar_lea.hbm %s17160_s29, 512 }
 0x220   : > { %s15393_s11 = scalar_lea.hbm %s16148_s9, 256  ;;  %p15399_p5 = scmp.lt.u32.totalorder %s16148_s9, %s17160_s29 }
 0x221   : > { %p15394_p6 = scmp.ne.s32.totalorder %s16148_s9, %s15393_s11  ;;  %p15400_p9 = scmp.lt.u32.totalorder %s15398_s7, %s15393_s11 }
 0x222   : > { %p15402_p12 = scmp.lt.u32.totalorder %s15393_s11, %s16148_s9 }
 0x223   : > { %p15396_p10 = pnand %p15394_p6, %p15365_p8  ;;  %p15401_p4 = por %p15400_p9, %p15399_p5 }
 0x225   : > { %p15397_p0 = pneg %p15396_p10  ;;  %p15403_p13 = por %p15402_p12, %p15401_p4 }
 0x227   : > { %p15404_p1 = pnand %p15403_p13, %p15397_p0 }
 0x229   : > { %15407 = shalt.err (!%p15404_p1)
}
 0x22a   : > { %s15408_s21 = scalar_lea.vmem %s16142_s24, 256  ;;  %s15551_s8 = smov [#allocation5]  }
 0x22b   : > { %p15409_p3 = scmp.ne.s32.totalorder %s16142_s24, %s15408_s21  ;;  %s15413_s30 = sshll.u32 %s15551_s8, 4  ;;  %s15414_s30 = int_to_ptr.vmem [resolvable:$false] %s15413_s30 }
 0x22c   : > { %s15415_s25 = scalar_lea.vmem %s15414_s30, 512  ;;  %p15416_p10 = scmp.lt.s32.totalorder %s16142_s24, %s15414_s30 }
 0x22d   : > { %p15411_p2 = pnand %p15409_p3, %p15365_p8  ;;  %p15417_p5 = scmp.lt.s32.totalorder %s15415_s25, %s15408_s21 }
 0x22f   : > { %p15412_p6 = pneg %p15411_p2  ;;  %p15418_p9 = por %p15417_p5, %p15416_p10 }
 0x231   : > { %p15419_p4 = pnand %p15418_p9, %p15412_p6 }
 0x233   : > { %15422 = shalt.err (!%p15419_p4)
}
 0x234   : > { %s17161_s11 = smov 8   ;;  %s17162_s23 = smov 128  }
 0x235   : > { %14739 = dma.hbm_to_vmem [thread:$0]  (!%p16106_p11), %s16148_s9, 256, %s16142_s24, %s16150_s10, %s17162_s23, %s17162_s23, %s17161_s11  }
 0x236   : > { %s17163_s20 = sld [smem:[#allocation50_spill]] }
 0x23c   : > { %p17164_p8 = scmp.ne.s32.totalorder %s17163_s20, 0 }
 0x23d   : > { %s17165_s4 = sld [smem:[#allocation46_spill]] (!%p17164_p8) }
 0x23e   : > { %741 = sbr.rel (%p17164_p8) target bundleno = 7181 (0x1c0d), region = 96 }
 0x243   : > { %s16182_s6 = sand.u32 (!%p17164_p8), 1, %s17165_s4  }
 0x244   : > { %s12361_s7 = sshll.u32 (!%p17164_p8), %s16182_s6, 3  ;;  %s744_s1 = scalar_lea.sflag (!%p17164_p8), [#allocation3], %s16182_s6 }
 0x245   : > { %s16188_s5 = scalar_lea.vmem [#allocation2], %s12361_s7 }
 0x246   : > { %15468 = dma.done.wait (%p16083_p7), %s744_s1, 128  }
 0x247   : > { %15470 = vsyncadd (%p16083_p7), %s744_s1, 4294967168  ;;  %s17166_s9 = sld [smem:[#allocation49_spill]]  ;;  %s12362_s24 = sshll.u32 %s16182_s6, 4 }
 0x248   : > { %s16196_s21 = scalar_lea.vmem [#allocation5], %s12362_s24 }
 0x24d   : > { %s752_s10 = sand.u32 1, %s17166_s9  }
 0x24e   : > { %s753_s0 = scalar_lea.sflag [#allocation6], %s752_s10 }
 0x24f   : > { %15472 = dma.done.wait (%p16083_p7), %s753_s0, 256  }
 0x250   : > { %15474 = vsyncadd (%p16083_p7), %s753_s0, 4294967040  ;;  %p17167_p11 = scmp.eq.s32.totalorder %s17166_s9, 0 }
 0x252   : > { %15476 = dma.done.wait (%p17167_p11), [#allocation6], 512   ;;  %p17168_p0 = pmov %p17167_p11 }
 0x254   : > { %15478 = vsyncadd (%p17168_p0), [#allocation6], 4294966784  ;;  %p17169_p12 = pmov %p17168_p0 }
 0x255   : > { %p17170_p13 = pmov %p17168_p0 }
 0x256   : > { %15480 = dma.done.wait (%p17169_p12), [#allocation9], 528  }
 0x257   : > { %15482 = vsyncadd (%p17170_p13), [#allocation9], 4294966768  ;;  %p17171_p1 = pmov %p17168_p0 }
 0x258   : > { %p17172_p3 = pmov %p17168_p0 }
 0x259   : > { %15484 = dma.done.wait (%p17171_p1), [#allocation12], 528  }
 0x25a   : > { %15486 = vsyncadd (%p17172_p3), [#allocation12], 4294966768  ;;  %p17173_p7 = pmov %p17168_p0 }
 0x25b   : > { %p17174_p2 = pmov %p17168_p0 }
 0x25c   : > { %15488 = dma.done.wait (%p17173_p7), [#allocation15], 528  }
 0x25d   : > { %15490 = vsyncadd (%p17174_p2), [#allocation15], 4294966768  ;;  %p17175_p6 = pmov %p17168_p0 }
 0x25e   : > { %p17176_p10 = pmov %p17168_p0 }
 0x25f   : > { %15492 = dma.done.wait (%p17175_p6), [#allocation18], 528  }
 0x260   : > { %15494 = vsyncadd (%p17176_p10), [#allocation18], 4294966768  ;;  %p17177_p5 = pmov %p17168_p0 }
 0x261   : > { %p17178_p9 = pmov %p17168_p0 }
 0x262   : > { %15496 = dma.done.wait (%p17177_p5), [#allocation21], 48  }
 0x263   : > { %15498 = vsyncadd (%p17178_p9), [#allocation21], 4294967248  ;;  %p17179_p4 = pmov %p17168_p0 }
 0x264   : > { %p17180_p8 = pmov %p17168_p0 }
 0x265   : > { %15500 = dma.done.wait (%p17179_p4), [#allocation24], 64  }
 0x266   : > { %15502 = vsyncadd (%p17180_p8), [#allocation24], 4294967232  ;;  %p17181_p11 = pmov %p17168_p0 }
 0x268   : > { %15504 = dma.done.wait (%p17181_p11), [#allocation27], 528  }
 0x269   : > { %15506 = vsyncadd (%p17168_p0), [#allocation27], 4294966768  ;;  %p17182_p12 = pmov %p17168_p0 }
 0x26a   : > { %p17183_p13 = pmov %p17168_p0 }
 0x26b   : > { %15508 = dma.done.wait (%p17182_p12), [#allocation30], 1040  }
 0x26c   : > { %15510 = vsyncadd (%p17183_p13), [#allocation30], 4294966256  ;;  %v15552_v0 = vmov 0.0|0.0   ;;  %vm15553_vm0 = vmmov 0   ;;  %v15554_v1 = vmov 0.0   ;;  %vm898_vm1 = vcmask 261120  }
 0x26d   : > { %13965 = vmatprep.subr.bf16.mxu0 %v15552_v0  ;;  %12892 = vmatprep.mubr.msk.f32.mxu0 %vm15553_vm0, %v15554_v1  ;;  %v887_v2 = vld [vmem:[#allocation7] sm:$0xff]  ;;  %v888_v3 = vld [vmem:[#allocation7 + $0x8] sm:$0xff]  ;;  %v889_v4 = vld [vmem:[#allocation7 + $0x10] sm:$0xff]  ;;  %s15555_s22 = smov 88   ;;  %s15556_s8 = smov 96   ;;  %vm1390_vm2 = vcmask 64512  }
 0x26e   : > { %13959 = vmatprep.subr.bf16.mxu1 %v15552_v0  ;;  %12881 = vmatprep.mubr.msk.f32.mxu1 %vm15553_vm0, %v15554_v1  ;;  %v903_v5 = vand.u32 4294901760, %v887_v2  ;;  %v906_v6 = vand.u32 4294901760, %v888_v3  ;;  %v890_v7 = vld [vmem:[#allocation7 + $0x18] sm:$0xff]  ;;  %v909_v8 = vand.u32 4294901760, %v889_v4  ;;  %v12381_v43 = vld [vmem:[#allocation8] ss:$0 sm:$0xff] }
 0x26f   : > { %v884_v9 = vld [vmem:[%s16188_s5] sm:$0xff]  ;;  %v912_v10 = vand.u32 4294901760, %v890_v7  ;;  %s15557_s30 = smov 112   ;;  %s15558_s25 = smov 120   ;;  %vm5072_vm3 = vcmask 130048   ;;  %vm5074_vm4 = vcmask 195584  }
 0x270   : > { %v900_v11 = vsel %vm898_vm1, %v884_v9, 0  ;;  %v983_v12 = vsub.f32 %v887_v2, %v903_v5  ;;  %v990_v13 = vsub.f32 %v888_v3, %v906_v6  ;;  %v997_v14 = vsub.f32 %v889_v4, %v909_v8  ;;  %s15559_s11 = smov 104   ;;  %s15560_s23 = smov 80  }
 0x271   : > { %v1004_v15 = vsub.f32 %v890_v7, %v912_v10  ;;  %v971_v16 = vand.u32 4294901760, %v900_v11  ;;  %v13960_v17 = vpack.c.bf16 %v906_v6, %v903_v5  ;;  %v13963_v27 = vpack.c.bf16 %v912_v10, %v909_v8  ;;  %s15561_s20 = smov 72   ;;  %s15562_s4 = smov 64  }
 0x272   : > { %v984_v18 = vand.u32 4294901760, %v983_v12  ;;  %v991_v19 = vand.u32 4294901760, %v990_v13  ;;  %v998_v20 = vand.u32 4294901760, %v997_v14  ;;  %v13972_v37 = vpack.c.bf16 %v990_v13, %v983_v12  ;;  %s15563_s1 = smov 56   ;;  %s15564_s10 = smov 48  }
 0x273   : > { %v1005_v21 = vand.u32 4294901760, %v1004_v15  ;;  %v972_v22 = vsub.f32 %v900_v11, %v971_v16  ;;  %13961 = vmatpush3.bf16.msra.mxu1 %v13960_v17  ;;  %v13975_v38 = vpack.c.bf16 %v1004_v15, %v997_v14  ;;  %s15565_s24 = smov 40   ;;  %s15566_s0 = smov 8   ;;  %vm11500_vm5 = vcmask 523264  }
 0x274   : > { %v985_v23 = vsub.f32 %v983_v12, %v984_v18  ;;  %v992_v24 = vsub.f32 %v990_v13, %v991_v19  ;;  %v999_v25 = vsub.f32 %v997_v14, %v998_v20  ;;  %13962 = vmatprep.subr.bf16.mxu1 %v15552_v0  ;;  %v13984_v39 = vpack.c.bf16 %v991_v19, %v984_v18  ;;  %p17185_p3 = scmp.ne.s32.totalorder %s17155_s2, 0 }
 0x275   : > { %v1006_v26 = vsub.f32 %v1004_v15, %v1005_v21  ;;  %v973_v28 = vand.u32 4294901760, %v972_v22  ;;  %v13987_v40 = vpack.c.bf16 %v1005_v21, %v998_v20 }
 0x276   : > { %v986_v29 = vand.u32 4294901760, %v985_v23  ;;  %v993_v30 = vand.u32 4294901760, %v992_v24  ;;  %v1000_v31 = vand.u32 4294901760, %v999_v25 }
 0x277   : > { %v1007_v32 = vand.u32 4294901760, %v1006_v26  ;;  %13964 = vmatpush3.bf16.msra.mxu1 %v13963_v27  ;;  %v974_v33 = vsub.f32 %v972_v22, %v973_v28 }
 0x278   : > { %v13966_v34 = vpack.c.bf16 %v993_v30, %v986_v29  ;;  %12939 = vmatprep.subr.mxu1 %v15554_v1 }
 0x279   : > { %v975_v35 = vand.u32 4294901760, %v974_v33  ;;  %v13969_v36 = vpack.c.bf16 %v1007_v32, %v1000_v31 }
 0x27a   : > { %13967 = vmatpush3.bf16.msra.mxu0 %v13966_v34 }
 0x27b   : > { %13968 = vmatprep.subr.bf16.mxu0 %v15552_v0  ;;  %12882 = vmatmul.mubr.f32.vlgmr.msra.gmra.mrb[0].mxu1 %v975_v35 }
 0x27c   : > { %12941 = vmatprep.mubr.msk.f32.mxu1 %vm15553_vm0, %v15554_v1 }
 0x27e   : > { %13970 = vmatpush3.bf16.msra.mxu0 %v13969_v36 }
 0x27f   : > { %13971 = vmatprep.subr.bf16.mxu0 %v15552_v0 }
 0x281   : > { %12893 = vmatmul.mubr.f32.vlgmr.msra.gmra.mrb[0].mxu0 %v971_v16 }
 0x282   : > { %13973 = vmatpush3.bf16.msra.mxu0 %v13972_v37  ;;  %12903 = vmatprep.mubr.msk.f32.mxu0 %vm15553_vm0, %v15554_v1 }
 0x283   : > { %13974 = vmatprep.subr.bf16.mxu0 %v15552_v0 }
 0x286   : > { %13976 = vmatpush3.bf16.msra.mxu0 %v13975_v38 }
 0x287   : > { %13977 = vmatprep.subr.bf16.mxu0 %v15552_v0 }
 0x289   : > { %12904 = vmatmul.mubr.f32.vlgmr.msra.gmra.mrb[0].mxu0 %v972_v22 }
 0x28a   : > { %13979 = vmatpush3.bf16.msra.mxu0 %v13960_v17  ;;  %12914 = vmatprep.mubr.msk.f32.mxu0 %vm15553_vm0, %v15554_v1 }
 0x28b   : > { %13980 = vmatprep.subr.bf16.mxu0 %v15552_v0 }
 0x28e   : > { %13982 = vmatpush3.bf16.msra.mxu0 %v13963_v27 }
 0x28f   : > { %13983 = vmatprep.subr.bf16.mxu0 %v15552_v0 }
 0x291   : > { %12915 = vmatmul.mubr.f32.vlgmr.msra.gmra.mrb[0].mxu0 %v973_v28 }
 0x292   : > { %13985 = vmatpush3.bf16.msra.mxu0 %v13984_v39  ;;  %12925 = vmatprep.mubr.msk.f32.mxu0 %vm15553_vm0, %v15554_v1 }
 0x293   : > { %13986 = vmatprep.subr.bf16.mxu0 %v15552_v0 }
 0x296   : > { %13988 = vmatpush3.bf16.msra.mxu0 %v13987_v40 }
 0x297   : > { %13989 = vmatprep.subr.bf16.mxu0 %v15552_v0 }
 0x299   : > { %12926 = vmatmul.mubr.f32.vlgmr.msra.gmra.mrb[0].mxu0 %v971_v16 }
 0x29a   : > { %13991 = vmatpush3.bf16.msra.mxu0 %v13960_v17  ;;  %12936 = vmatprep.mubr.msk.f32.mxu0 %vm15553_vm0, %v15554_v1 }
 0x29b   : > { %13992 = vmatprep.subr.bf16.mxu0 %v15552_v0 }
 0x29e   : > { %13994 = vmatpush3.bf16.msra.mxu0 %v13963_v27 }
 0x29f   : > { %12999 = vmatprep.subr.mxu0 %v15554_v1 }
 0x2a1   : > { %12937 = vmatmul.mubr.f32.vlgmr.msra.gmra.mrb[0].mxu0 %v971_v16 }
 0x2a2   : > { %13001 = vmatprep.mubr.msk.f32.mxu0 %vm15553_vm0, %v15554_v1 }
 0x34e   : > { %v977_v41 = vpop.f32.mrb[0].mxu1 }
 0x34f   : > { %v12883_v42 = vpop.f32.mrb[1].mxu1  ;;  %v978_v44 = vadd.f32 %v12381_v43, %v977_v41 }
 0x374   : > { %v1383_v45 = vpop.f32.mrb[0].mxu0 }
 0x375   : > { %v16270_v46 = vadd.f32 %v1383_v45, %v978_v44  ;;  %v12938_v47 = vpop.f32.mrb[1].mxu0 }
 0x377   : > { %2307 = vrot.lane.b32.xlu1 %v16270_v46, %s15555_s22  ;;  %1388 = vrot.lane.b32.xlu0 %v16270_v46, %s15556_s8  ;;  %v1391_v48 = vsel %vm1390_vm2, %v16270_v46, 0 }
 0x378   : > { %v16288_v49 = vand.u32 4294901760, %v1391_v48 }
 0x37a   : > { %v1462_v50 = vsub.f32 %v1391_v48, %v16288_v49 }
 0x37b   : > { %3223 = vrot.lane.b32.xlu1 %v16270_v46, %s15557_s30  ;;  %2305 = vrot.lane.b32.xlu0 %v16270_v46, %s15558_s25 }
 0x37c   : > { %v1463_v51 = vand.u32 4294901760, %v1462_v50 }
 0x37e   : > { %v1464_v56 = vsub.f32 %v1462_v50, %v1463_v51 }
 0x37f   : > { %4141 = vrot.lane.b32.xlu1 %v16270_v46, %s15559_s11  ;;  %3225 = vrot.lane.b32.xlu0 %v16270_v46, %s15560_s23 }
 0x380   : > { %v1465_v63 = vand.u32 4294901760, %v1464_v56 }
 0x383   : > { %4143 = vrot.lane.b32.xlu0 %v16270_v46, %s15561_s20 }
 0x3e9   : > { %v2308_v52 = vpop.permute.xlu1 %2307  ;;  %v1389_v53 = vpop.permute.xlu0 %1388 }
 0x3ea   : > { %v2311_v54 = vsel %vm1390_vm2, %v2308_v52, 0  ;;  %v1393_v55 = vsel %vm1390_vm2, %v1389_v53, 0 }
 0x3eb   : > { %v16293_v57 = vand.u32 4294901760, %v2311_v54  ;;  %v1396_v58 = vand.u32 4294901760, %v1393_v55 }
 0x3ed   : > { %v2391_v59 = vsub.f32 %v2311_v54, %v16293_v57  ;;  %v1473_v60 = vsub.f32 %v1393_v55, %v1396_v58  ;;  %13000 = vmatpush3.xpose.msra.mxu0 %v16293_v57  ;;  %12940 = vmatpush3.xpose.msra.mxu1 %v1396_v58  ;;  %v2306_v61 = vpop.permute.xlu0 %2305  ;;  %v3224_v13 = vpop.permute.xlu1 %3223 }
 0x3ee   : > { %v2309_v62 = vsel %vm1390_vm2, %v2306_v61, 0  ;;  %12944 = vmatprep.subr.mxu1 %v15554_v1  ;;  %13004 = vmatprep.subr.mxu0 %v15554_v1  ;;  %v3227_v15 = vsel %vm1390_vm2, %v3224_v13, 0 }
 0x3ef   : > { %v1474_v2 = vand.u32 4294901760, %v1473_v60  ;;  %v16300_v3 = vand.u32 4294901760, %v2309_v62  ;;  %v2392_v4 = vand.u32 4294901760, %v2391_v59  ;;  %v3297_v17 = vand.u32 4294901760, %v3227_v15 }
 0x3f0   : > { %12942 = vmatmul.mubr.f32.vlgmr.msra.gmra.mrb[2].mxu1 %v1465_v63 }
 0x3f1   : > { %v1475_v5 = vsub.f32 %v1473_v60, %v1474_v2  ;;  %v2380_v6 = vsub.f32 %v2309_v62, %v16300_v3  ;;  %12946 = vmatprep.mubr.msk.f32.mxu1 %vm15553_vm0, %v15554_v1  ;;  %v2393_v9 = vsub.f32 %v2391_v59, %v2392_v4  ;;  %v3226_v14 = vpop.permute.xlu0 %3225  ;;  %v3298_v19 = vsub.f32 %v3227_v15, %v3297_v17  ;;  %v4142_v27 = vpop.permute.xlu1 %4141 }
 0x3f2   : > { %v3229_v16 = vsel %vm1390_vm2, %v3226_v14, 0  ;;  %v4145_v29 = vsel %vm1390_vm2, %v4142_v27, 0 }
 0x3f3   : > { %v1476_v7 = vand.u32 4294901760, %v1475_v5  ;;  %v2381_v8 = vand.u32 4294901760, %v2380_v6  ;;  %v2394_v12 = vand.u32 4294901760, %v2393_v9  ;;  %v3232_v18 = vand.u32 4294901760, %v3229_v16 }
 0x3f4   : > { %v3299_v21 = vand.u32 4294901760, %v3298_v19  ;;  %v4215_v31 = vand.u32 4294901760, %v4145_v29 }
 0x3f5   : > { %v2382_v10 = vsub.f32 %v2380_v6, %v2381_v8  ;;  %12945 = vmatpush3.xpose.msra.mxu1 %v1476_v7  ;;  %v3309_v20 = vsub.f32 %v3229_v16, %v3232_v18  ;;  %v4144_v28 = vpop.permute.xlu0 %4143 }
 0x3f6   : > { %12949 = vmatprep.subr.mxu1 %v15554_v1  ;;  %v3300_v23 = vsub.f32 %v3298_v19, %v3299_v21  ;;  %v4147_v30 = vsel %vm1390_vm2, %v4144_v28, 0  ;;  %v4216_v33 = vsub.f32 %v4145_v29, %v4215_v31 }
 0x3f7   : > { %v2383_v11 = vand.u32 4294901760, %v2382_v10  ;;  %v3310_v22 = vand.u32 4294901760, %v3309_v20  ;;  %v4150_v32 = vand.u32 4294901760, %v4147_v30 }
 0x3f8   : > { %12947 = vmatmul.mubr.f32.vlgmr.msra.gmra.mrb[2].mxu1 %v16288_v49  ;;  %v3301_v25 = vand.u32 4294901760, %v3300_v23  ;;  %v4217_v35 = vand.u32 4294901760, %v4216_v33 }
 0x3f9   : > { %12950 = vmatpush3.xpose.msra.mxu1 %v1473_v60  ;;  %13002 = vmatmul.mubr.f32.vlgmr.msra.gmra.mrb[2].mxu0 %v2383_v11  ;;  %v3311_v24 = vsub.f32 %v3309_v20, %v3310_v22  ;;  %v4227_v34 = vsub.f32 %v4147_v30, %v4150_v32 }
 0x3fa   : > { %13005 = vmatpush3.xpose.msra.mxu0 %v2394_v12  ;;  %12951 = vmatprep.mubr.msk.f32.mxu1 %vm15553_vm0, %v15554_v1  ;;  %v4218_v37 = vsub.f32 %v4216_v33, %v4217_v35 }
 0x3fb   : > { %12954 = vmatprep.subr.mxu1 %v15554_v1  ;;  %13006 = vmatprep.mubr.msk.f32.mxu0 %vm15553_vm0, %v15554_v1  ;;  %v3312_v26 = vand.u32 4294901760, %v3311_v24  ;;  %v4228_v36 = vand.u32 4294901760, %v4227_v34 }
 0x3fc   : > { %13009 = vmatprep.subr.mxu0 %v15554_v1  ;;  %v4219_v39 = vand.u32 4294901760, %v4218_v37 }
 0x3fd   : > { %v4229_v38 = vsub.f32 %v4227_v34, %v4228_v36 }
 0x3ff   : > { %v4230_v40 = vand.u32 4294901760, %v4229_v38 }
 0x400   : > { %12952 = vmatmul.mubr.f32.vlgmr.msra.gmra.mrb[2].mxu1 %v1462_v50 }
 0x401   : > { %12955 = vmatpush3.xpose.msra.mxu1 %v1396_v58  ;;  %13007 = vmatmul.mubr.f32.vlgmr.msra.gmra.mrb[2].mxu0 %v16300_v3 }
 0x402   : > { %13010 = vmatpush3.xpose.msra.mxu0 %v2391_v59  ;;  %12956 = vmatprep.mubr.msk.f32.mxu1 %vm15553_vm0, %v15554_v1 }
 0x403   : > { %12959 = vmatprep.subr.mxu1 %v15554_v1  ;;  %13011 = vmatprep.mubr.msk.f32.mxu0 %vm15553_vm0, %v15554_v1 }
 0x404   : > { %13014 = vmatprep.subr.mxu0 %v15554_v1 }
 0x408   : > { %12957 = vmatmul.mubr.f32.vlgmr.msra.gmra.mrb[2].mxu1 %v1463_v51 }
 0x409   : > { %12960 = vmatpush3.xpose.msra.mxu1 %v1474_v2  ;;  %13012 = vmatmul.mubr.f32.vlgmr.msra.gmra.mrb[2].mxu0 %v2380_v6 }
 0x40a   : > { %13015 = vmatpush3.xpose.msra.mxu0 %v16293_v57  ;;  %12961 = vmatprep.mubr.msk.f32.mxu1 %vm15553_vm0, %v15554_v1 }
 0x40b   : > { %12964 = vmatprep.subr.mxu1 %v15554_v1  ;;  %13016 = vmatprep.mubr.msk.f32.mxu0 %vm15553_vm0, %v15554_v1 }
 0x40c   : > { %13019 = vmatprep.subr.mxu0 %v15554_v1 }
 0x410   : > { %12962 = vmatmul.mubr.f32.vlgmr.msra.gmra.mrb[2].mxu1 %v16288_v49 }
 0x411   : > { %12965 = vmatpush3.xpose.msra.mxu1 %v1396_v58  ;;  %13017 = vmatmul.mubr.f32.vlgmr.msra.gmra.mrb[2].mxu0 %v2381_v8 }
 0x412   : > { %13020 = vmatpush3.xpose.msra.mxu0 %v2392_v4  ;;  %12966 = vmatprep.mubr.msk.f32.mxu1 %vm15553_vm0, %v15554_v1 }
 0x413   : > { %13021 = vmatprep.mubr.msk.f32.mxu0 %vm15553_vm0, %v15554_v1  ;;  %13024 = vmatprep.subr.mxu0 %v15554_v1 }
 0x414   : > { %12969 = vmatprep.subr.mxu1 %v15554_v1 }
 0x418   : > { %12967 = vmatmul.mubr.f32.vlgmr.msra.gmra.mrb[2].mxu1 %v16288_v49 }
 0x419   : > { %13022 = vmatmul.mubr.f32.vlgmr.msra.gmra.mrb[2].mxu0 %v16300_v3  ;;  %12971 = vmatprep.mubr.msk.f32.mxu1 %vm15553_vm0, %v15554_v1 }
 0x41a   : > { %13025 = vmatpush3.xpose.msra.mxu0 %v16293_v57  ;;  %13026 = vmatprep.mubr.msk.f32.mxu0 %vm15553_vm0, %v15554_v1 }
 0x41b   : > { %13059 = vmatprep.subr.mxu0 %v15554_v1 }
 0x421   : > { %13027 = vmatmul.mubr.f32.vlgmr.msra.gmra.mrb[2].mxu0 %v16300_v3 }
 0x422   : > { %13060 = vmatpush3.xpose.msra.mxu0 %v3232_v18  ;;  %13061 = vmatprep.mubr.msk.f32.mxu0 %vm15553_vm0, %v15554_v1 }
 0x423   : > { %13064 = vmatprep.subr.mxu0 %v15554_v1 }
 0x425   : > { %13062 = vmatmul.mubr.f32.vlgmr.msra.gmra.mrb[4].mxu0 %v3301_v25 }
 0x426   : > { %13065 = vmatpush3.xpose.msra.mxu0 %v3312_v26  ;;  %13066 = vmatprep.mubr.msk.f32.mxu0 %vm15553_vm0, %v15554_v1 }
 0x427   : > { %13069 = vmatprep.subr.mxu0 %v15554_v1 }
 0x42d   : > { %13067 = vmatmul.mubr.f32.vlgmr.msra.gmra.mrb[4].mxu0 %v3297_v17 }
 0x42e   : > { %13070 = vmatpush3.xpose.msra.mxu0 %v3309_v20  ;;  %13071 = vmatprep.mubr.msk.f32.mxu0 %vm15553_vm0, %v15554_v1 }
 0x42f   : > { %13074 = vmatprep.subr.mxu0 %v15554_v1 }
 0x435   : > { %13072 = vmatmul.mubr.f32.vlgmr.msra.gmra.mrb[4].mxu0 %v3298_v19 }
 0x436   : > { %13075 = vmatpush3.xpose.msra.mxu0 %v3232_v18  ;;  %13076 = vmatprep.mubr.msk.f32.mxu0 %vm15553_vm0, %v15554_v1 }
 0x437   : > { %13079 = vmatprep.subr.mxu0 %v15554_v1 }
 0x43d   : > { %13077 = vmatmul.mubr.f32.vlgmr.msra.gmra.mrb[4].mxu0 %v3299_v21 }
 0x43e   : > { %13080 = vmatpush3.xpose.msra.mxu0 %v3310_v22  ;;  %13081 = vmatprep.mubr.msk.f32.mxu0 %vm15553_vm0, %v15554_v1 }
 0x43f   : > { %13084 = vmatprep.subr.mxu0 %v15554_v1 }
 0x445   : > { %13082 = vmatmul.mubr.f32.vlgmr.msra.gmra.mrb[4].mxu0 %v3297_v17 }
 0x446   : > { %13085 = vmatpush3.xpose.msra.mxu0 %v3232_v18  ;;  %13086 = vmatprep.mubr.msk.f32.mxu0 %vm15553_vm0, %v15554_v1 }
 0x447   : > { %13119 = vmatprep.subr.mxu0 %v15554_v1 }
 0x44d   : > { %13087 = vmatmul.mubr.f32.vlgmr.msra.gmra.mrb[4].mxu0 %v3297_v17 }
 0x44e   : > { %13120 = vmatpush3.xpose.msra.mxu0 %v4150_v32  ;;  %13121 = vmatprep.mubr.msk.f32.mxu0 %vm15553_vm0, %v15554_v1 }
 0x44f   : > { %13124 = vmatprep.subr.mxu0 %v15554_v1 }
 0x451   : > { %13122 = vmatmul.mubr.f32.vlgmr.msra.gmra.mrb[6].mxu0 %v4219_v39 }
 0x452   : > { %13125 = vmatpush3.xpose.msra.mxu0 %v4230_v40  ;;  %13126 = vmatprep.mubr.msk.f32.mxu0 %vm15553_vm0, %v15554_v1 }
 0x453   : > { %13129 = vmatprep.subr.mxu0 %v15554_v1 }
 0x459   : > { %13127 = vmatmul.mubr.f32.vlgmr.msra.gmra.mrb[6].mxu0 %v4215_v31 }
 0x45a   : > { %13130 = vmatpush3.xpose.msra.mxu0 %v4227_v34  ;;  %13131 = vmatprep.mubr.msk.f32.mxu0 %vm15553_vm0, %v15554_v1 }
 0x45b   : > { %13134 = vmatprep.subr.mxu0 %v15554_v1 }
 0x461   : > { %13132 = vmatmul.mubr.f32.vlgmr.msra.gmra.mrb[6].mxu0 %v4216_v33 }
 0x462   : > { %13135 = vmatpush3.xpose.msra.mxu0 %v4150_v32  ;;  %13136 = vmatprep.mubr.msk.f32.mxu0 %vm15553_vm0, %v15554_v1 }
 0x463   : > { %13139 = vmatprep.subr.mxu0 %v15554_v1 }
 0x469   : > { %13137 = vmatmul.mubr.f32.vlgmr.msra.gmra.mrb[6].mxu0 %v4217_v35 }
 0x46a   : > { %13140 = vmatpush3.xpose.msra.mxu0 %v4228_v36  ;;  %13141 = vmatprep.mubr.msk.f32.mxu0 %vm15553_vm0, %v15554_v1 }
 0x46b   : > { %13144 = vmatprep.subr.mxu0 %v15554_v1 }
 0x471   : > { %13142 = vmatmul.mubr.f32.vlgmr.msra.gmra.mrb[6].mxu0 %v4215_v31 }
 0x472   : > { %13145 = vmatpush3.xpose.msra.mxu0 %v4150_v32  ;;  %13146 = vmatprep.mubr.msk.f32.mxu0 %vm15553_vm0, %v15554_v1 }
 0x473   : > { %13995 = vmatprep.subr.bf16.mxu0 %v15552_v0 }
 0x479   : > { %13147 = vmatmul.mubr.f32.vlgmr.msra.gmra.mrb[6].mxu0 %v4215_v31 }
 0x47a   : > { %13187 = vmatprep.mubr.msk.f32.mxu0 %vm15553_vm0, %v15554_v1 }
 0x4eb   : > { %v1837_v41 = vpop.f32.mrb[2].mxu1 }
 0x4ec   : > { %v1841_v42 = vmul.f32 0.35355338, %v1837_v41  ;;  %v12968_v43 = vpop.f32.mrb[3].mxu1 }
 0x4ee   : > { %v1842_v44 = vsel %vm1390_vm2, %v1841_v42, -inf }
 0x4ef   : > { %1843 = vmax.xlane.f32.xlu1 %v1842_v44 }
 0x4f4   : > { %v2755_v45 = vpop.f32.mrb[2].mxu0 }
 0x4f5   : > { %v2759_v47 = vmul.f32 0.35355338, %v2755_v45  ;;  %v13028_v48 = vpop.f32.mrb[3].mxu0 }
 0x4f7   : > { %v2760_v49 = vsel %vm1390_vm2, %v2759_v47, -inf }
 0x4f8   : > { %2761 = vmax.xlane.f32.xlu0 %v2760_v49 }
 0x520   : > { %v3673_v50 = vpop.f32.mrb[4].mxu0 }
 0x521   : > { %v3677_v51 = vmul.f32 0.35355338, %v3673_v50  ;;  %v13088_v52 = vpop.f32.mrb[5].mxu0 }
 0x523   : > { %v3678_v53 = vsel %vm1390_vm2, %v3677_v51, -inf }
 0x524   : > { %3679 = vmax.xlane.f32.xlu1 %v3678_v53 }
 0x54c   : > { %v4591_v54 = vpop.f32.mrb[6].mxu0 }
 0x54d   : > { %v4595_v55 = vmul.f32 0.35355338, %v4591_v54  ;;  %v13148_v56 = vpop.f32.mrb[7].mxu0 }
 0x54f   : > { %v4596_v57 = vsel %vm1390_vm2, %v4595_v55, -inf }
 0x550   : > { %4597 = vmax.xlane.f32.xlu1 %v4596_v57 }
 0x57c   : > { %v1844_v58 = vpop.xlane.xlu1 %1843 }
 0x57d   : > { %v1845_v59 = vsub.f32 %v1841_v42, %v1844_v58 }
 0x57f   : > { %v1846_v60 = vmul.f32 1.442695, %v1845_v59 }
 0x581   : > { %14848 = vpow2.f32 %v1846_v60 }
 0x585   : > { %v2762_v61 = vpop.xlane.xlu0 %2761 }
 0x586   : > { %v2763_v62 = vsub.f32 %v2759_v47, %v2762_v61 }
 0x588   : > { %v2764_v63 = vmul.f32 1.442695, %v2763_v62 }
 0x58a   : > { %14850 = vpow2.f32 %v2764_v63 }
 0x58b   : > { %v14849_v2 = vpop.eup %14848 }
 0x58c   : > { %v1848_v3 = vsel %vm1390_vm2, %v14849_v2, 0.0 }
 0x58d   : > { %1849 = vadd.xlane.f32.xlu0 %v1848_v3 }
 0x594   : > { %v14851_v4 = vpop.eup %14850 }
 0x595   : > { %v2766_v5 = vsel %vm1390_vm2, %v14851_v4, 0.0 }
 0x596   : > { %2767 = vadd.xlane.f32.xlu1 %v2766_v5 }
 0x5a3   : > { %1853 = vrot.lane.b32.xlu0 %v16270_v46, %s15562_s4  ;;  %s15567_s4 = smov 16  }
 0x5a7   : > { %2771 = vrot.lane.b32.xlu1 %v16270_v46, %s15563_s1  ;;  %s15568_s1 = smov 24  }
 0x5ab   : > { %3689 = vrot.lane.b32.xlu1 %v16270_v46, %s15564_s10 }
 0x5b1   : > { %v3680_v6 = vpop.xlane.xlu1 %3679 }
 0x5b2   : > { %v3681_v7 = vsub.f32 %v3677_v51, %v3680_v6 }
 0x5b4   : > { %v3682_v8 = vmul.f32 1.442695, %v3681_v7 }
 0x5b6   : > { %14852 = vpow2.f32 %v3682_v8 }
 0x5c0   : > { %v16394_v9 = vpop.eup %14852 }
 0x5c1   : > { %v3684_v10 = vsel %vm1390_vm2, %v16394_v9, 0.0 }
 0x5c2   : > { %3685 = vadd.xlane.f32.xlu0 %v3684_v10 }
 0x5d8   : > { %4607 = vrot.lane.b32.xlu0 %v16270_v46, %s15565_s24 }
 0x5dd   : > { %v4598_v11 = vpop.xlane.xlu1 %4597 }
 0x5de   : > { %v4599_v12 = vsub.f32 %v4595_v55, %v4598_v11 }
 0x5e0   : > { %v4600_v13 = vmul.f32 1.442695, %v4599_v12 }
 0x5e2   : > { %14854 = vpow2.f32 %v4600_v13 }
 0x5ec   : > { %v16399_v14 = vpop.eup %14854 }
 0x5ed   : > { %v4602_v15 = vsel %vm1390_vm2, %v16399_v14, 0.0 }
 0x5ee   : > { %4603 = vadd.xlane.f32.xlu1 %v4602_v15 }
 0x61a   : > { %v1850_v16 = vpop.xlane.xlu0 %1849 }
 0x61b   : > { %14856 = vrcp.f32 %v1850_v16 }
 0x61e   : > { %v1854_v17 = vpop.permute.xlu0 %1853 }
 0x61f   : > { %v1860_v18 = vand.u32 4294901760, %v1854_v17 }
 0x621   : > { %12970 = vmatpush3.msra.mxu1 %v1860_v18  ;;  %v1937_v46 = vsub.f32 %v1854_v17, %v1860_v18 }
 0x622   : > { %12974 = vmatprep.subr.mxu1 %v15554_v1 }
 0x623   : > { %v1938_v23 = vand.u32 4294901760, %v1937_v46  ;;  %v2768_v30 = vpop.xlane.xlu1 %2767 }
 0x624   : > { %14858 = vrcp.f32 %v2768_v30 }
 0x625   : > { %v14857_v19 = vpop.eup %14856  ;;  %v1939_v26 = vsub.f32 %v1937_v46, %v1938_v23 }
 0x626   : > { %v1852_v20 = vmul.f32 %v14857_v19, %v14849_v2  ;;  %v5077_v19 = vld [vmem:[#allocation10 + $0x8] sm:$0xff] }
 0x627   : > { %v1940_v29 = vand.u32 4294901760, %v1939_v26  ;;  %v2772_v34 = vpop.permute.xlu1 %2771 }
 0x628   : > { %v1857_v21 = vsel %vm1390_vm2, %v1852_v20, 0  ;;  %v2778_v36 = vand.u32 4294901760, %v2772_v34 }
 0x629   : > { %v1925_v22 = vand.u32 4294901760, %v1857_v21 }
 0x62a   : > { %v2855_v38 = vsub.f32 %v2772_v34, %v2778_v36 }
 0x62b   : > { %v1926_v24 = vsub.f32 %v1857_v21, %v1925_v22  ;;  %v3690_v50 = vpop.permute.xlu1 %3689 }
 0x62c   : > { %v2856_v40 = vand.u32 4294901760, %v2855_v38  ;;  %v3696_v52 = vand.u32 4294901760, %v3690_v50 }
 0x62d   : > { %v1927_v25 = vand.u32 4294901760, %v1926_v24 }
 0x62e   : > { %v14859_v31 = vpop.eup %14858  ;;  %v2857_v42 = vsub.f32 %v2855_v38, %v2856_v40  ;;  %v3773_v54 = vsub.f32 %v3690_v50, %v3696_v52 }
 0x62f   : > { %v1928_v27 = vsub.f32 %v1926_v24, %v1927_v25  ;;  %v2770_v32 = vmul.f32 %v14859_v31, %v14851_v4 }
 0x630   : > { %v2858_v44 = vand.u32 4294901760, %v2857_v42  ;;  %v3774_v56 = vand.u32 4294901760, %v3773_v54 }
 0x631   : > { %v1929_v28 = vand.u32 4294901760, %v1928_v27  ;;  %v2775_v33 = vsel %vm1390_vm2, %v2770_v32, 0  ;;  %v5078_v32 = vld [vmem:[#allocation10 + $0x10] sm:$0xff] }
 0x632   : > { %v2843_v35 = vand.u32 4294901760, %v2775_v33  ;;  %v3775_v58 = vsub.f32 %v3773_v54, %v3774_v56  ;;  %v5097_v34 = vand.u32 4294901760, %v5078_v32 }
 0x633   : > { %12972 = vmatmul.mubr.f32.vlgmr.msra.gmra.mrb[4].mxu1 %v1929_v28 }
 0x634   : > { %12975 = vmatpush3.msra.mxu1 %v1940_v29  ;;  %12976 = vmatprep.mubr.msk.f32.mxu1 %vm15553_vm0, %v15554_v1  ;;  %v2844_v37 = vsub.f32 %v2775_v33, %v2843_v35  ;;  %v3776_v60 = vand.u32 4294901760, %v3775_v58  ;;  %v5079_v33 = vld [vmem:[#allocation10 + $0x18] sm:$0xff] }
 0x635   : > { %12979 = vmatprep.subr.mxu1 %v15554_v1 }
 0x636   : > { %v2845_v39 = vand.u32 4294901760, %v2844_v37 }
 0x638   : > { %v2846_v41 = vsub.f32 %v2844_v37, %v2845_v39 }
 0x63a   : > { %v2847_v43 = vand.u32 4294901760, %v2846_v41 }
 0x63b   : > { %12977 = vmatmul.mubr.f32.vlgmr.msra.gmra.mrb[4].mxu1 %v1925_v22 }
 0x63c   : > { %12980 = vmatpush3.msra.mxu1 %v1937_v46  ;;  %12981 = vmatprep.mubr.msk.f32.mxu1 %vm15553_vm0, %v15554_v1  ;;  %v5094_v46 = vand.u32 4294901760, %v5077_v19 }
 0x63d   : > { %12984 = vmatprep.subr.mxu1 %v15554_v1 }
 0x643   : > { %12982 = vmatmul.mubr.f32.vlgmr.msra.gmra.mrb[4].mxu1 %v1926_v24 }
 0x644   : > { %12985 = vmatpush3.msra.mxu1 %v1860_v18  ;;  %12986 = vmatprep.mubr.msk.f32.mxu1 %vm15553_vm0, %v15554_v1 }
 0x645   : > { %12989 = vmatprep.subr.mxu1 %v15554_v1 }
 0x64b   : > { %12987 = vmatmul.mubr.f32.vlgmr.msra.gmra.mrb[4].mxu1 %v1927_v25 }
 0x64c   : > { %12990 = vmatpush3.msra.mxu1 %v1938_v23  ;;  %12991 = vmatprep.mubr.msk.f32.mxu1 %vm15553_vm0, %v15554_v1 }
 0x64d   : > { %12994 = vmatprep.subr.mxu1 %v15554_v1 }
 0x64f   : > { %v3686_v45 = vpop.xlane.xlu0 %3685 }
 0x650   : > { %14860 = vrcp.f32 %v3686_v45 }
 0x653   : > { %12992 = vmatmul.mubr.f32.vlgmr.msra.gmra.mrb[4].mxu1 %v1925_v22  ;;  %v4608_v3 = vpop.permute.xlu0 %4607 }
 0x654   : > { %12995 = vmatpush3.msra.mxu1 %v1860_v18  ;;  %12996 = vmatprep.mubr.msk.f32.mxu1 %vm15553_vm0, %v15554_v1  ;;  %v4614_v5 = vand.u32 4294901760, %v4608_v3  ;;  %v5076_v18 = vld [vmem:[#allocation10] sm:$0xff] }
 0x655   : > { %13029 = vmatprep.subr.mxu1 %v15554_v1  ;;  %v5091_v20 = vand.u32 4294901760, %v5076_v18 }
 0x656   : > { %v4691_v7 = vsub.f32 %v4608_v3, %v4614_v5 }
 0x657   : > { %v16482_v21 = vsub.f32 %v5076_v18, %v5091_v20  ;;  %v13996_v45 = vpack.c.bf16 %v5094_v46, %v5091_v20 }
 0x659   : > { %v5172_v23 = vand.u32 4294901760, %v16482_v21  ;;  %13997 = vmatpush3.bf16.msra.mxu0 %v13996_v45 }
 0x65a   : > { %v14861_v47 = vpop.eup %14860  ;;  %13998 = vmatprep.subr.bf16.mxu0 %v15552_v0 }
 0x65b   : > { %12997 = vmatmul.mubr.f32.vlgmr.msra.gmra.mrb[4].mxu1 %v1925_v22  ;;  %v3688_v48 = vmul.f32 %v14861_v47, %v16394_v9  ;;  %v4692_v9 = vand.u32 4294901760, %v4691_v7  ;;  %v16484_v22 = vsub.f32 %v5077_v19, %v5094_v46  ;;  %v5173_v25 = vsub.f32 %v16482_v21, %v5172_v23 }
 0x65c   : > { %13030 = vmatpush3.msra.mxu1 %v2778_v36  ;;  %13031 = vmatprep.mubr.msk.f32.mxu1 %vm15553_vm0, %v15554_v1 }
 0x65d   : > { %13034 = vmatprep.subr.mxu1 %v15554_v1  ;;  %v3693_v49 = vsel %vm1390_vm2, %v3688_v48, 0  ;;  %v4693_v11 = vsub.f32 %v4691_v7, %v4692_v9  ;;  %v5179_v24 = vand.u32 4294901760, %v16484_v22  ;;  %v5174_v27 = vand.u32 4294901760, %v5173_v25  ;;  %v6100_v25 = vld [vmem:[#allocation16] sm:$0xff] }
 0x65e   : > { %v3761_v51 = vand.u32 4294901760, %v3693_v49  ;;  %v14008_v48 = vpack.c.bf16 %v16484_v22, %v16482_v21 }
 0x65f   : > { %13032 = vmatmul.mubr.f32.vlgmr.msra.gmra.mrb[6].mxu1 %v2847_v43  ;;  %v4694_v13 = vand.u32 4294901760, %v4693_v11  ;;  %v5180_v26 = vsub.f32 %v16484_v22, %v5179_v24  ;;  %v14886_v22 = vld [vmem:[%s16188_s5] sm:$0xff]  ;;  %s12389_s5 = sshll.u32 %s17166_s9, 7 }
 0x660   : > { %13035 = vmatpush3.msra.mxu1 %v2858_v44  ;;  %13036 = vmatprep.mubr.msk.f32.mxu1 %vm15553_vm0, %v15554_v1  ;;  %v3762_v53 = vsub.f32 %v3693_v49, %v3761_v51 }
 0x661   : > { %13039 = vmatprep.subr.mxu1 %v15554_v1  ;;  %v5181_v28 = vand.u32 4294901760, %v5180_v26  ;;  %v6101_v26 = vld [vmem:[#allocation16 + $0x8] sm:$0xff] }
 0x662   : > { %v3763_v55 = vand.u32 4294901760, %v3762_v53 }
 0x663   : > { %v14002_v29 = vpack.c.bf16 %v5181_v28, %v5174_v27  ;;  %v6102_v27 = vld [vmem:[#allocation16 + $0x10] sm:$0xff]  ;;  %v6118_v28 = vand.u32 4294901760, %v6100_v25 }
 0x664   : > { %v3764_v57 = vsub.f32 %v3762_v53, %v3763_v55 }
 0x666   : > { %v3765_v59 = vand.u32 4294901760, %v3764_v57 }
 0x667   : > { %13037 = vmatmul.mubr.f32.vlgmr.msra.gmra.mrb[6].mxu1 %v2843_v35 }
 0x668   : > { %13040 = vmatpush3.msra.mxu1 %v2855_v38  ;;  %13041 = vmatprep.mubr.msk.f32.mxu1 %vm15553_vm0, %v15554_v1 }
 0x669   : > { %13044 = vmatprep.subr.mxu1 %v15554_v1 }
 0x66f   : > { %13042 = vmatmul.mubr.f32.vlgmr.msra.gmra.mrb[6].mxu1 %v2844_v37 }
 0x670   : > { %13045 = vmatpush3.msra.mxu1 %v2778_v36  ;;  %13046 = vmatprep.mubr.msk.f32.mxu1 %vm15553_vm0, %v15554_v1 }
 0x671   : > { %13049 = vmatprep.subr.mxu1 %v15554_v1 }
 0x677   : > { %13047 = vmatmul.mubr.f32.vlgmr.msra.gmra.mrb[6].mxu1 %v2845_v39 }
 0x678   : > { %13050 = vmatpush3.msra.mxu1 %v2856_v40  ;;  %13051 = vmatprep.mubr.msk.f32.mxu1 %vm15553_vm0, %v15554_v1 }
 0x679   : > { %13054 = vmatprep.subr.mxu1 %v15554_v1 }
 0x67b   : > { %v4604_v61 = vpop.xlane.xlu1 %4603 }
 0x67c   : > { %14862 = vrcp.f32 %v4604_v61 }
 0x67f   : > { %13052 = vmatmul.mubr.f32.vlgmr.msra.gmra.mrb[6].mxu1 %v2843_v35 }
 0x680   : > { %13055 = vmatpush3.msra.mxu1 %v2778_v36  ;;  %13056 = vmatprep.mubr.msk.f32.mxu1 %vm15553_vm0, %v15554_v1  ;;  %v5185_v36 = vsub.f32 %v5078_v32, %v5097_v34  ;;  %v885_v32 = vld [vmem:[%s16196_s21] sm:$0xff] }
 0x681   : > { %13089 = vmatprep.subr.mxu1 %v15554_v1 }
 0x682   : > { %v5186_v38 = vand.u32 4294901760, %v5185_v36 }
 0x684   : > { %v5187_v40 = vsub.f32 %v5185_v36, %v5186_v38 }
 0x686   : > { %v14863_v62 = vpop.eup %14862  ;;  %v5188_v42 = vand.u32 4294901760, %v5187_v40  ;;  %v6208_v40 = vsub.f32 %v6100_v25, %v6118_v28 }
 0x687   : > { %13057 = vmatmul.mubr.f32.vlgmr.msra.gmra.mrb[6].mxu1 %v2843_v35  ;;  %v4606_v63 = vmul.f32 %v14863_v62, %v16399_v14  ;;  %v5100_v35 = vand.u32 4294901760, %v5079_v33 }
 0x688   : > { %13090 = vmatpush3.msra.mxu1 %v3696_v52  ;;  %13091 = vmatprep.mubr.msk.f32.mxu1 %vm15553_vm0, %v15554_v1 }
 0x689   : > { %13094 = vmatprep.subr.mxu1 %v15554_v1  ;;  %v4611_v2 = vsel %vm1390_vm2, %v4606_v63, 0  ;;  %v5192_v37 = vsub.f32 %v5079_v33, %v5100_v35  ;;  %v13999_v47 = vpack.c.bf16 %v5100_v35, %v5097_v34  ;;  %v886_v33 = vld [vmem:[%s16196_s21 + $0x8] sm:$0xff]  ;;  %v6112_v35 = vsel %vm898_vm1, %v885_v32, 0  ;;  %s883_s21 = scalar_lea.vmem [#allocation32], %s12361_s7  ;;  %s15569_s7 = smov [#allocation32]  }
 0x68a   : > { %v4679_v4 = vand.u32 4294901760, %v4611_v2  ;;  %s15427_s9 = sshll.u32 %s15569_s7, 4  ;;  %s15428_s9 = int_to_ptr.vmem [resolvable:$false] %s15427_s9 }
 0x68b   : > { %13092 = vmatmul.mubr.f32.vlgmr.msra.gmra.mrb[8].mxu1 %v3765_v59  ;;  %v5193_v39 = vand.u32 4294901760, %v5192_v37  ;;  %14000 = vmatpush3.bf16.msra.mxu0 %v13999_v47  ;;  %s15429_s10 = scalar_lea.vmem %s15428_s9, 256 }
 0x68c   : > { %13095 = vmatpush3.msra.mxu1 %v3776_v60  ;;  %13096 = vmatprep.mubr.msk.f32.mxu1 %vm15553_vm0, %v15554_v1  ;;  %v4680_v6 = vsub.f32 %v4611_v2, %v4679_v4 }
 0x68d   : > { %13099 = vmatprep.subr.mxu1 %v15554_v1  ;;  %v5194_v41 = vsub.f32 %v5192_v37, %v5193_v39  ;;  %14007 = vmatprep.subr.bf16.mxu0 %v15552_v0 }
 0x68e   : > { %v4681_v8 = vand.u32 4294901760, %v4680_v6 }
 0x68f   : > { %v5195_v43 = vand.u32 4294901760, %v5194_v41 }
 0x690   : > { %v4682_v10 = vsub.f32 %v4680_v6, %v4681_v8 }
 0x691   : > { %v14005_v44 = vpack.c.bf16 %v5195_v43, %v5188_v42 }
 0x692   : > { %v4683_v12 = vand.u32 4294901760, %v4682_v10 }
 0x693   : > { %13097 = vmatmul.mubr.f32.vlgmr.msra.gmra.mrb[8].mxu1 %v3761_v51 }
 0x694   : > { %13100 = vmatpush3.msra.mxu1 %v3773_v54  ;;  %13101 = vmatprep.mubr.msk.f32.mxu1 %vm15553_vm0, %v15554_v1 }
 0x695   : > { %13104 = vmatprep.subr.mxu1 %v15554_v1 }
 0x69b   : > { %13102 = vmatmul.mubr.f32.vlgmr.msra.gmra.mrb[8].mxu1 %v3762_v53  ;;  %v14023_v53 = vpack.c.bf16 %v5193_v39, %v5186_v38  ;;  %v16530_v38 = vand.u32 4294901760, %v6112_v35 }
 0x69c   : > { %13105 = vmatpush3.msra.mxu1 %v3696_v52  ;;  %13106 = vmatprep.mubr.msk.f32.mxu1 %vm15553_vm0, %v15554_v1 }
 0x69d   : > { %13109 = vmatprep.subr.mxu1 %v15554_v1 }
 0x6a3   : > { %13107 = vmatmul.mubr.f32.vlgmr.msra.gmra.mrb[8].mxu1 %v3763_v55 }
 0x6a4   : > { %13110 = vmatpush3.msra.mxu1 %v3774_v56  ;;  %13111 = vmatprep.mubr.msk.f32.mxu1 %vm15553_vm0, %v15554_v1 }
 0x6a5   : > { %13114 = vmatprep.subr.mxu1 %v15554_v1 }
 0x6ab   : > { %13112 = vmatmul.mubr.f32.vlgmr.msra.gmra.mrb[8].mxu1 %v3761_v51 }
 0x6ac   : > { %13115 = vmatpush3.msra.mxu1 %v3696_v52  ;;  %13116 = vmatprep.mubr.msk.f32.mxu1 %vm15553_vm0, %v15554_v1  ;;  %v14020_v52 = vpack.c.bf16 %v5179_v24, %v5172_v23 }
 0x6ad   : > { %13149 = vmatprep.subr.mxu1 %v15554_v1 }
 0x6b3   : > { %13117 = vmatmul.mubr.f32.vlgmr.msra.gmra.mrb[8].mxu1 %v3761_v51  ;;  %v14011_v51 = vpack.c.bf16 %v5192_v37, %v5185_v36  ;;  %v6115_v36 = vsel %vm898_vm1, %v886_v33, 0 }
 0x6b4   : > { %13150 = vmatpush3.msra.mxu1 %v4614_v5  ;;  %13151 = vmatprep.mubr.msk.f32.mxu1 %vm15553_vm0, %v15554_v1  ;;  %v16532_v39 = vand.u32 4294901760, %v6115_v36 }
 0x6b5   : > { %13154 = vmatprep.subr.mxu1 %v15554_v1 }
 0x6b7   : > { %13152 = vmatmul.mubr.f32.vlgmr.msra.gmra.mrb[10].mxu1 %v4683_v12 }
 0x6b8   : > { %13155 = vmatpush3.msra.mxu1 %v4694_v13  ;;  %13156 = vmatprep.mubr.msk.f32.mxu1 %vm15553_vm0, %v15554_v1 }
 0x6b9   : > { %13159 = vmatprep.subr.mxu1 %v15554_v1 }
 0x6bf   : > { %13157 = vmatmul.mubr.f32.vlgmr.msra.gmra.mrb[10].mxu1 %v4679_v4 }
 0x6c0   : > { %13160 = vmatpush3.msra.mxu1 %v4691_v7  ;;  %13161 = vmatprep.mubr.msk.f32.mxu1 %vm15553_vm0, %v15554_v1 }
 0x6c1   : > { %13164 = vmatprep.subr.mxu1 %v15554_v1 }
 0x6c7   : > { %13162 = vmatmul.mubr.f32.vlgmr.msra.gmra.mrb[10].mxu1 %v4680_v6  ;;  %v12382_v6 = vld [vmem:[#allocation11] ss:$0 sm:$0xff] }
 0x6c8   : > { %13165 = vmatpush3.msra.mxu1 %v4614_v5  ;;  %13166 = vmatprep.mubr.msk.f32.mxu1 %vm15553_vm0, %v15554_v1 }
 0x6c9   : > { %13169 = vmatprep.subr.mxu1 %v15554_v1 }
 0x6cf   : > { %13167 = vmatmul.mubr.f32.vlgmr.msra.gmra.mrb[10].mxu1 %v4681_v8 }
 0x6d0   : > { %13170 = vmatpush3.msra.mxu1 %v4692_v9  ;;  %13171 = vmatprep.mubr.msk.f32.mxu1 %vm15553_vm0, %v15554_v1 }
 0x6d1   : > { %13174 = vmatprep.subr.mxu1 %v15554_v1 }
 0x6d7   : > { %13172 = vmatmul.mubr.f32.vlgmr.msra.gmra.mrb[10].mxu1 %v4679_v4 }
 0x6d8   : > { %13175 = vmatpush3.msra.mxu1 %v4614_v5  ;;  %13176 = vmatprep.mubr.msk.f32.mxu1 %vm15553_vm0, %v15554_v1 }
 0x6d9   : > { %14001 = vmatprep.subr.bf16.mxu1 %v15552_v0 }
 0x6df   : > { %13177 = vmatmul.mubr.f32.vlgmr.msra.gmra.mrb[10].mxu1 %v4679_v4 }
 0x6e0   : > { %13198 = vmatprep.mubr.msk.f32.mxu1 %vm15553_vm0, %v15554_v1  ;;  %14003 = vmatpush3.bf16.msra.mxu1 %v14002_v29  ;;  %v6121_v29 = vand.u32 4294901760, %v6101_v26 }
 0x6e1   : > { %14004 = vmatprep.subr.bf16.mxu1 %v15552_v0 }
 0x6e2   : > { %v16528_v37 = vpack.c.bf16 %v6121_v29, %v6118_v28  ;;  %v6215_v42 = vsub.f32 %v6101_v26, %v6121_v29 }
 0x6e4   : > { %14006 = vmatpush3.bf16.msra.mxu1 %v14005_v44 }
 0x6e5   : > { %14013 = vmatprep.subr.bf16.mxu1 %v15552_v0 }
 0x72e   : > { %v2301_v14 = vpop.f32.mrb[4].mxu1 }
 0x72f   : > { %v12998_v15 = vpop.f32.mrb[5].mxu1 }
 0x75a   : > { %v3219_v16 = vpop.f32.mrb[6].mxu1 }
 0x75b   : > { %5060 = vrot.lane.b32.xlu1 %v3219_v16, %s15566_s0  ;;  %v13058_v17 = vpop.f32.mrb[7].mxu1 }
 0x786   : > { %v4137_v30 = vpop.f32.mrb[8].mxu1 }
 0x787   : > { %5064 = vrot.lane.b32.xlu0 %v4137_v30, %s15567_s4  ;;  %v13118_v31 = vpop.f32.mrb[9].mxu1  ;;  %v6103_v30 = vld [vmem:[#allocation16 + $0x18] sm:$0xff] }
 0x788   : > { %v6124_v31 = vand.u32 4294901760, %v6102_v27  ;;  %v6127_v34 = vand.u32 4294901760, %v6103_v30 }
 0x78a   : > { %v16534_v41 = vpack.c.bf16 %v6127_v34, %v6124_v31  ;;  %v6222_v43 = vsub.f32 %v6102_v27, %v6124_v31  ;;  %v6229_v44 = vsub.f32 %v6103_v30, %v6127_v34 }
 0x7b2   : > { %v5055_v49 = vpop.f32.mrb[10].mxu1 }
 0x7b3   : > { %5068 = vrot.lane.b32.xlu0 %v5055_v49, %s15568_s1  ;;  %v13178_v50 = vpop.f32.mrb[11].mxu1  ;;  %v6216_v49 = vand.u32 4294901760, %v6215_v42 }
 0x7b4   : > { %v6223_v50 = vand.u32 4294901760, %v6222_v43 }
 0x7cd   : > { %v5061_v54 = vpop.permute.xlu1 %5060 }
 0x7ce   : > { %v5071_v56 = vsel %vm1390_vm2, %v2301_v14, %v5061_v54 }
 0x7f9   : > { %v5065_v55 = vpop.permute.xlu0 %5064 }
 0x7fa   : > { %v5073_v57 = vsel %vm5072_vm3, %v5071_v56, %v5065_v55  ;;  %v6217_v55 = vsub.f32 %v6215_v42, %v6216_v49  ;;  %v6224_v56 = vsub.f32 %v6222_v43, %v6223_v50 }
 0x825   : > { %v5069_v58 = vpop.permute.xlu0 %5068 }
 0x826   : > { %v5075_v59 = vsel %vm5074_vm4, %v5073_v57, %v5069_v58 }
 0x827   : > { %v5088_v60 = vsel %vm898_vm1, %v5075_v59, 0 }
 0x828   : > { %v5159_v61 = vand.u32 4294901760, %v5088_v60 }
 0x82a   : > { %v5160_v62 = vsub.f32 %v5088_v60, %v5159_v61  ;;  %13199 = vmatmul.mubr.f32.vlgmr.msra.gmra.mrb[12].mxu1 %v5159_v61 }
 0x82b   : > { %14015 = vmatpush3.bf16.msra.mxu1 %v13996_v45  ;;  %13220 = vmatprep.mubr.msk.f32.mxu1 %vm15553_vm0, %v15554_v1 }
 0x82c   : > { %14016 = vmatprep.subr.bf16.mxu1 %v15552_v0  ;;  %v5161_v63 = vand.u32 4294901760, %v5160_v62 }
 0x82e   : > { %v5162_v2 = vsub.f32 %v5160_v62, %v5161_v63 }
 0x82f   : > { %14018 = vmatpush3.bf16.msra.mxu1 %v13999_v47 }
 0x830   : > { %14025 = vmatprep.subr.bf16.mxu1 %v15552_v0  ;;  %v5163_v3 = vand.u32 4294901760, %v5162_v2 }
 0x832   : > { %13221 = vmatmul.mubr.f32.vlgmr.msra.gmra.mrb[14].mxu1 %v5161_v63  ;;  %13188 = vmatmul.mubr.f32.vlgmr.msra.gmra.mrb[8].mxu0 %v5163_v3 }
 0x833   : > { %14009 = vmatpush3.bf16.msra.mxu0 %v14008_v48  ;;  %14027 = vmatpush3.bf16.msra.mxu1 %v13996_v45  ;;  %v6187_v45 = vsub.f32 %v6112_v35, %v16530_v38  ;;  %v6209_v48 = vand.u32 4294901760, %v6208_v40 }
 0x834   : > { %14010 = vmatprep.subr.bf16.mxu0 %v15552_v0  ;;  %14028 = vmatprep.subr.bf16.mxu1 %v15552_v0 }
 0x835   : > { %13209 = vmatprep.mubr.msk.f32.mxu0 %vm15553_vm0, %v15554_v1  ;;  %13242 = vmatprep.mubr.msk.f32.mxu1 %vm15553_vm0, %v15554_v1  ;;  %v6210_v54 = vsub.f32 %v6208_v40, %v6209_v48 }
 0x837   : > { %14012 = vmatpush3.bf16.msra.mxu0 %v14011_v51  ;;  %14030 = vmatpush3.bf16.msra.mxu1 %v13999_v47  ;;  %v6197_v47 = vsub.f32 %v6115_v36, %v16532_v39  ;;  %v6230_v51 = vand.u32 4294901760, %v6229_v44  ;;  %v6211_v60 = vand.u32 4294901760, %v6210_v54 }
 0x838   : > { %14019 = vmatprep.subr.bf16.mxu0 %v15552_v0  ;;  %14068 = vmatprep.subr.bf16.mxu1 %v16528_v37 }
 0x839   : > { %v6231_v57 = vsub.f32 %v6229_v44, %v6230_v51 }
 0x83a   : > { %13210 = vmatmul.mubr.f32.vlgmr.msra.gmra.mrb[10].mxu0 %v5160_v62  ;;  %13243 = vmatmul.mubr.f32.vlgmr.msra.gmra.mrb[16].mxu1 %v5159_v61  ;;  %v6225_v62 = vand.u32 4294901760, %v6224_v56 }
 0x83b   : > { %14021 = vmatpush3.bf16.msra.mxu0 %v14020_v52  ;;  %13231 = vmatprep.mubr.msk.f32.mxu0 %vm15553_vm0, %v15554_v1  ;;  %v6188_v52 = vand.u32 4294901760, %v6187_v45  ;;  %v6232_v63 = vand.u32 4294901760, %v6231_v57 }
 0x83c   : > { %14022 = vmatprep.subr.bf16.mxu0 %v15552_v0  ;;  %14070 = vmatpush3.bf16.msra.mxu1 %v16528_v37 }
 0x83d   : > { %14072 = vmatprep.subr.bf16.mxu1 %v16534_v41  ;;  %v6189_v58 = vsub.f32 %v6187_v45, %v6188_v52 }
 0x83f   : > { %14024 = vmatpush3.bf16.msra.mxu0 %v14023_v53  ;;  %v6198_v53 = vand.u32 4294901760, %v6197_v47  ;;  %v6190_v2 = vand.u32 4294901760, %v6189_v58 }
 0x840   : > { %14031 = vmatprep.subr.bf16.mxu0 %v15552_v0  ;;  %14074 = vmatpush3.bf16.msra.mxu1 %v16534_v41 }
 0x841   : > { %v6199_v59 = vsub.f32 %v6197_v47, %v6198_v53  ;;  %13319 = vmatprep.mubr.f32.mxu1 %v6190_v2 }
 0x842   : > { %13232 = vmatmul.mubr.f32.vlgmr.msra.gmra.mrb[12].mxu0 %v5159_v61  ;;  %v6218_v61 = vand.u32 4294901760, %v6217_v55 }
 0x843   : > { %13253 = vmatprep.mubr.msk.f32.mxu0 %vm15553_vm0, %v15554_v1  ;;  %v6200_v3 = vand.u32 4294901760, %v6199_v59 }
 0x845   : > { %13320 = vmatmul.mubr.f32.vlgmr.msra.gmra.mrb[18].mxu1 %v6200_v3 }
 0x846   : > { %13330 = vmatprep.mubr.f32.mxu1 %v16530_v38 }
 0x8fd   : > { %v5256_v4 = vpop.f32.mrb[12].mxu1 }
 0x8fe   : > { %v13200_v5 = vpop.f32.mrb[13].mxu1 }
 0x8ff   : > { %v14079_v5 = vpack.c.bf16 %v6232_v63, %v6225_v62 }
 0x905   : > { %v5413_v7 = vpop.f32.mrb[14].mxu1  ;;  %v5165_v8 = vpop.f32.mrb[8].mxu0 }
 0x906   : > { %v5166_v9 = vadd.f32 %v12382_v6, %v5165_v8  ;;  %v13222_v10 = vpop.f32.mrb[15].mxu1  ;;  %v13189_v11 = vpop.f32.mrb[9].mxu0  ;;  %v14083_v6 = vpack.c.bf16 %v6215_v42, %v6208_v40 }
 0x908   : > { %v5257_v12 = vadd.f32 %v5256_v4, %v5166_v9  ;;  %v14075_v4 = vpack.c.bf16 %v6218_v61, %v6211_v60 }
 0x90a   : > { %14076 = vmatprep.subr.bf16.mxu1 %v14075_v4 }
 0x90b   : > { %14078 = vmatpush3.bf16.msra.mxu1 %v14075_v4 }
 0x90c   : > { %14080 = vmatprep.subr.bf16.mxu1 %v14079_v5 }
 0x90d   : > { %v5336_v13 = vpop.f32.mrb[10].mxu0  ;;  %v5571_v14 = vpop.f32.mrb[16].mxu1 }
 0x90e   : > { %v5337_v15 = vadd.f32 %v5336_v13, %v5257_v12  ;;  %v13211_v16 = vpop.f32.mrb[11].mxu0  ;;  %v13244_v17 = vpop.f32.mrb[17].mxu1  ;;  %v14099_v13 = vpack.c.bf16 %v6216_v49, %v6209_v48  ;;  %v5591_v49 = vlaneseq }
 0x90f   : > { %14082 = vmatpush3.bf16.msra.mxu1 %v14079_v5  ;;  %v5602_v16 = vld [vmem:[#allocation13 + $0x8] sm:$0xff]  ;;  %v5603_v17 = vld [vmem:[#allocation13 + $0x10] sm:$0xff]  ;;  %v12384_v5 = vld [vmem:[#allocation17] ss:$0 sm:$0xff] }
 0x910   : > { %v5414_v18 = vadd.f32 %v5413_v7, %v5337_v15  ;;  %14084 = vmatprep.subr.bf16.mxu1 %v14083_v6  ;;  %v14087_v7 = vpack.c.bf16 %v6229_v44, %v6222_v43  ;;  %v5601_v15 = vld [vmem:[#allocation13] sm:$0xff] }
 0x912   : > { %13331 = vmatmul.mubr.f32.vlgmr.msra.gmra.mrb[18].mxu1 %v16532_v39 }
 0x913   : > { %14086 = vmatpush3.bf16.msra.mxu1 %v14083_v6  ;;  %13341 = vmatprep.mubr.f32.mxu1 %v6187_v45 }
 0x914   : > { %14088 = vmatprep.subr.bf16.mxu1 %v14087_v7 }
 0x915   : > { %v5496_v19 = vpop.f32.mrb[12].mxu0 }
 0x916   : > { %v5497_v20 = vadd.f32 %v5496_v19, %v5414_v18  ;;  %v13233_v46 = vpop.f32.mrb[13].mxu0  ;;  %v5616_v18 = vand.u32 4294901760, %v5601_v15  ;;  %v5619_v19 = vand.u32 4294901760, %v5602_v16 }
 0x917   : > { %14090 = vmatpush3.bf16.msra.mxu1 %v14087_v7  ;;  %v5622_v46 = vand.u32 4294901760, %v5603_v17 }
 0x918   : > { %v5572_v21 = vadd.f32 %v5571_v14, %v5497_v20  ;;  %14092 = vmatprep.subr.bf16.mxu1 %v16528_v37  ;;  %v14103_v14 = vpack.c.bf16 %v6230_v51, %v6223_v50  ;;  %v5604_v20 = vld [vmem:[#allocation13 + $0x18] sm:$0xff]  ;;  %v5592_v51 = vshrl.u32 %v5591_v49, 7 }
 0x919   : > { %v5710_v25 = vsub.f32 %v5603_v17, %v5622_v46 }
 0x91a   : > { %v16520_v23 = vadd.f32 %v14886_v22, %v5572_v21  ;;  %13342 = vmatmul.mubr.f32.vlgmr.msra.gmra.mrb[18].mxu1 %v6197_v47  ;;  %v5625_v21 = vand.u32 4294901760, %v5604_v20  ;;  %v16565_v22 = vpack.c.bf16 %v5619_v19, %v5616_v18  ;;  %v16575_v54 = vsub.s32 1, %v5592_v51 }
 0x91b   : > { %14094 = vmatpush3.bf16.msra.mxu1 %v16528_v37  ;;  %13352 = vmatprep.mubr.f32.mxu1 %v6188_v52  ;;  %v5711_v34 = vand.u32 4294901760, %v5710_v25  ;;  %v16573_v52 = vsub.s32 0, %v5592_v51 }
 0x91c   : > { %v5577_v24 = vsel %vm898_vm1, %v16520_v23, 0.0  ;;  %14096 = vmatprep.subr.bf16.mxu1 %v16534_v41  ;;  %v5717_v26 = vsub.f32 %v5604_v20, %v5625_v21  ;;  %14033 = vmatpush3.bf16.msra.mxu0 %v16565_v22  ;;  %v16568_v27 = vpack.c.bf16 %v5625_v21, %v5622_v46 }
 0x91d   : > { %5578 = vadd.xlane.f32.xlu0 %v5577_v24  ;;  %v5703_v24 = vsub.f32 %v5602_v16, %v5619_v19  ;;  %14034 = vmatprep.subr.bf16.mxu0 %v15552_v0 }
 0x91e   : > { %v5718_v35 = vand.u32 4294901760, %v5717_v26  ;;  %v14047_v43 = vpack.c.bf16 %v5717_v26, %v5710_v25 }
 0x91f   : > { %14098 = vmatpush3.bf16.msra.mxu1 %v16534_v41  ;;  %v5704_v29 = vand.u32 4294901760, %v5703_v24 }
 0x920   : > { %14100 = vmatprep.subr.bf16.mxu1 %v14099_v13  ;;  %14036 = vmatpush3.bf16.msra.mxu0 %v16568_v27  ;;  %v14059_v45 = vpack.c.bf16 %v5718_v35, %v5711_v34 }
 0x921   : > { %14037 = vmatprep.subr.bf16.mxu0 %v15552_v0  ;;  %v5705_v31 = vsub.f32 %v5703_v24, %v5704_v29 }
 0x922   : > { %13353 = vmatmul.mubr.f32.vlgmr.msra.gmra.mrb[18].mxu1 %v6198_v53  ;;  %v5576_v53 = vld [vmem:[#allocation22] sm:$0x3] }
 0x923   : > { %13363 = vmatprep.mubr.f32.mxu1 %v16530_v38  ;;  %14102 = vmatpush3.bf16.msra.mxu1 %v14099_v13  ;;  %v5706_v33 = vand.u32 4294901760, %v5705_v31  ;;  %v5594_v55 = vrot.slane %v5576_v53, %v16573_v52  ;;  %v5599_v58 = vrot.slane %v5576_v53, %v16575_v54 }
 0x924   : > { %14104 = vmatprep.subr.bf16.mxu1 %v14103_v14 }
 0x927   : > { %14106 = vmatpush3.bf16.msra.mxu1 %v14103_v14 }
 0x928   : > { %14108 = vmatprep.subr.bf16.mxu1 %v16528_v37 }
 0x92a   : > { %13364 = vmatmul.mubr.f32.vlgmr.msra.gmra.mrb[18].mxu1 %v16532_v39 }
 0x92b   : > { %14110 = vmatpush3.bf16.msra.mxu1 %v16528_v37  ;;  %13374 = vmatprep.mubr.f32.mxu1 %v16530_v38  ;;  %v5712_v37 = vsub.f32 %v5710_v25, %v5711_v34  ;;  %v5719_v38 = vsub.f32 %v5717_v26, %v5718_v35  ;;  %v12383_v25 = vld [vmem:[#allocation14] ss:$0 sm:$0xff] }
 0x92c   : > { %14112 = vmatprep.subr.bf16.mxu1 %v16534_v41 }
 0x92d   : > { %v5720_v40 = vand.u32 4294901760, %v5719_v38 }
 0x92f   : > { %14114 = vmatpush3.bf16.msra.mxu1 %v16534_v41 }
 0x930   : > { %14133 = vmatprep.subr.bf16.mxu1 %v15552_v0 }
 0x932   : > { %13375 = vmatmul.mubr.f32.vlgmr.msra.gmra.mrb[18].mxu1 %v16532_v39  ;;  %v5713_v39 = vand.u32 4294901760, %v5712_v37 }
 0x933   : > { %13423 = vmatprep.mubr.msk.f32.mxu1 %vm15553_vm0, %v15554_v1 }
 0x934   : > { %v14041_v41 = vpack.c.bf16 %v5720_v40, %v5713_v39 }
 0x9aa   : > { %v5579_v8 = vpop.xlane.xlu0 %5578 }
 0x9ab   : > { %v5581_v9 = vmul.f32 0.03125, %v5579_v8 }
 0x9ad   : > { %v16550_v10 = vsub.f32 %v16520_v23, %v5581_v9  ;;  %v5696_v23 = vsub.f32 %v5601_v15, %v5616_v18 }
 0x9af   : > { %v5583_v11 = vmul.f32 %v16550_v10, %v16550_v10  ;;  %v5697_v28 = vand.u32 4294901760, %v5696_v23  ;;  %v14044_v42 = vpack.c.bf16 %v5703_v24, %v5696_v23 }
 0x9b1   : > { %v5584_v12 = vsel %vm898_vm1, %v5583_v11, 0.0  ;;  %v5698_v30 = vsub.f32 %v5696_v23, %v5697_v28  ;;  %v14056_v44 = vpack.c.bf16 %v5704_v29, %v5697_v28 }
 0x9b2   : > { %5585 = vadd.xlane.f32.xlu1 %v5584_v12 }
 0x9b3   : > { %v5699_v32 = vand.u32 4294901760, %v5698_v30 }
 0x9b5   : > { %v14038_v36 = vpack.c.bf16 %v5706_v33, %v5699_v32 }
 0xa05   : > { %v13376_v6 = vpop.f32.mrb[18].mxu1 }
 0xa06   : > { %v16610_v7 = vadd.f32 %v13376_v6, %v12384_v5  ;;  %v6635_v8 = vpop.f32.mrb[19].mxu1 }
 0xa07   : > { %v16612_v9 = vadd.f32 %v12384_v5, %v6635_v8 }
 0xa09   : > { %7125 = vrot.lane.b32.xlu1 %v16612_v9, %s15556_s8  ;;  %v6649_v11 = vsel %vm1390_vm2, %v16612_v9, 0 }
 0xa0a   : > { %v6655_v13 = vand.u32 4294901760, %v6649_v11 }
 0xa0c   : > { %v6733_v16 = vsub.f32 %v6649_v11, %v6655_v13 }
 0xa0d   : > { %7595 = vrot.lane.b32.xlu1 %v16612_v9, %s15558_s25 }
 0xa0e   : > { %v6734_v17 = vand.u32 4294901760, %v6733_v16 }
 0xa10   : > { %v6735_v19 = vsub.f32 %v6733_v16, %v6734_v17 }
 0xa11   : > { %7597 = vrot.lane.b32.xlu1 %v16610_v7, %s15558_s25 }
 0xa12   : > { %v6736_v21 = vand.u32 4294901760, %v6735_v19 }
 0xa3f   : > { %v5586_v47 = vpop.xlane.xlu1 %5585 }
 0xa40   : > { %v5587_v48 = vmul.f32 0.03125, %v5586_v47 }
 0xa42   : > { %v5588_v50 = vadd.f32 1e-05, %v5587_v48 }
 0xa44   : > { %14864 = vrsqrt.f32 %v5588_v50 }
 0xa4e   : > { %v14865_v56 = vpop.eup %14864 }
 0xa4f   : > { %v5590_v57 = vmul.f32 %v14865_v56, %v16550_v10  ;;  %v6652_v10 = vsel %vm1390_vm2, %v16610_v7, 0 }
 0xa50   : > { %v6658_v12 = vand.u32 4294901760, %v6652_v10 }
 0xa51   : > { %v5595_v59 = vmul.f32 %v5594_v55, %v5590_v57 }
 0xa52   : > { %v6740_v14 = vsub.f32 %v6652_v10, %v6658_v12  ;;  %v14116_v15 = vpack.c.bf16 %v6658_v12, %v6655_v13 }
 0xa53   : > { %v16580_v60 = vadd.f32 %v5599_v58, %v5595_v59 }
 0xa54   : > { %v6741_v18 = vand.u32 4294901760, %v6740_v14  ;;  %v14122_v46 = vpack.c.bf16 %v6740_v14, %v6733_v16 }
 0xa55   : > { %v5613_v61 = vsel %vm898_vm1, %v16580_v60, 0 }
 0xa56   : > { %v5684_v62 = vand.u32 4294901760, %v5613_v61  ;;  %v6742_v20 = vsub.f32 %v6740_v14, %v6741_v18  ;;  %v14128_v23 = vpack.c.bf16 %v6741_v18, %v6734_v17 }
 0xa58   : > { %v5685_v63 = vsub.f32 %v5613_v61, %v5684_v62 }
 0xa5a   : > { %v5686_v2 = vand.u32 4294901760, %v5685_v63 }
 0xa5c   : > { %v5687_v3 = vsub.f32 %v5685_v63, %v5686_v2 }
 0xa5e   : > { %v5688_v4 = vand.u32 4294901760, %v5687_v3 }
 0xa60   : > { %13254 = vmatmul.mubr.f32.vlgmr.msra.gmra.mrb[14].mxu0 %v5688_v4 }
 0xa61   : > { %14039 = vmatpush3.bf16.msra.mxu0 %v14038_v36  ;;  %13264 = vmatprep.mubr.msk.f32.mxu0 %vm15553_vm0, %v15554_v1 }
 0xa62   : > { %14040 = vmatprep.subr.bf16.mxu0 %v15552_v0 }
 0xa65   : > { %14042 = vmatpush3.bf16.msra.mxu0 %v14041_v41 }
 0xa66   : > { %14043 = vmatprep.subr.bf16.mxu0 %v15552_v0 }
 0xa68   : > { %13265 = vmatmul.mubr.f32.vlgmr.msra.gmra.mrb[14].mxu0 %v5684_v62 }
 0xa69   : > { %14045 = vmatpush3.bf16.msra.mxu0 %v14044_v42  ;;  %13275 = vmatprep.mubr.msk.f32.mxu0 %vm15553_vm0, %v15554_v1 }
 0xa6a   : > { %14046 = vmatprep.subr.bf16.mxu0 %v15552_v0 }
 0xa6d   : > { %14048 = vmatpush3.bf16.msra.mxu0 %v14047_v43 }
 0xa6e   : > { %14049 = vmatprep.subr.bf16.mxu0 %v15552_v0 }
 0xa70   : > { %13276 = vmatmul.mubr.f32.vlgmr.msra.gmra.mrb[14].mxu0 %v5685_v63 }
 0xa71   : > { %14051 = vmatpush3.bf16.msra.mxu0 %v16565_v22  ;;  %13286 = vmatprep.mubr.msk.f32.mxu0 %vm15553_vm0, %v15554_v1 }
 0xa72   : > { %14052 = vmatprep.subr.bf16.mxu0 %v15552_v0 }
 0xa75   : > { %14054 = vmatpush3.bf16.msra.mxu0 %v16568_v27 }
 0xa76   : > { %14055 = vmatprep.subr.bf16.mxu0 %v15552_v0 }
 0xa78   : > { %13287 = vmatmul.mubr.f32.vlgmr.msra.gmra.mrb[14].mxu0 %v5686_v2 }
 0xa79   : > { %14057 = vmatpush3.bf16.msra.mxu0 %v14056_v44  ;;  %13297 = vmatprep.mubr.msk.f32.mxu0 %vm15553_vm0, %v15554_v1 }
 0xa7a   : > { %14058 = vmatprep.subr.bf16.mxu0 %v15552_v0 }
 0xa7d   : > { %14060 = vmatpush3.bf16.msra.mxu0 %v14059_v45  ;;  %v7126_v45 = vpop.permute.xlu1 %7125 }
 0xa7e   : > { %14061 = vmatprep.subr.bf16.mxu0 %v15552_v0  ;;  %v7135_v48 = vand.u32 4294901760, %v7126_v45 }
 0xa80   : > { %13298 = vmatmul.mubr.f32.vlgmr.msra.gmra.mrb[14].mxu0 %v5684_v62  ;;  %v7213_v53 = vsub.f32 %v7126_v45, %v7135_v48 }
 0xa81   : > { %14063 = vmatpush3.bf16.msra.mxu0 %v16565_v22  ;;  %13308 = vmatprep.mubr.msk.f32.mxu0 %vm15553_vm0, %v15554_v1  ;;  %v6743_v22 = vand.u32 4294901760, %v6742_v20  ;;  %v7596_v12 = vpop.permute.xlu1 %7595 }
 0xa82   : > { %14064 = vmatprep.subr.bf16.mxu0 %v15552_v0  ;;  %v7214_v58 = vand.u32 4294901760, %v7213_v53 }
 0xa83   : > { %v14119_v24 = vpack.c.bf16 %v6743_v22, %v6736_v21 }
 0xa84   : > { %v7215_v2 = vsub.f32 %v7213_v53, %v7214_v58 }
 0xa85   : > { %14066 = vmatpush3.bf16.msra.mxu0 %v16568_v27  ;;  %v7598_v13 = vpop.permute.xlu1 %7597 }
 0xa86   : > { %14115 = vmatprep.subr.bf16.mxu0 %v15552_v0  ;;  %v7216_v6 = vand.u32 4294901760, %v7215_v2  ;;  %v7603_v16 = vsel %vm1390_vm2, %v7598_v13, 0 }
 0xa87   : > { %v7609_v19 = vand.u32 4294901760, %v7603_v16 }
 0xa88   : > { %13309 = vmatmul.mubr.f32.vlgmr.msra.gmra.mrb[14].mxu0 %v5684_v62 }
 0xa89   : > { %13381 = vmatprep.mubr.msk.f32.mxu0 %vm15553_vm0, %v15554_v1  ;;  %v7691_v22 = vsub.f32 %v7603_v16, %v7609_v19 }
 0xa8e   : > { %14117 = vmatpush3.bf16.xpose.msra.mxu0 %v14116_v15 }
 0xa8f   : > { %14118 = vmatprep.subr.bf16.mxu0 %v15552_v0 }
 0xb5b   : > { %v6096_v26 = vpop.f32.mrb[14].mxu0 }
 0xb5c   : > { %v16625_v27 = vadd.f32 %v12383_v25, %v6096_v26  ;;  %v13310_v28 = vpop.f32.mrb[15].mxu0  ;;  %v7692_v25 = vand.u32 4294901760, %v7691_v22 }
 0xb5e   : > { %v6646_v29 = vsel %vm1390_vm2, %v16625_v27, 0 }
 0xb5f   : > { %v6721_v30 = vand.u32 4294901760, %v6646_v29 }
 0xb61   : > { %v6722_v31 = vsub.f32 %v6646_v29, %v6721_v30 }
 0xb63   : > { %v6723_v32 = vand.u32 4294901760, %v6722_v31 }
 0xb65   : > { %v6724_v33 = vsub.f32 %v6722_v31, %v6723_v32 }
 0xb67   : > { %v6725_v34 = vand.u32 4294901760, %v6724_v33 }
 0xb69   : > { %13382 = vmatmul.mubr.f32.vlgmr.msra.gmra.mrb[16].mxu0 %v6725_v34 }
 0xb6a   : > { %14120 = vmatpush3.bf16.xpose.msra.mxu0 %v14119_v24  ;;  %13388 = vmatprep.mubr.msk.f32.mxu0 %vm15553_vm0, %v15554_v1 }
 0xb6b   : > { %14121 = vmatprep.subr.bf16.mxu0 %v15552_v0 }
 0xb71   : > { %13389 = vmatmul.mubr.f32.vlgmr.msra.gmra.mrb[16].mxu0 %v6721_v30 }
 0xb72   : > { %14123 = vmatpush3.bf16.xpose.msra.mxu0 %v14122_v46  ;;  %13395 = vmatprep.mubr.msk.f32.mxu0 %vm15553_vm0, %v15554_v1 }
 0xb73   : > { %14124 = vmatprep.subr.bf16.mxu0 %v15552_v0 }
 0xb79   : > { %13396 = vmatmul.mubr.f32.vlgmr.msra.gmra.mrb[16].mxu0 %v6722_v31 }
 0xb7a   : > { %14126 = vmatpush3.bf16.xpose.msra.mxu0 %v14116_v15  ;;  %13402 = vmatprep.mubr.msk.f32.mxu0 %vm15553_vm0, %v15554_v1 }
 0xb7b   : > { %14127 = vmatprep.subr.bf16.mxu0 %v15552_v0 }
 0xb81   : > { %13403 = vmatmul.mubr.f32.vlgmr.msra.gmra.mrb[16].mxu0 %v6723_v32 }
 0xb82   : > { %14129 = vmatpush3.bf16.xpose.msra.mxu0 %v14128_v23  ;;  %13409 = vmatprep.mubr.msk.f32.mxu0 %vm15553_vm0, %v15554_v1 }
 0xb83   : > { %14130 = vmatprep.subr.bf16.mxu0 %v15552_v0 }
 0xb89   : > { %13410 = vmatmul.mubr.f32.vlgmr.msra.gmra.mrb[16].mxu0 %v6721_v30 }
 0xb8a   : > { %14132 = vmatpush3.bf16.xpose.msra.mxu0 %v14116_v15  ;;  %13416 = vmatprep.mubr.msk.f32.mxu0 %vm15553_vm0, %v15554_v1  ;;  %v7601_v15 = vsel %vm1390_vm2, %v7596_v12, 0 }
 0xb8b   : > { %14169 = vmatprep.subr.bf16.mxu0 %v15552_v0  ;;  %v7606_v18 = vand.u32 4294901760, %v7601_v15 }
 0xb8d   : > { %v7684_v21 = vsub.f32 %v7601_v15, %v7606_v18  ;;  %v14152_v29 = vpack.c.bf16 %v7609_v19, %v7606_v18 }
 0xb8f   : > { %v7685_v24 = vand.u32 4294901760, %v7684_v21 }
 0xb91   : > { %13417 = vmatmul.mubr.f32.vlgmr.msra.gmra.mrb[16].mxu0 %v6721_v30  ;;  %v7686_v28 = vsub.f32 %v7684_v21, %v7685_v24  ;;  %v7693_v30 = vsub.f32 %v7691_v22, %v7692_v25 }
 0xb92   : > { %13507 = vmatprep.mubr.msk.f32.mxu0 %vm15553_vm0, %v15554_v1 }
 0xb93   : > { %v7687_v32 = vand.u32 4294901760, %v7686_v28  ;;  %v7694_v33 = vand.u32 4294901760, %v7693_v30 }
 0xc64   : > { %v7109_v35 = vpop.f32.mrb[16].mxu0 }
 0xc65   : > { %v7113_v36 = vmul.f32 0.35355338, %v7109_v35  ;;  %v13418_v37 = vpop.f32.mrb[17].mxu0  ;;  %v14155_v35 = vpack.c.bf16 %v7694_v33, %v7687_v32 }
 0xc66   : > { %v14164_v37 = vpack.c.bf16 %v7692_v25, %v7685_v24 }
 0xc67   : > { %v7114_v38 = vsel %vm5072_vm3, %v7113_v36, -inf }
 0xc68   : > { %7115 = vmax.xlane.f32.xlu0 %v7114_v38 }
 0xcf5   : > { %v7116_v39 = vpop.xlane.xlu0 %7115 }
 0xcf6   : > { %v7117_v40 = vsub.f32 %v7113_v36, %v7116_v39  ;;  %v14158_v36 = vpack.c.bf16 %v7691_v22, %v7684_v21 }
 0xcf8   : > { %v7118_v41 = vmul.f32 1.442695, %v7117_v40 }
 0xcfa   : > { %14866 = vpow2.f32 %v7118_v41 }
 0xd04   : > { %v14867_v42 = vpop.eup %14866 }
 0xd05   : > { %v7120_v43 = vsel %vm5072_vm3, %v14867_v42, 0.0 }
 0xd06   : > { %7121 = vadd.xlane.f32.xlu0 %v7120_v43 }
 0xd1c   : > { %7127 = vrot.lane.b32.xlu0 %v16610_v7, %s15556_s8 }
 0xd20   : > { %7593 = vrot.lane.b32.xlu0 %v16625_v27, %s15558_s25  ;;  %s17184_s25 = sld [smem:[#allocation66_spill]] }
 0xd93   : > { %v7122_v44 = vpop.xlane.xlu0 %7121 }
 0xd94   : > { %14868 = vrcp.f32 %v7122_v44 }
 0xd97   : > { %v7128_v47 = vpop.permute.xlu0 %7127 }
 0xd98   : > { %v7138_v49 = vand.u32 4294901760, %v7128_v47 }
 0xd9a   : > { %v14134_v50 = vpack.c.bf16 %v7138_v49, %v7135_v48  ;;  %v7220_v51 = vsub.f32 %v7128_v47, %v7138_v49 }
 0xd9b   : > { %v7594_v17 = vpop.permute.xlu0 %7593 }
 0xd9c   : > { %14135 = vmatpush3.bf16.msra.mxu1 %v14134_v50  ;;  %v7221_v57 = vand.u32 4294901760, %v7220_v51  ;;  %v14140_v11 = vpack.c.bf16 %v7220_v51, %v7213_v53  ;;  %v7599_v20 = vsel %vm1390_vm2, %v7594_v17, 0 }
 0xd9d   : > { %14136 = vmatprep.subr.bf16.mxu1 %v15552_v0  ;;  %v7672_v46 = vand.u32 4294901760, %v7599_v20 }
 0xd9e   : > { %v14869_v55 = vpop.eup %14868  ;;  %v7222_v62 = vsub.f32 %v7220_v51, %v7221_v57  ;;  %v14146_v14 = vpack.c.bf16 %v7221_v57, %v7214_v58 }
 0xd9f   : > { %v7124_v56 = vmul.f32 %v14869_v55, %v14867_v42  ;;  %v7673_v23 = vsub.f32 %v7599_v20, %v7672_v46 }
 0xda0   : > { %v7223_v4 = vand.u32 4294901760, %v7222_v62 }
 0xda1   : > { %v7132_v59 = vsel %vm5072_vm3, %v7124_v56, 0  ;;  %v7674_v26 = vand.u32 4294901760, %v7673_v23 }
 0xda2   : > { %v7201_v61 = vand.u32 4294901760, %v7132_v59  ;;  %v14137_v10 = vpack.c.bf16 %v7223_v4, %v7216_v6 }
 0xda3   : > { %v7675_v31 = vsub.f32 %v7673_v23, %v7674_v26 }
 0xda4   : > { %v7202_v63 = vsub.f32 %v7132_v59, %v7201_v61 }
 0xda5   : > { %v7676_v34 = vand.u32 4294901760, %v7675_v31 }
 0xda6   : > { %v7203_v3 = vand.u32 4294901760, %v7202_v63 }
 0xda8   : > { %v7204_v5 = vsub.f32 %v7202_v63, %v7203_v3 }
 0xdaa   : > { %v7205_v8 = vand.u32 4294901760, %v7204_v5 }
 0xdac   : > { %13424 = vmatmul.mubr.f32.vlgmr.msra.gmra.mrb[20].mxu1 %v7205_v8 }
 0xdad   : > { %14138 = vmatpush3.bf16.msra.mxu1 %v14137_v10  ;;  %13430 = vmatprep.mubr.msk.f32.mxu1 %vm15553_vm0, %v15554_v1 }
 0xdae   : > { %14139 = vmatprep.subr.bf16.mxu1 %v15552_v0 }
 0xdb4   : > { %13431 = vmatmul.mubr.f32.vlgmr.msra.gmra.mrb[20].mxu1 %v7201_v61 }
 0xdb5   : > { %14141 = vmatpush3.bf16.msra.mxu1 %v14140_v11  ;;  %13437 = vmatprep.mubr.msk.f32.mxu1 %vm15553_vm0, %v15554_v1 }
 0xdb6   : > { %14142 = vmatprep.subr.bf16.mxu1 %v15552_v0 }
 0xdbc   : > { %13438 = vmatmul.mubr.f32.vlgmr.msra.gmra.mrb[20].mxu1 %v7202_v63 }
 0xdbd   : > { %14144 = vmatpush3.bf16.msra.mxu1 %v14134_v50  ;;  %13444 = vmatprep.mubr.msk.f32.mxu1 %vm15553_vm0, %v15554_v1 }
 0xdbe   : > { %14145 = vmatprep.subr.bf16.mxu1 %v15552_v0 }
 0xdc4   : > { %13445 = vmatmul.mubr.f32.vlgmr.msra.gmra.mrb[20].mxu1 %v7203_v3 }
 0xdc5   : > { %14147 = vmatpush3.bf16.msra.mxu1 %v14146_v14  ;;  %13451 = vmatprep.mubr.msk.f32.mxu1 %vm15553_vm0, %v15554_v1 }
 0xdc6   : > { %14148 = vmatprep.subr.bf16.mxu1 %v15552_v0 }
 0xdcc   : > { %13452 = vmatmul.mubr.f32.vlgmr.msra.gmra.mrb[20].mxu1 %v7201_v61 }
 0xdcd   : > { %14150 = vmatpush3.bf16.msra.mxu1 %v14134_v50  ;;  %13458 = vmatprep.mubr.msk.f32.mxu1 %vm15553_vm0, %v15554_v1 }
 0xdce   : > { %14151 = vmatprep.subr.bf16.mxu1 %v15552_v0 }
 0xdd4   : > { %13459 = vmatmul.mubr.f32.vlgmr.msra.gmra.mrb[20].mxu1 %v7201_v61 }
 0xdd5   : > { %13465 = vmatprep.mubr.msk.f32.mxu1 %vm15553_vm0, %v15554_v1 }
 0xdd6   : > { %14153 = vmatpush3.bf16.xpose.msra.mxu1 %v14152_v29 }
 0xdd7   : > { %14154 = vmatprep.subr.bf16.mxu1 %v15552_v0 }
 0xddd   : > { %13466 = vmatmul.mubr.f32.vlgmr.msra.gmra.mrb[22].mxu1 %v7676_v34 }
 0xdde   : > { %14156 = vmatpush3.bf16.xpose.msra.mxu1 %v14155_v35  ;;  %13472 = vmatprep.mubr.msk.f32.mxu1 %vm15553_vm0, %v15554_v1 }
 0xddf   : > { %14157 = vmatprep.subr.bf16.mxu1 %v15552_v0 }
 0xde5   : > { %13473 = vmatmul.mubr.f32.vlgmr.msra.gmra.mrb[22].mxu1 %v7672_v46 }
 0xde6   : > { %14159 = vmatpush3.bf16.xpose.msra.mxu1 %v14158_v36  ;;  %13479 = vmatprep.mubr.msk.f32.mxu1 %vm15553_vm0, %v15554_v1 }
 0xde7   : > { %14160 = vmatprep.subr.bf16.mxu1 %v15552_v0 }
 0xded   : > { %13480 = vmatmul.mubr.f32.vlgmr.msra.gmra.mrb[22].mxu1 %v7673_v23 }
 0xdee   : > { %14162 = vmatpush3.bf16.xpose.msra.mxu1 %v14152_v29  ;;  %13486 = vmatprep.mubr.msk.f32.mxu1 %vm15553_vm0, %v15554_v1 }
 0xdef   : > { %14163 = vmatprep.subr.bf16.mxu1 %v15552_v0 }
 0xdf5   : > { %13487 = vmatmul.mubr.f32.vlgmr.msra.gmra.mrb[22].mxu1 %v7674_v26 }
 0xdf6   : > { %14165 = vmatpush3.bf16.xpose.msra.mxu1 %v14164_v37  ;;  %13493 = vmatprep.mubr.msk.f32.mxu1 %vm15553_vm0, %v15554_v1 }
 0xdf7   : > { %14166 = vmatprep.subr.bf16.mxu1 %v15552_v0 }
 0xdfd   : > { %13494 = vmatmul.mubr.f32.vlgmr.msra.gmra.mrb[22].mxu1 %v7672_v46 }
 0xdfe   : > { %14168 = vmatpush3.bf16.xpose.msra.mxu1 %v14152_v29  ;;  %13500 = vmatprep.mubr.msk.f32.mxu1 %vm15553_vm0, %v15554_v1 }
 0xdff   : > { %14205 = vmatprep.subr.bf16.mxu1 %v15552_v0 }
 0xe05   : > { %13501 = vmatmul.mubr.f32.vlgmr.msra.gmra.mrb[22].mxu1 %v7672_v46 }
 0xe06   : > { %13591 = vmatprep.mubr.msk.f32.mxu1 %vm15553_vm0, %v15554_v1 }
 0xea7   : > { %v16692_v38 = vpop.f32.mrb[20].mxu1 }
 0xea8   : > { %v13460_v39 = vpop.f32.mrb[21].mxu1 }
 0xed8   : > { %v8060_v40 = vpop.f32.mrb[22].mxu1 }
 0xed9   : > { %v8064_v41 = vmul.f32 0.35355338, %v8060_v40  ;;  %v13502_v42 = vpop.f32.mrb[23].mxu1 }
 0xedb   : > { %v8065_v43 = vsel %vm5072_vm3, %v8064_v41, -inf }
 0xedc   : > { %8066 = vmax.xlane.f32.xlu1 %v8065_v43 }
 0xeed   : > { %8078 = vrot.lane.b32.xlu1 %v16610_v7, %s15555_s22 }
 0xef1   : > { %8546 = vrot.lane.b32.xlu1 %v16612_v9, %s15557_s30 }
 0xef5   : > { %8544 = vrot.lane.b32.xlu1 %v16625_v27, %s15557_s30 }
 0xf69   : > { %v8067_v44 = vpop.xlane.xlu1 %8066 }
 0xf6a   : > { %v8068_v45 = vsub.f32 %v8064_v41, %v8067_v44 }
 0xf6c   : > { %v8069_v47 = vmul.f32 1.442695, %v8068_v45 }
 0xf6d   : > { %v8079_v51 = vpop.permute.xlu1 %8078 }
 0xf6e   : > { %14870 = vpow2.f32 %v8069_v47  ;;  %v8089_v55 = vand.u32 4294901760, %v8079_v51 }
 0xf70   : > { %v8171_v59 = vsub.f32 %v8079_v51, %v8089_v55 }
 0xf71   : > { %v8547_v17 = vpop.permute.xlu1 %8546 }
 0xf72   : > { %v8172_v2 = vand.u32 4294901760, %v8171_v59  ;;  %v8552_v21 = vsel %vm1390_vm2, %v8547_v17, 0 }
 0xf73   : > { %v8557_v24 = vand.u32 4294901760, %v8552_v21 }
 0xf74   : > { %v8173_v8 = vsub.f32 %v8171_v59, %v8172_v2 }
 0xf75   : > { %v8545_v20 = vpop.permute.xlu1 %8544  ;;  %v8635_v28 = vsub.f32 %v8552_v21, %v8557_v24 }
 0xf76   : > { %v8174_v13 = vand.u32 4294901760, %v8173_v8  ;;  %v8550_v22 = vsel %vm1390_vm2, %v8545_v20, 0 }
 0xf77   : > { %v8623_v25 = vand.u32 4294901760, %v8550_v22  ;;  %v8636_v31 = vand.u32 4294901760, %v8635_v28 }
 0xf78   : > { %v14871_v48 = vpop.eup %14870 }
 0xf79   : > { %v8071_v49 = vsel %vm5072_vm3, %v14871_v48, 0.0  ;;  %v8624_v29 = vsub.f32 %v8550_v22, %v8623_v25  ;;  %v8637_v35 = vsub.f32 %v8635_v28, %v8636_v31 }
 0xf7a   : > { %8072 = vadd.xlane.f32.xlu0 %v8071_v49 }
 0xf7b   : > { %v8625_v32 = vand.u32 4294901760, %v8624_v29  ;;  %v8638_v39 = vand.u32 4294901760, %v8637_v35 }
 0xf7d   : > { %v8626_v36 = vsub.f32 %v8624_v29, %v8625_v32 }
 0xf7f   : > { %v8627_v40 = vand.u32 4294901760, %v8626_v36 }
 0xf90   : > { %8076 = vrot.lane.b32.xlu0 %v16612_v9, %s15555_s22  ;;  %s12081_s22 = sshll.u32 %s883_s21, 4  ;;  %s17022_s22 = int_to_ptr.vmem [resolvable:$true] %s12081_s22 }
 0xf91   : > { %p15430_p6 = scmp.lt.s32.totalorder %s17022_s22, %s15428_s9 }
 0xf94   : > { %8548 = vrot.lane.b32.xlu0 %v16610_v7, %s15557_s30 }
0x1007   : > { %v8073_v50 = vpop.xlane.xlu0 %8072 }
0x1008   : > { %14872 = vrcp.f32 %v8073_v50 }
0x100b   : > { %v8077_v53 = vpop.permute.xlu0 %8076 }
0x100c   : > { %v8086_v56 = vand.u32 4294901760, %v8077_v53 }
0x100e   : > { %v14170_v57 = vpack.c.bf16 %v8089_v55, %v8086_v56  ;;  %v8164_v58 = vsub.f32 %v8077_v53, %v8086_v56 }
0x100f   : > { %v8549_v18 = vpop.permute.xlu0 %8548 }
0x1010   : > { %14171 = vmatpush3.bf16.msra.mxu0 %v14170_v57  ;;  %v8165_v63 = vand.u32 4294901760, %v8164_v58  ;;  %v14176_v16 = vpack.c.bf16 %v8171_v59, %v8164_v58  ;;  %v8554_v46 = vsel %vm1390_vm2, %v8549_v18, 0 }
0x1011   : > { %14172 = vmatprep.subr.bf16.mxu0 %v15552_v0  ;;  %v8560_v23 = vand.u32 4294901760, %v8554_v46 }
0x1012   : > { %v14873_v61 = vpop.eup %14872  ;;  %v8166_v5 = vsub.f32 %v8164_v58, %v8165_v63  ;;  %v14182_v19 = vpack.c.bf16 %v8172_v2, %v8165_v63 }
0x1013   : > { %v8075_v62 = vmul.f32 %v14873_v61, %v14871_v48  ;;  %v8642_v26 = vsub.f32 %v8554_v46, %v8560_v23  ;;  %v14188_v33 = vpack.c.bf16 %v8560_v23, %v8557_v24 }
0x1014   : > { %v8167_v11 = vand.u32 4294901760, %v8166_v5 }
0x1015   : > { %v8083_v3 = vsel %vm5072_vm3, %v8075_v62, 0  ;;  %v8643_v30 = vand.u32 4294901760, %v8642_v26  ;;  %v14194_v42 = vpack.c.bf16 %v8642_v26, %v8635_v28 }
0x1016   : > { %v8152_v4 = vand.u32 4294901760, %v8083_v3  ;;  %v14173_v15 = vpack.c.bf16 %v8174_v13, %v8167_v11 }
0x1017   : > { %v8644_v34 = vsub.f32 %v8642_v26, %v8643_v30  ;;  %v14200_v43 = vpack.c.bf16 %v8643_v30, %v8636_v31 }
0x1018   : > { %v8153_v6 = vsub.f32 %v8083_v3, %v8152_v4 }
0x1019   : > { %v8645_v37 = vand.u32 4294901760, %v8644_v34 }
0x101a   : > { %v8154_v10 = vand.u32 4294901760, %v8153_v6 }
0x101b   : > { %v14191_v41 = vpack.c.bf16 %v8645_v37, %v8638_v39 }
0x101c   : > { %v8155_v12 = vsub.f32 %v8153_v6, %v8154_v10 }
0x101e   : > { %v8156_v14 = vand.u32 4294901760, %v8155_v12 }
0x1020   : > { %13508 = vmatmul.mubr.f32.vlgmr.msra.gmra.mrb[18].mxu0 %v8156_v14 }
0x1021   : > { %14174 = vmatpush3.bf16.msra.mxu0 %v14173_v15  ;;  %13514 = vmatprep.mubr.msk.f32.mxu0 %vm15553_vm0, %v15554_v1 }
0x1022   : > { %14175 = vmatprep.subr.bf16.mxu0 %v15552_v0 }
0x1028   : > { %13515 = vmatmul.mubr.f32.vlgmr.msra.gmra.mrb[18].mxu0 %v8152_v4 }
0x1029   : > { %14177 = vmatpush3.bf16.msra.mxu0 %v14176_v16  ;;  %13521 = vmatprep.mubr.msk.f32.mxu0 %vm15553_vm0, %v15554_v1 }
0x102a   : > { %14178 = vmatprep.subr.bf16.mxu0 %v15552_v0 }
0x1030   : > { %13522 = vmatmul.mubr.f32.vlgmr.msra.gmra.mrb[18].mxu0 %v8153_v6 }
0x1031   : > { %14180 = vmatpush3.bf16.msra.mxu0 %v14170_v57  ;;  %13528 = vmatprep.mubr.msk.f32.mxu0 %vm15553_vm0, %v15554_v1 }
0x1032   : > { %14181 = vmatprep.subr.bf16.mxu0 %v15552_v0 }
0x1038   : > { %13529 = vmatmul.mubr.f32.vlgmr.msra.gmra.mrb[18].mxu0 %v8154_v10 }
0x1039   : > { %14183 = vmatpush3.bf16.msra.mxu0 %v14182_v19  ;;  %13535 = vmatprep.mubr.msk.f32.mxu0 %vm15553_vm0, %v15554_v1 }
0x103a   : > { %14184 = vmatprep.subr.bf16.mxu0 %v15552_v0 }
0x1040   : > { %13536 = vmatmul.mubr.f32.vlgmr.msra.gmra.mrb[18].mxu0 %v8152_v4 }
0x1041   : > { %14186 = vmatpush3.bf16.msra.mxu0 %v14170_v57  ;;  %13542 = vmatprep.mubr.msk.f32.mxu0 %vm15553_vm0, %v15554_v1 }
0x1042   : > { %14187 = vmatprep.subr.bf16.mxu0 %v15552_v0 }
0x1048   : > { %13543 = vmatmul.mubr.f32.vlgmr.msra.gmra.mrb[18].mxu0 %v8152_v4 }
0x1049   : > { %13549 = vmatprep.mubr.msk.f32.mxu0 %vm15553_vm0, %v15554_v1 }
0x104a   : > { %14189 = vmatpush3.bf16.xpose.msra.mxu0 %v14188_v33 }
0x104b   : > { %14190 = vmatprep.subr.bf16.mxu0 %v15552_v0 }
0x1051   : > { %13550 = vmatmul.mubr.f32.vlgmr.msra.gmra.mrb[20].mxu0 %v8627_v40 }
0x1052   : > { %14192 = vmatpush3.bf16.xpose.msra.mxu0 %v14191_v41  ;;  %13556 = vmatprep.mubr.msk.f32.mxu0 %vm15553_vm0, %v15554_v1 }
0x1053   : > { %14193 = vmatprep.subr.bf16.mxu0 %v15552_v0 }
0x1059   : > { %13557 = vmatmul.mubr.f32.vlgmr.msra.gmra.mrb[20].mxu0 %v8623_v25 }
0x105a   : > { %14195 = vmatpush3.bf16.xpose.msra.mxu0 %v14194_v42  ;;  %13563 = vmatprep.mubr.msk.f32.mxu0 %vm15553_vm0, %v15554_v1 }
0x105b   : > { %14196 = vmatprep.subr.bf16.mxu0 %v15552_v0 }
0x1061   : > { %13564 = vmatmul.mubr.f32.vlgmr.msra.gmra.mrb[20].mxu0 %v8624_v29 }
0x1062   : > { %14198 = vmatpush3.bf16.xpose.msra.mxu0 %v14188_v33  ;;  %13570 = vmatprep.mubr.msk.f32.mxu0 %vm15553_vm0, %v15554_v1 }
0x1063   : > { %14199 = vmatprep.subr.bf16.mxu0 %v15552_v0 }
0x1069   : > { %13571 = vmatmul.mubr.f32.vlgmr.msra.gmra.mrb[20].mxu0 %v8625_v32 }
0x106a   : > { %14201 = vmatpush3.bf16.xpose.msra.mxu0 %v14200_v43  ;;  %13577 = vmatprep.mubr.msk.f32.mxu0 %vm15553_vm0, %v15554_v1 }
0x106b   : > { %14202 = vmatprep.subr.bf16.mxu0 %v15552_v0 }
0x1071   : > { %13578 = vmatmul.mubr.f32.vlgmr.msra.gmra.mrb[20].mxu0 %v8623_v25 }
0x1072   : > { %14204 = vmatpush3.bf16.xpose.msra.mxu0 %v14188_v33  ;;  %13584 = vmatprep.mubr.msk.f32.mxu0 %vm15553_vm0, %v15554_v1 }
0x1073   : > { %14241 = vmatprep.subr.bf16.mxu0 %v15552_v0 }
0x1079   : > { %13585 = vmatmul.mubr.f32.vlgmr.msra.gmra.mrb[20].mxu0 %v8623_v25 }
0x107a   : > { %13675 = vmatprep.mubr.msk.f32.mxu0 %vm15553_vm0, %v15554_v1 }
0x111b   : > { %v16746_v44 = vpop.f32.mrb[18].mxu0 }
0x111c   : > { %v13544_v45 = vpop.f32.mrb[19].mxu0 }
0x114c   : > { %v9011_v47 = vpop.f32.mrb[20].mxu0 }
0x114d   : > { %v9015_v48 = vmul.f32 0.35355338, %v9011_v47  ;;  %v13586_v49 = vpop.f32.mrb[21].mxu0 }
0x114f   : > { %v9016_v50 = vsel %vm5072_vm3, %v9015_v48, -inf }
0x1150   : > { %9017 = vmax.xlane.f32.xlu0 %v9016_v50 }
0x1166   : > { %9027 = vrot.lane.b32.xlu0 %v16612_v9, %s15560_s23 }
0x116a   : > { %9497 = vrot.lane.b32.xlu0 %v16612_v9, %s15559_s11 }
0x116e   : > { %9495 = vrot.lane.b32.xlu0 %v16625_v27, %s15559_s11 }
0x11dd   : > { %v9018_v51 = vpop.xlane.xlu0 %9017 }
0x11de   : > { %v9019_v53 = vsub.f32 %v9015_v48, %v9018_v51 }
0x11e0   : > { %v9020_v55 = vmul.f32 1.442695, %v9019_v53 }
0x11e1   : > { %v9028_v59 = vpop.permute.xlu0 %9027 }
0x11e2   : > { %14874 = vpow2.f32 %v9020_v55  ;;  %v9037_v62 = vand.u32 4294901760, %v9028_v59 }
0x11e4   : > { %v9115_v3 = vsub.f32 %v9028_v59, %v9037_v62 }
0x11e5   : > { %v9498_v21 = vpop.permute.xlu0 %9497 }
0x11e6   : > { %v9116_v8 = vand.u32 4294901760, %v9115_v3  ;;  %v9503_v26 = vsel %vm1390_vm2, %v9498_v21, 0 }
0x11e7   : > { %v9508_v30 = vand.u32 4294901760, %v9503_v26 }
0x11e8   : > { %v9117_v14 = vsub.f32 %v9115_v3, %v9116_v8 }
0x11e9   : > { %v9496_v24 = vpop.permute.xlu0 %9495  ;;  %v9586_v33 = vsub.f32 %v9503_v26, %v9508_v30  ;;  %v10462_v26 = vld [vmem:[#allocation19 + $0x8] sm:$0xff] }
0x11ea   : > { %v9118_v18 = vand.u32 4294901760, %v9117_v14  ;;  %v9501_v28 = vsel %vm1390_vm2, %v9496_v24, 0 }
0x11eb   : > { %v9574_v31 = vand.u32 4294901760, %v9501_v28  ;;  %v9587_v36 = vand.u32 4294901760, %v9586_v33 }
0x11ec   : > { %v14875_v56 = vpop.eup %14874 }
0x11ed   : > { %v9022_v57 = vsel %vm5072_vm3, %v14875_v56, 0.0  ;;  %v9575_v34 = vsub.f32 %v9501_v28, %v9574_v31  ;;  %v9588_v41 = vsub.f32 %v9586_v33, %v9587_v36 }
0x11ee   : > { %9023 = vadd.xlane.f32.xlu1 %v9022_v57 }
0x11ef   : > { %v9576_v37 = vand.u32 4294901760, %v9575_v34  ;;  %v9589_v45 = vand.u32 4294901760, %v9588_v41  ;;  %v10464_v41 = vld [vmem:[#allocation19 + $0x18] sm:$0xff] }
0x11f1   : > { %v9577_v42 = vsub.f32 %v9575_v34, %v9576_v37 }
0x11f3   : > { %v9578_v47 = vand.u32 4294901760, %v9577_v42 }
0x11ff   : > { %9029 = vrot.lane.b32.xlu1 %v16610_v7, %s15560_s23  ;;  %s12068_s23 = scalar_lea.sflag [#allocation4], %s16182_s6 }
0x1203   : > { %9499 = vrot.lane.b32.xlu1 %v16610_v7, %s15559_s11  ;;  %s17020_s11 = scalar_lea.hbm %s17184_s25, %s12389_s5 }
0x127b   : > { %v9024_v58 = vpop.xlane.xlu1 %9023 }
0x127c   : > { %14876 = vrcp.f32 %v9024_v58 }
0x127f   : > { %v9030_v61 = vpop.permute.xlu1 %9029 }
0x1280   : > { %v9040_v27 = vand.u32 4294901760, %v9030_v61 }
0x1282   : > { %v14206_v63 = vpack.c.bf16 %v9040_v27, %v9037_v62  ;;  %v9122_v2 = vsub.f32 %v9030_v61, %v9040_v27 }
0x1283   : > { %v9500_v22 = vpop.permute.xlu1 %9499 }
0x1284   : > { %14207 = vmatpush3.bf16.msra.mxu1 %v14206_v63  ;;  %v9123_v6 = vand.u32 4294901760, %v9122_v2  ;;  %v14212_v46 = vpack.c.bf16 %v9122_v2, %v9115_v3  ;;  %v9505_v25 = vsel %vm1390_vm2, %v9500_v22, 0 }
0x1285   : > { %14208 = vmatprep.subr.bf16.mxu1 %v15552_v0  ;;  %v9511_v29 = vand.u32 4294901760, %v9505_v25 }
0x1286   : > { %v14877_v4 = vpop.eup %14876  ;;  %v9124_v12 = vsub.f32 %v9122_v2, %v9123_v6  ;;  %v14218_v23 = vpack.c.bf16 %v9123_v6, %v9116_v8 }
0x1287   : > { %v9026_v5 = vmul.f32 %v14877_v4, %v14875_v56  ;;  %v9593_v32 = vsub.f32 %v9505_v25, %v9511_v29  ;;  %v14224_v39 = vpack.c.bf16 %v9511_v29, %v9508_v30  ;;  %v10461_v25 = vld [vmem:[#allocation19] sm:$0xff]  ;;  %v10479_v29 = vand.u32 4294901760, %v10462_v26 }
0x1288   : > { %v9125_v16 = vand.u32 4294901760, %v9124_v12  ;;  %v10476_v28 = vand.u32 4294901760, %v10461_v25 }
0x1289   : > { %v9034_v10 = vsel %vm5072_vm3, %v9026_v5, 0  ;;  %v9594_v35 = vand.u32 4294901760, %v9593_v32  ;;  %v14230_v49 = vpack.c.bf16 %v9593_v32, %v9586_v33 }
0x128a   : > { %v9103_v11 = vand.u32 4294901760, %v9034_v10  ;;  %v14209_v20 = vpack.c.bf16 %v9125_v16, %v9118_v18  ;;  %v16828_v30 = vsub.f32 %v10461_v25, %v10476_v28 }
0x128b   : > { %v9595_v40 = vsub.f32 %v9593_v32, %v9594_v35  ;;  %v14236_v50 = vpack.c.bf16 %v9594_v35, %v9587_v36 }
0x128c   : > { %v9104_v13 = vsub.f32 %v9034_v10, %v9103_v11  ;;  %v10557_v32 = vand.u32 4294901760, %v16828_v30 }
0x128d   : > { %v9596_v43 = vand.u32 4294901760, %v9595_v40  ;;  %v10463_v40 = vld [vmem:[#allocation19 + $0x10] sm:$0xff] }
0x128e   : > { %v9105_v15 = vand.u32 4294901760, %v9104_v13  ;;  %v10482_v42 = vand.u32 4294901760, %v10463_v40 }
0x128f   : > { %v14227_v48 = vpack.c.bf16 %v9596_v43, %v9589_v45  ;;  %v10485_v43 = vand.u32 4294901760, %v10464_v41 }
0x1290   : > { %v9106_v17 = vsub.f32 %v9104_v13, %v9105_v15  ;;  %v10570_v45 = vsub.f32 %v10463_v40, %v10482_v42  ;;  %v10985_v40 = vld [vmem:[#allocation26] sm:$0xff] }
0x1292   : > { %v9107_v19 = vand.u32 4294901760, %v9106_v17 }
0x1294   : > { %13592 = vmatmul.mubr.f32.vlgmr.msra.gmra.mrb[24].mxu1 %v9107_v19 }
0x1295   : > { %14210 = vmatpush3.bf16.msra.mxu1 %v14209_v20  ;;  %13598 = vmatprep.mubr.msk.f32.mxu1 %vm15553_vm0, %v15554_v1 }
0x1296   : > { %14211 = vmatprep.subr.bf16.mxu1 %v15552_v0 }
0x129c   : > { %13599 = vmatmul.mubr.f32.vlgmr.msra.gmra.mrb[24].mxu1 %v9103_v11 }
0x129d   : > { %14213 = vmatpush3.bf16.msra.mxu1 %v14212_v46  ;;  %13605 = vmatprep.mubr.msk.f32.mxu1 %vm15553_vm0, %v15554_v1 }
0x129e   : > { %14214 = vmatprep.subr.bf16.mxu1 %v15552_v0 }
0x12a4   : > { %13606 = vmatmul.mubr.f32.vlgmr.msra.gmra.mrb[24].mxu1 %v9104_v13 }
0x12a5   : > { %14216 = vmatpush3.bf16.msra.mxu1 %v14206_v63  ;;  %13612 = vmatprep.mubr.msk.f32.mxu1 %vm15553_vm0, %v15554_v1 }
0x12a6   : > { %14217 = vmatprep.subr.bf16.mxu1 %v15552_v0 }
0x12ac   : > { %13613 = vmatmul.mubr.f32.vlgmr.msra.gmra.mrb[24].mxu1 %v9105_v15 }
0x12ad   : > { %14219 = vmatpush3.bf16.msra.mxu1 %v14218_v23  ;;  %13619 = vmatprep.mubr.msk.f32.mxu1 %vm15553_vm0, %v15554_v1 }
0x12ae   : > { %14220 = vmatprep.subr.bf16.mxu1 %v15552_v0 }
0x12b4   : > { %13620 = vmatmul.mubr.f32.vlgmr.msra.gmra.mrb[24].mxu1 %v9103_v11 }
0x12b5   : > { %14222 = vmatpush3.bf16.msra.mxu1 %v14206_v63  ;;  %13626 = vmatprep.mubr.msk.f32.mxu1 %vm15553_vm0, %v15554_v1 }
0x12b6   : > { %14223 = vmatprep.subr.bf16.mxu1 %v15552_v0 }
0x12bc   : > { %13627 = vmatmul.mubr.f32.vlgmr.msra.gmra.mrb[24].mxu1 %v9103_v11 }
0x12bd   : > { %13633 = vmatprep.mubr.msk.f32.mxu1 %vm15553_vm0, %v15554_v1 }
0x12be   : > { %14225 = vmatpush3.bf16.xpose.msra.mxu1 %v14224_v39 }
0x12bf   : > { %14226 = vmatprep.subr.bf16.mxu1 %v15552_v0 }
0x12c5   : > { %13634 = vmatmul.mubr.f32.vlgmr.msra.gmra.mrb[26].mxu1 %v9578_v47  ;;  %v10577_v47 = vsub.f32 %v10464_v41, %v10485_v43  ;;  %v10986_v41 = vld [vmem:[#allocation26 + $0x8] sm:$0xff] }
0x12c6   : > { %14228 = vmatpush3.bf16.xpose.msra.mxu1 %v14227_v48  ;;  %13640 = vmatprep.mubr.msk.f32.mxu1 %vm15553_vm0, %v15554_v1  ;;  %v10571_v48 = vand.u32 4294901760, %v10570_v45 }
0x12c7   : > { %14229 = vmatprep.subr.bf16.mxu1 %v15552_v0 }
0x12cd   : > { %13641 = vmatmul.mubr.f32.vlgmr.msra.gmra.mrb[26].mxu1 %v9574_v31 }
0x12ce   : > { %14231 = vmatpush3.bf16.xpose.msra.mxu1 %v14230_v49  ;;  %13647 = vmatprep.mubr.msk.f32.mxu1 %vm15553_vm0, %v15554_v1  ;;  %v10578_v49 = vand.u32 4294901760, %v10577_v47 }
0x12cf   : > { %14232 = vmatprep.subr.bf16.mxu1 %v15552_v0 }
0x12d5   : > { %13648 = vmatmul.mubr.f32.vlgmr.msra.gmra.mrb[26].mxu1 %v9575_v34  ;;  %v10558_v34 = vsub.f32 %v16828_v30, %v10557_v32 }
0x12d6   : > { %14234 = vmatpush3.bf16.xpose.msra.mxu1 %v14224_v39  ;;  %13654 = vmatprep.mubr.msk.f32.mxu1 %vm15553_vm0, %v15554_v1 }
0x12d7   : > { %14235 = vmatprep.subr.bf16.mxu1 %v15552_v0  ;;  %v10559_v36 = vand.u32 4294901760, %v10558_v34 }
0x12dd   : > { %13655 = vmatmul.mubr.f32.vlgmr.msra.gmra.mrb[26].mxu1 %v9576_v37 }
0x12de   : > { %14237 = vmatpush3.bf16.xpose.msra.mxu1 %v14236_v50  ;;  %13661 = vmatprep.mubr.msk.f32.mxu1 %vm15553_vm0, %v15554_v1  ;;  %v10572_v50 = vsub.f32 %v10570_v45, %v10571_v48 }
0x12df   : > { %14238 = vmatprep.subr.bf16.mxu1 %v15552_v0 }
0x12e5   : > { %13662 = vmatmul.mubr.f32.vlgmr.msra.gmra.mrb[26].mxu1 %v9574_v31 }
0x12e6   : > { %14240 = vmatpush3.bf16.xpose.msra.mxu1 %v14224_v39  ;;  %13668 = vmatprep.mubr.msk.f32.mxu1 %vm15553_vm0, %v15554_v1 }
0x12e7   : > { %14265 = vmatprep.subr.bf16.mxu1 %v15552_v0 }
0x12ed   : > { %13669 = vmatmul.mubr.f32.vlgmr.msra.gmra.mrb[26].mxu1 %v9574_v31  ;;  %v16830_v31 = vsub.f32 %v10462_v26, %v10479_v29 }
0x12ee   : > { %13732 = vmatprep.mubr.msk.f32.mxu1 %vm15553_vm0, %v15554_v1 }
0x12ef   : > { %v10564_v33 = vand.u32 4294901760, %v16830_v31 }
0x12f1   : > { %v10565_v35 = vsub.f32 %v16830_v31, %v10564_v33 }
0x12f3   : > { %v10566_v37 = vand.u32 4294901760, %v10565_v35 }
0x12f5   : > { %v14266_v39 = vpack.c.bf16 %v10566_v37, %v10559_v36 }
0x12f7   : > { %14267 = vmatpush3.bf16.msra.mxu1 %v14266_v39 }
0x12f8   : > { %14268 = vmatprep.subr.bf16.mxu1 %v15552_v0 }
0x138f   : > { %v9491_v51 = vpop.f32.mrb[24].mxu1 }
0x1390   : > { %v13628_v53 = vpop.f32.mrb[25].mxu1 }
0x1391   : > { %v10573_v53 = vand.u32 4294901760, %v10572_v50 }
0x13c0   : > { %v9962_v55 = vpop.f32.mrb[26].mxu1 }
0x13c1   : > { %v9966_v56 = vmul.f32 0.35355338, %v9962_v55  ;;  %v13670_v57 = vpop.f32.mrb[27].mxu1 }
0x13c2   : > { %v14260_v57 = vpack.c.bf16 %v10479_v29, %v10476_v28 }
0x13c3   : > { %v9967_v58 = vsel %vm5072_vm3, %v9966_v56, -inf }
0x13c4   : > { %9968 = vmax.xlane.f32.xlu1 %v9967_v58  ;;  %v14263_v58 = vpack.c.bf16 %v10485_v43, %v10482_v42  ;;  %v10987_v42 = vld [vmem:[#allocation26 + $0x10] sm:$0xff]  ;;  %v11000_v43 = vand.u32 4294901760, %v10985_v40 }
0x13d5   : > { %9980 = vrot.lane.b32.xlu1 %v16610_v7, %s15561_s20 }
0x13d9   : > { %10447 = vrot.lane.b32.xlu1 %v16746_v44, %s15566_s0 }
0x1451   : > { %v9969_v59 = vpop.xlane.xlu1 %9968 }
0x1452   : > { %v9970_v61 = vsub.f32 %v9966_v56, %v9969_v59 }
0x1454   : > { %v9971_v62 = vmul.f32 1.442695, %v9970_v61 }
0x1455   : > { %v9981_v3 = vpop.permute.xlu1 %9980 }
0x1456   : > { %14878 = vpow2.f32 %v9971_v62  ;;  %v9991_v4 = vand.u32 4294901760, %v9981_v3  ;;  %v14275_v62 = vpack.c.bf16 %v10577_v47, %v10570_v45  ;;  %v11003_v45 = vand.u32 4294901760, %v10986_v41 }
0x1458   : > { %v10073_v8 = vsub.f32 %v9981_v3, %v9991_v4  ;;  %v16879_v50 = vpack.c.bf16 %v11003_v45, %v11000_v43 }
0x145a   : > { %v10074_v13 = vand.u32 4294901760, %v10073_v8 }
0x145c   : > { %v10075_v17 = vsub.f32 %v10073_v8, %v10074_v13 }
0x145e   : > { %v10076_v46 = vand.u32 4294901760, %v10075_v17 }
0x1460   : > { %v14879_v27 = vpop.eup %14878 }
0x1461   : > { %v9973_v63 = vsel %vm5072_vm3, %v14879_v27, 0.0 }
0x1462   : > { %9974 = vadd.xlane.f32.xlu0 %v9973_v63  ;;  %v10448_v63 = vpop.permute.xlu1 %10447 }
0x1463   : > { %v10458_v3 = vsel %vm1390_vm2, %v16692_v38, %v10448_v63  ;;  %v14272_v38 = vpack.c.bf16 %v16830_v31, %v16828_v30 }
0x1478   : > { %9978 = vrot.lane.b32.xlu0 %v16612_v9, %s15561_s20  ;;  %s15423_s20 = scalar_lea.vmem %s17022_s22, 128 }
0x1479   : > { %p15424_p1 = scmp.ne.s32.totalorder %s17022_s22, %s15423_s20  ;;  %p15431_p10 = scmp.lt.s32.totalorder %s15429_s10, %s15423_s20 }
0x147b   : > { %p15425_p7 = pnand %p15424_p1, %p17185_p3  ;;  %p15432_p5 = por %p15431_p10, %p15430_p6 }
0x147c   : > { %10451 = vrot.lane.b32.xlu0 %v9491_v51, %s15567_s4  ;;  %v10579_v51 = vsub.f32 %v10577_v47, %v10578_v49  ;;  %v10988_v47 = vld [vmem:[#allocation26 + $0x18] sm:$0xff] }
0x147d   : > { %p15426_p2 = pneg %p15425_p7 }
0x147e   : > { %v10580_v55 = vand.u32 4294901760, %v10579_v51  ;;  %v11087_v51 = vsub.f32 %v10986_v41, %v11003_v45  ;;  %v11490_v41 = vld [vmem:[#allocation29 + $0x28] sm:$0xff] }
0x147f   : > { %p15433_p9 = pnand %p15432_p5, %p15426_p2 }
0x1480   : > { %v14269_v56 = vpack.c.bf16 %v10580_v55, %v10573_v53 }
0x1482   : > { %14270 = vmatpush3.bf16.msra.mxu1 %v14269_v56 }
0x1483   : > { %14277 = vmatprep.subr.bf16.mxu1 %v15552_v0 }
0x14ef   : > { %v9975_v2 = vpop.xlane.xlu0 %9974 }
0x14f0   : > { %14880 = vrcp.f32 %v9975_v2 }
0x14f3   : > { %v9979_v7 = vpop.permute.xlu0 %9978 }
0x14f4   : > { %v9988_v5 = vand.u32 4294901760, %v9979_v7 }
0x14f6   : > { %v14242_v44 = vpack.c.bf16 %v9991_v4, %v9988_v5  ;;  %v10066_v6 = vsub.f32 %v9979_v7, %v9988_v5 }
0x14f7   : > { %v10452_v2 = vpop.permute.xlu0 %10451 }
0x14f8   : > { %14243 = vmatpush3.bf16.msra.mxu0 %v14242_v44  ;;  %v10067_v12 = vand.u32 4294901760, %v10066_v6  ;;  %v14248_v23 = vpack.c.bf16 %v10073_v8, %v10066_v6  ;;  %v10459_v7 = vsel %vm5072_vm3, %v10458_v3, %v10452_v2 }
0x14f9   : > { %14244 = vmatprep.subr.bf16.mxu0 %v15552_v0 }
0x14fa   : > { %v14881_v10 = vpop.eup %14880  ;;  %v10068_v15 = vsub.f32 %v10066_v6, %v10067_v12  ;;  %v14254_v24 = vpack.c.bf16 %v10074_v13, %v10067_v12  ;;  %v14284_v13 = vpack.c.bf16 %v10564_v33, %v10557_v32 }
0x14fb   : > { %v9977_v11 = vmul.f32 %v14881_v10, %v14879_v27  ;;  %v14287_v27 = vpack.c.bf16 %v10578_v49, %v10571_v48  ;;  %v11006_v48 = vand.u32 4294901760, %v10987_v42  ;;  %v11009_v49 = vand.u32 4294901760, %v10988_v47 }
0x14fc   : > { %v10069_v19 = vand.u32 4294901760, %v10068_v15  ;;  %v12385_v15 = vld [vmem:[#allocation20] ss:$0 sm:$0xff] }
0x14fd   : > { %v9985_v9 = vsel %vm5072_vm3, %v9977_v11, 0  ;;  %v11094_v53 = vsub.f32 %v10987_v42, %v11006_v48  ;;  %v11101_v55 = vsub.f32 %v10988_v47, %v11009_v49  ;;  %v16882_v56 = vpack.c.bf16 %v11009_v49, %v11006_v48  ;;  %v11491_v47 = vld [vmem:[#allocation29 + $0x30] sm:$0xff]  ;;  %v11492_v48 = vld [vmem:[#allocation29 + $0x38] sm:$0xff] }
0x14fe   : > { %v10054_v14 = vand.u32 4294901760, %v9985_v9  ;;  %v14245_v22 = vpack.c.bf16 %v10076_v46, %v10069_v19  ;;  %v11523_v49 = vand.u32 4294901760, %v11491_v47 }
0x14ff   : > { %v11095_v63 = vand.u32 4294901760, %v11094_v53  ;;  %v11102_v2 = vand.u32 4294901760, %v11101_v55 }
0x1500   : > { %v10055_v16 = vsub.f32 %v9985_v9, %v10054_v14 }
0x1502   : > { %v10056_v18 = vand.u32 4294901760, %v10055_v16 }
0x1504   : > { %v10057_v20 = vsub.f32 %v10055_v16, %v10056_v18 }
0x1506   : > { %v10058_v21 = vand.u32 4294901760, %v10057_v20 }
0x1508   : > { %13676 = vmatmul.mubr.f32.vlgmr.msra.gmra.mrb[22].mxu0 %v10058_v21 }
0x1509   : > { %14246 = vmatpush3.bf16.msra.mxu0 %v14245_v22  ;;  %13682 = vmatprep.mubr.msk.f32.mxu0 %vm15553_vm0, %v15554_v1 }
0x150a   : > { %14247 = vmatprep.subr.bf16.mxu0 %v15552_v0 }
0x1510   : > { %13683 = vmatmul.mubr.f32.vlgmr.msra.gmra.mrb[22].mxu0 %v10054_v14 }
0x1511   : > { %14249 = vmatpush3.bf16.msra.mxu0 %v14248_v23  ;;  %13689 = vmatprep.mubr.msk.f32.mxu0 %vm15553_vm0, %v15554_v1 }
0x1512   : > { %14250 = vmatprep.subr.bf16.mxu0 %v15552_v0 }
0x1518   : > { %13690 = vmatmul.mubr.f32.vlgmr.msra.gmra.mrb[22].mxu0 %v10055_v16 }
0x1519   : > { %14252 = vmatpush3.bf16.msra.mxu0 %v14242_v44  ;;  %13696 = vmatprep.mubr.msk.f32.mxu0 %vm15553_vm0, %v15554_v1 }
0x151a   : > { %14253 = vmatprep.subr.bf16.mxu0 %v15552_v0 }
0x1520   : > { %13697 = vmatmul.mubr.f32.vlgmr.msra.gmra.mrb[22].mxu0 %v10056_v18 }
0x1521   : > { %14255 = vmatpush3.bf16.msra.mxu0 %v14254_v24  ;;  %13703 = vmatprep.mubr.msk.f32.mxu0 %vm15553_vm0, %v15554_v1 }
0x1522   : > { %14256 = vmatprep.subr.bf16.mxu0 %v15552_v0 }
0x1528   : > { %13704 = vmatmul.mubr.f32.vlgmr.msra.gmra.mrb[22].mxu0 %v10054_v14 }
0x1529   : > { %14258 = vmatpush3.bf16.msra.mxu0 %v14242_v44  ;;  %13710 = vmatprep.mubr.msk.f32.mxu0 %vm15553_vm0, %v15554_v1 }
0x152a   : > { %14259 = vmatprep.subr.bf16.mxu0 %v15552_v0 }
0x1530   : > { %13711 = vmatmul.mubr.f32.vlgmr.msra.gmra.mrb[22].mxu0 %v10054_v14 }
0x1531   : > { %13721 = vmatprep.mubr.msk.f32.mxu0 %vm15553_vm0, %v15554_v1  ;;  %14261 = vmatpush3.bf16.msra.mxu0 %v14260_v57 }
0x1532   : > { %14262 = vmatprep.subr.bf16.mxu0 %v15552_v0 }
0x1535   : > { %14264 = vmatpush3.bf16.msra.mxu0 %v14263_v58 }
0x1536   : > { %14271 = vmatprep.subr.bf16.mxu0 %v15552_v0 }
0x1603   : > { %v10442_v59 = vpop.f32.mrb[22].mxu0 }
0x1604   : > { %10455 = vrot.lane.b32.xlu1 %v10442_v59, %s15568_s1  ;;  %v13712_v61 = vpop.f32.mrb[23].mxu0 }
0x1676   : > { %v10456_v4 = vpop.permute.xlu1 %10455 }
0x1677   : > { %v10460_v5 = vsel %vm5074_vm4, %v10459_v7, %v10456_v4  ;;  %v11096_v7 = vsub.f32 %v11094_v53, %v11095_v63  ;;  %v11103_v4 = vsub.f32 %v11101_v55, %v11102_v2 }
0x1678   : > { %v10473_v44 = vsel %vm898_vm1, %v10460_v5, 0 }
0x1679   : > { %v10544_v6 = vand.u32 4294901760, %v10473_v44  ;;  %v11097_v5 = vand.u32 4294901760, %v11096_v7 }
0x167b   : > { %v10545_v8 = vsub.f32 %v10473_v44, %v10544_v6  ;;  %13733 = vmatmul.mubr.f32.vlgmr.msra.gmra.mrb[28].mxu1 %v10544_v6  ;;  %v11104_v44 = vand.u32 4294901760, %v11103_v4 }
0x167c   : > { %14279 = vmatpush3.bf16.msra.mxu1 %v14260_v57  ;;  %13754 = vmatprep.mubr.msk.f32.mxu1 %vm15553_vm0, %v15554_v1 }
0x167d   : > { %14280 = vmatprep.subr.bf16.mxu1 %v15552_v0  ;;  %v10546_v10 = vand.u32 4294901760, %v10545_v8 }
0x167f   : > { %v10547_v11 = vsub.f32 %v10545_v8, %v10546_v10 }
0x1680   : > { %14282 = vmatpush3.bf16.msra.mxu1 %v14263_v58 }
0x1681   : > { %14289 = vmatprep.subr.bf16.mxu1 %v15552_v0  ;;  %v10548_v12 = vand.u32 4294901760, %v10547_v11 }
0x1683   : > { %13755 = vmatmul.mubr.f32.vlgmr.msra.gmra.mrb[30].mxu1 %v10546_v10  ;;  %13722 = vmatmul.mubr.f32.vlgmr.msra.gmra.mrb[24].mxu0 %v10548_v12  ;;  %v14311_v10 = vpack.c.bf16 %v11101_v55, %v11094_v53  ;;  %v11485_v12 = vld [vmem:[#allocation29] sm:$0xff] }
0x1684   : > { %14273 = vmatpush3.bf16.msra.mxu0 %v14272_v38  ;;  %14291 = vmatpush3.bf16.msra.mxu1 %v14260_v57  ;;  %v14323_v38 = vpack.c.bf16 %v11102_v2, %v11095_v63 }
0x1685   : > { %14274 = vmatprep.subr.bf16.mxu0 %v15552_v0  ;;  %14292 = vmatprep.subr.bf16.mxu1 %v15552_v0 }
0x1686   : > { %13743 = vmatprep.mubr.msk.f32.mxu0 %vm15553_vm0, %v15554_v1  ;;  %13776 = vmatprep.mubr.msk.f32.mxu1 %vm15553_vm0, %v15554_v1 }
0x1688   : > { %14276 = vmatpush3.bf16.msra.mxu0 %v14275_v62  ;;  %14294 = vmatpush3.bf16.msra.mxu1 %v14263_v58  ;;  %v11088_v58 = vand.u32 4294901760, %v11087_v51 }
0x1689   : > { %14283 = vmatprep.subr.bf16.mxu0 %v15552_v0  ;;  %14331 = vmatprep.subr.bf16.mxu1 %v15552_v0 }
0x168a   : > { %v11089_v61 = vsub.f32 %v11087_v51, %v11088_v58 }
0x168b   : > { %13744 = vmatmul.mubr.f32.vlgmr.msra.gmra.mrb[26].mxu0 %v10545_v8  ;;  %13777 = vmatmul.mubr.f32.vlgmr.msra.gmra.mrb[32].mxu1 %v10544_v6 }
0x168c   : > { %14285 = vmatpush3.bf16.msra.mxu0 %v14284_v13  ;;  %13765 = vmatprep.mubr.msk.f32.mxu0 %vm15553_vm0, %v15554_v1  ;;  %v11486_v13 = vld [vmem:[#allocation29 + $0x8] sm:$0xff] }
0x168d   : > { %14286 = vmatprep.subr.bf16.mxu0 %v15552_v0  ;;  %13861 = vmatprep.mubr.msk.f32.mxu1 %vm15553_vm0, %v15554_v1 }
0x1690   : > { %14288 = vmatpush3.bf16.msra.mxu0 %v14287_v27  ;;  %v11090_v27 = vand.u32 4294901760, %v11089_v61 }
0x1691   : > { %14295 = vmatprep.subr.bf16.mxu0 %v15552_v0 }
0x1693   : > { %13766 = vmatmul.mubr.f32.vlgmr.msra.gmra.mrb[28].mxu0 %v10544_v6  ;;  %v14305_v6 = vpack.c.bf16 %v11104_v44, %v11097_v5 }
0x1694   : > { %13787 = vmatprep.mubr.msk.f32.mxu0 %vm15553_vm0, %v15554_v1  ;;  %14297 = vmatpush3.bf16.msra.mxu0 %v16879_v50 }
0x1695   : > { %14298 = vmatprep.subr.bf16.mxu0 %v15552_v0 }
0x1698   : > { %14300 = vmatpush3.bf16.msra.mxu0 %v16882_v56 }
0x1699   : > { %14301 = vmatprep.subr.bf16.mxu0 %v15552_v0 }
0x174e   : > { %v10641_v9 = vpop.f32.mrb[28].mxu1 }
0x174f   : > { %v13734_v14 = vpop.f32.mrb[29].mxu1 }
0x1750   : > { %v11508_v14 = vand.u32 4294901760, %v11486_v13 }
0x1756   : > { %v10798_v16 = vpop.f32.mrb[30].mxu1  ;;  %v10550_v17 = vpop.f32.mrb[24].mxu0 }
0x1757   : > { %v10551_v18 = vadd.f32 %v12385_v15, %v10550_v17  ;;  %v13756_v19 = vpop.f32.mrb[31].mxu1  ;;  %v13723_v20 = vpop.f32.mrb[25].mxu0  ;;  %v16891_v17 = vsub.f32 %v11486_v13, %v11508_v14 }
0x1759   : > { %v10642_v46 = vadd.f32 %v10641_v9, %v10551_v18  ;;  %v11505_v9 = vand.u32 4294901760, %v11485_v12  ;;  %v11597_v61 = vand.u32 4294901760, %v16891_v17 }
0x175b   : > { %v16887_v15 = vpack.c.bf16 %v11508_v14, %v11505_v9 }
0x175d   : > { %14333 = vmatpush3.bf16.msra.mxu1 %v16887_v15 }
0x175e   : > { %v10721_v21 = vpop.f32.mrb[26].mxu0  ;;  %v10956_v22 = vpop.f32.mrb[32].mxu1  ;;  %14334 = vmatprep.subr.bf16.mxu1 %v15552_v0 }
0x175f   : > { %v10722_v23 = vadd.f32 %v10721_v21, %v10642_v46  ;;  %v13745_v24 = vpop.f32.mrb[27].mxu0  ;;  %v13778_v25 = vpop.f32.mrb[33].mxu1  ;;  %v10961_v46 = vld [vmem:[#allocation23] sm:$0x3] }
0x1760   : > { %v10978_v21 = vrot.slane %v10961_v46, %v16573_v52  ;;  %v10983_v24 = vrot.slane %v10961_v46, %v16575_v54 }
0x1761   : > { %v10799_v26 = vadd.f32 %v10798_v16, %v10722_v23  ;;  %v16889_v16 = vsub.f32 %v11485_v12, %v11505_v9 }
0x1766   : > { %v10881_v28 = vpop.f32.mrb[28].mxu0 }
0x1767   : > { %v10882_v29 = vadd.f32 %v10881_v28, %v10799_v26  ;;  %v13767_v30 = vpop.f32.mrb[29].mxu0 }
0x1769   : > { %v10957_v31 = vadd.f32 %v10956_v22, %v10882_v29 }
0x176b   : > { %v10960_v32 = vadd.f32 %v10957_v31, %v16580_v60  ;;  %v11080_v60 = vsub.f32 %v10985_v40, %v11000_v43  ;;  %v11489_v40 = vld [vmem:[#allocation29 + $0x20] sm:$0xff]  ;;  %v11520_v43 = vand.u32 4294901760, %v11490_v41 }
0x176c   : > { %v11517_v42 = vand.u32 4294901760, %v11489_v40 }
0x176d   : > { %v10962_v33 = vsel %vm898_vm1, %v10960_v32, 0.0  ;;  %v11081_v57 = vand.u32 4294901760, %v11080_v60  ;;  %v14308_v8 = vpack.c.bf16 %v11087_v51, %v11080_v60 }
0x176e   : > { %10963 = vadd.xlane.f32.xlu0 %v10962_v33  ;;  %v16935_v45 = vpack.c.bf16 %v11520_v43, %v11517_v42  ;;  %v16947_v55 = vsub.f32 %v11489_v40, %v11517_v42 }
0x176f   : > { %v11082_v59 = vsub.f32 %v11080_v60, %v11081_v57  ;;  %v14320_v11 = vpack.c.bf16 %v11088_v58, %v11081_v57  ;;  %v16952_v57 = vsub.f32 %v11491_v47, %v11523_v49 }
0x1771   : > { %v11083_v62 = vand.u32 4294901760, %v11082_v59  ;;  %v11590_v59 = vand.u32 4294901760, %v16889_v16 }
0x1773   : > { %v14302_v3 = vpack.c.bf16 %v11090_v27, %v11083_v62  ;;  %v11591_v62 = vsub.f32 %v16889_v16, %v11590_v59  ;;  %v11598_v27 = vsub.f32 %v16891_v17, %v11597_v61 }
0x1775   : > { %v11592_v63 = vand.u32 4294901760, %v11591_v62  ;;  %v11599_v2 = vand.u32 4294901760, %v11598_v27 }
0x1777   : > { %v14344_v4 = vpack.c.bf16 %v11599_v2, %v11592_v63 }
0x17fb   : > { %v10964_v34 = vpop.xlane.xlu0 %10963 }
0x17fc   : > { %v10965_v35 = vmul.f32 0.03125, %v10964_v34  ;;  %v11487_v34 = vld [vmem:[#allocation29 + $0x10] sm:$0xff] }
0x17fe   : > { %v10966_v36 = vsub.f32 %v10960_v32, %v10965_v35  ;;  %v11488_v35 = vld [vmem:[#allocation29 + $0x18] sm:$0xff] }
0x1800   : > { %v10967_v37 = vmul.f32 %v10966_v36, %v10966_v36 }
0x1802   : > { %v10968_v39 = vsel %vm898_vm1, %v10967_v37, 0.0  ;;  %v11514_v37 = vand.u32 4294901760, %v11488_v35 }
0x1803   : > { %10969 = vadd.xlane.f32.xlu1 %v10968_v39 }
0x1804   : > { %v16945_v53 = vsub.f32 %v11488_v35, %v11514_v37  ;;  %v12386_v35 = vld [vmem:[#allocation28] ss:$0 sm:$0xff] }
0x1806   : > { %v11611_v7 = vand.u32 4294901760, %v16945_v53 }
0x1808   : > { %v11612_v44 = vsub.f32 %v16945_v53, %v11611_v7 }
0x1890   : > { %v10970_v18 = vpop.xlane.xlu1 %10969 }
0x1891   : > { %v10971_v19 = vmul.f32 0.03125, %v10970_v18  ;;  %v11632_v18 = vand.u32 4294901760, %v16952_v57 }
0x1893   : > { %v10972_v20 = vadd.f32 1e-05, %v10971_v19  ;;  %v11633_v46 = vsub.f32 %v16952_v57, %v11632_v18 }
0x1895   : > { %14882 = vrsqrt.f32 %v10972_v20 }
0x189f   : > { %v14883_v22 = vpop.eup %14882 }
0x18a0   : > { %v10974_v23 = vmul.f32 %v14883_v22, %v10966_v36  ;;  %v11511_v36 = vand.u32 4294901760, %v11487_v34  ;;  %v11634_v22 = vand.u32 4294901760, %v11633_v46 }
0x18a2   : > { %v10979_v25 = vmul.f32 %v10978_v21, %v10974_v23  ;;  %v16929_v39 = vpack.c.bf16 %v11514_v37, %v11511_v36  ;;  %v16943_v51 = vsub.f32 %v11487_v34, %v11511_v36 }
0x18a4   : > { %v16897_v26 = vadd.f32 %v10983_v24, %v10979_v25  ;;  %14336 = vmatpush3.bf16.msra.mxu1 %v16929_v39  ;;  %v14356_v25 = vpack.c.bf16 %v16891_v17, %v16889_v16 }
0x18a5   : > { %14337 = vmatprep.subr.bf16.mxu1 %v15552_v0 }
0x18a6   : > { %v10997_v28 = vsel %vm898_vm1, %v16897_v26, 0 }
0x18a7   : > { %v11068_v29 = vand.u32 4294901760, %v10997_v28 }
0x18a8   : > { %14339 = vmatpush3.bf16.msra.mxu1 %v16935_v45 }
0x18a9   : > { %v11069_v30 = vsub.f32 %v10997_v28, %v11068_v29  ;;  %14340 = vmatprep.subr.bf16.mxu1 %v15552_v0  ;;  %v14359_v28 = vpack.c.bf16 %v16945_v53, %v16943_v51 }
0x18ab   : > { %v11070_v31 = vand.u32 4294901760, %v11069_v30 }
0x18ad   : > { %v11071_v32 = vsub.f32 %v11069_v30, %v11070_v31 }
0x18af   : > { %v11072_v33 = vand.u32 4294901760, %v11071_v32 }
0x18b1   : > { %13788 = vmatmul.mubr.f32.vlgmr.msra.gmra.mrb[30].mxu0 %v11072_v33 }
0x18b2   : > { %14303 = vmatpush3.bf16.msra.mxu0 %v14302_v3  ;;  %13798 = vmatprep.mubr.msk.f32.mxu0 %vm15553_vm0, %v15554_v1  ;;  %v11604_v3 = vand.u32 4294901760, %v16943_v51 }
0x18b3   : > { %14304 = vmatprep.subr.bf16.mxu0 %v15552_v0 }
0x18b4   : > { %v11605_v5 = vsub.f32 %v16943_v51, %v11604_v3  ;;  %v14383_v32 = vpack.c.bf16 %v11611_v7, %v11604_v3 }
0x18b6   : > { %14306 = vmatpush3.bf16.msra.mxu0 %v14305_v6  ;;  %v11606_v6 = vand.u32 4294901760, %v11605_v5 }
0x18b7   : > { %14307 = vmatprep.subr.bf16.mxu0 %v15552_v0 }
0x18b9   : > { %13799 = vmatmul.mubr.f32.vlgmr.msra.gmra.mrb[30].mxu0 %v11068_v29 }
0x18ba   : > { %14309 = vmatpush3.bf16.msra.mxu0 %v14308_v8  ;;  %13809 = vmatprep.mubr.msk.f32.mxu0 %vm15553_vm0, %v15554_v1  ;;  %v11613_v8 = vand.u32 4294901760, %v11612_v44 }
0x18bb   : > { %14310 = vmatprep.subr.bf16.mxu0 %v15552_v0 }
0x18be   : > { %14312 = vmatpush3.bf16.msra.mxu0 %v14311_v10  ;;  %v11618_v10 = vand.u32 4294901760, %v16947_v55 }
0x18bf   : > { %14313 = vmatprep.subr.bf16.mxu0 %v15552_v0 }
0x18c0   : > { %v11619_v12 = vsub.f32 %v16947_v55, %v11618_v10 }
0x18c1   : > { %13810 = vmatmul.mubr.f32.vlgmr.msra.gmra.mrb[30].mxu0 %v11069_v30 }
0x18c2   : > { %14315 = vmatpush3.bf16.msra.mxu0 %v16879_v50  ;;  %13820 = vmatprep.mubr.msk.f32.mxu0 %vm15553_vm0, %v15554_v1  ;;  %v11620_v9 = vand.u32 4294901760, %v11619_v12 }
0x18c3   : > { %14316 = vmatprep.subr.bf16.mxu0 %v15552_v0 }
0x18c6   : > { %14318 = vmatpush3.bf16.msra.mxu0 %v16882_v56 }
0x18c7   : > { %14319 = vmatprep.subr.bf16.mxu0 %v15552_v0 }
0x18c9   : > { %13821 = vmatmul.mubr.f32.vlgmr.msra.gmra.mrb[30].mxu0 %v11070_v31  ;;  %v14380_v31 = vpack.c.bf16 %v11597_v61, %v11590_v59 }
0x18ca   : > { %14321 = vmatpush3.bf16.msra.mxu0 %v14320_v11  ;;  %13831 = vmatprep.mubr.msk.f32.mxu0 %vm15553_vm0, %v15554_v1 }
0x18cb   : > { %14322 = vmatprep.subr.bf16.mxu0 %v15552_v0 }
0x18ce   : > { %14324 = vmatpush3.bf16.msra.mxu0 %v14323_v38  ;;  %v14347_v38 = vpack.c.bf16 %v11613_v8, %v11606_v6 }
0x18cf   : > { %14325 = vmatprep.subr.bf16.mxu0 %v15552_v0 }
0x18d1   : > { %13832 = vmatmul.mubr.f32.vlgmr.msra.gmra.mrb[30].mxu0 %v11068_v29 }
0x18d2   : > { %14327 = vmatpush3.bf16.msra.mxu0 %v16879_v50  ;;  %13842 = vmatprep.mubr.msk.f32.mxu0 %vm15553_vm0, %v15554_v1  ;;  %v11526_v50 = vand.u32 4294901760, %v11492_v48 }
0x18d3   : > { %14328 = vmatprep.subr.bf16.mxu0 %v15552_v0 }
0x18d4   : > { %v16941_v60 = vpack.c.bf16 %v11526_v50, %v11523_v49  ;;  %v16954_v58 = vsub.f32 %v11492_v48, %v11526_v50  ;;  %v12387_v50 = vld [vmem:[#allocation31] ss:$0 sm:$0xff] }
0x18d6   : > { %14330 = vmatpush3.bf16.msra.mxu0 %v16882_v56  ;;  %v16949_v56 = vsub.f32 %v11490_v41, %v11520_v43  ;;  %14342 = vmatpush3.bf16.msra.mxu1 %v16941_v60  ;;  %v11639_v19 = vand.u32 4294901760, %v16954_v58  ;;  %v14365_v30 = vpack.c.bf16 %v16954_v58, %v16952_v57 }
0x18d7   : > { %14367 = vmatprep.subr.bf16.mxu0 %v15552_v0  ;;  %14343 = vmatprep.subr.bf16.mxu1 %v15552_v0 }
0x18d8   : > { %v11625_v11 = vand.u32 4294901760, %v16949_v56  ;;  %v11640_v21 = vsub.f32 %v16954_v58, %v11639_v19  ;;  %v14389_v34 = vpack.c.bf16 %v11639_v19, %v11632_v18 }
0x18d9   : > { %13843 = vmatmul.mubr.f32.vlgmr.msra.gmra.mrb[30].mxu0 %v11068_v29  ;;  %v14362_v29 = vpack.c.bf16 %v16949_v56, %v16947_v55 }
0x18da   : > { %14369 = vmatpush3.bf16.msra.mxu0 %v16887_v15  ;;  %13918 = vmatprep.mubr.msk.f32.mxu0 %vm15553_vm0, %v15554_v1  ;;  %v11626_v13 = vsub.f32 %v16949_v56, %v11625_v11  ;;  %v11641_v23 = vand.u32 4294901760, %v11640_v21  ;;  %v14386_v33 = vpack.c.bf16 %v11625_v11, %v11618_v10 }
0x18db   : > { %14370 = vmatprep.subr.bf16.mxu0 %v15552_v0 }
0x18dc   : > { %v11627_v14 = vand.u32 4294901760, %v11626_v13  ;;  %v14353_v24 = vpack.c.bf16 %v11641_v23, %v11634_v22 }
0x18de   : > { %14372 = vmatpush3.bf16.msra.mxu0 %v16929_v39  ;;  %v14350_v20 = vpack.c.bf16 %v11627_v14, %v11620_v9 }
0x18df   : > { %14373 = vmatprep.subr.bf16.mxu0 %v15552_v0 }
0x18e2   : > { %14375 = vmatpush3.bf16.msra.mxu0 %v16935_v45 }
0x18e3   : > { %14376 = vmatprep.subr.bf16.mxu0 %v15552_v0 }
0x18e6   : > { %14378 = vmatpush3.bf16.msra.mxu0 %v16941_v60 }
0x18e7   : > { %14391 = vmatprep.subr.bf16.mxu0 %v15552_v0 }
0x19ac   : > { %v11480_v36 = vpop.f32.mrb[30].mxu0 }
0x19ad   : > { %v14408_v37 = vadd.f32 %v12386_v35, %v11480_v36  ;;  %v13844_v40 = vpop.f32.mrb[31].mxu0 }
0x19af   : > { %v11484_v41 = vmax.f32 %v14408_v37, 0.0 }
0x19b1   : > { %v11502_v16 = vsel %vm11500_vm5, %v11484_v41, 0 }
0x19b2   : > { %v11577_v17 = vand.u32 4294901760, %v11502_v16 }
0x19b4   : > { %v11578_v42 = vsub.f32 %v11502_v16, %v11577_v17 }
0x19b6   : > { %v11579_v43 = vand.u32 4294901760, %v11578_v42 }
0x19b8   : > { %13919 = vmatmul.mubr.f32.vlgmr.msra.gmra.mrb[32].mxu0 %v11579_v43  ;;  %v11580_v47 = vsub.f32 %v11578_v42, %v11579_v43 }
0x19b9   : > { %14393 = vmatpush3.bf16.msra.mxu0 %v16887_v15  ;;  %13956 = vmatprep.mubr.msk.f32.mxu0 %vm15553_vm0, %v15554_v1 }
0x19ba   : > { %14394 = vmatprep.subr.bf16.mxu0 %v15552_v0  ;;  %v11581_v48 = vand.u32 4294901760, %v11580_v47 }
0x19bc   : > { %13862 = vmatmul.mubr.f32.vlgmr.msra.gmra.mrb[34].mxu1 %v11581_v48 }
0x19bd   : > { %14345 = vmatpush3.bf16.msra.mxu1 %v14344_v4  ;;  %14396 = vmatpush3.bf16.msra.mxu0 %v16929_v39 }
0x19be   : > { %14346 = vmatprep.subr.bf16.mxu1 %v15552_v0  ;;  %14397 = vmatprep.subr.bf16.mxu0 %v15552_v0 }
0x19bf   : > { %13880 = vmatprep.mubr.msk.f32.mxu1 %vm15553_vm0, %v15554_v1 }
0x19c1   : > { %14348 = vmatpush3.bf16.msra.mxu1 %v14347_v38  ;;  %14399 = vmatpush3.bf16.msra.mxu0 %v16935_v45  ;;  %v12042_v38 = vld [vmem:[#allocation25] sm:$0x3] }
0x19c2   : > { %14349 = vmatprep.subr.bf16.mxu1 %v15552_v0  ;;  %14400 = vmatprep.subr.bf16.mxu0 %v15552_v0  ;;  %v12064_v9 = vrot.slane %v12042_v38, %v16575_v54 }
0x19c5   : > { %14351 = vmatpush3.bf16.msra.mxu1 %v14350_v20  ;;  %14402 = vmatpush3.bf16.msra.mxu0 %v16941_v60 }
0x19c6   : > { %14352 = vmatprep.subr.bf16.mxu1 %v15552_v0 }
0x19c8   : > { %13957 = vmatmul.mubr.f32.vlgmr.msra.gmra.mrb[34].mxu0 %v11577_v17 }
0x19c9   : > { %14354 = vmatpush3.bf16.msra.mxu1 %v14353_v24 }
0x19ca   : > { %14355 = vmatprep.subr.bf16.mxu1 %v15552_v0 }
0x19cc   : > { %13881 = vmatmul.mubr.f32.vlgmr.msra.gmra.mrb[36].mxu1 %v11577_v17 }
0x19cd   : > { %14357 = vmatpush3.bf16.msra.mxu1 %v14356_v25  ;;  %13899 = vmatprep.mubr.msk.f32.mxu1 %vm15553_vm0, %v15554_v1 }
0x19ce   : > { %14358 = vmatprep.subr.bf16.mxu1 %v15552_v0 }
0x19d1   : > { %14360 = vmatpush3.bf16.msra.mxu1 %v14359_v28 }
0x19d2   : > { %14361 = vmatprep.subr.bf16.mxu1 %v15552_v0 }
0x19d5   : > { %14363 = vmatpush3.bf16.msra.mxu1 %v14362_v29 }
0x19d6   : > { %14364 = vmatprep.subr.bf16.mxu1 %v15552_v0 }
0x19d9   : > { %14366 = vmatpush3.bf16.msra.mxu1 %v14365_v30 }
0x19da   : > { %14379 = vmatprep.subr.bf16.mxu1 %v15552_v0 }
0x19dc   : > { %13900 = vmatmul.mubr.f32.vlgmr.msra.gmra.mrb[38].mxu1 %v11578_v42 }
0x19dd   : > { %14381 = vmatpush3.bf16.msra.mxu1 %v14380_v31  ;;  %13937 = vmatprep.mubr.msk.f32.mxu1 %vm15553_vm0, %v15554_v1 }
0x19de   : > { %14382 = vmatprep.subr.bf16.mxu1 %v15552_v0 }
0x19e1   : > { %14384 = vmatpush3.bf16.msra.mxu1 %v14383_v32 }
0x19e2   : > { %14385 = vmatprep.subr.bf16.mxu1 %v15552_v0 }
0x19e5   : > { %14387 = vmatpush3.bf16.msra.mxu1 %v14386_v33 }
0x19e6   : > { %14388 = vmatprep.subr.bf16.mxu1 %v15552_v0 }
0x19e9   : > { %14390 = vmatpush3.bf16.msra.mxu1 %v14389_v34 }
0x19ec   : > { %13938 = vmatmul.mubr.f32.vlgmr.msra.gmra.mrb[40].mxu1 %v11577_v17 }
0x1a8b   : > { %v11863_v15 = vpop.f32.mrb[32].mxu0 }
0x1a8c   : > { %v13920_v39 = vpop.f32.mrb[33].mxu0 }
0x1a8f   : > { %v11583_v45 = vpop.f32.mrb[34].mxu1 }
0x1a90   : > { %v13863_v49 = vpop.f32.mrb[35].mxu1  ;;  %v11584_v53 = vadd.f32 %v12387_v50, %v11583_v45 }
0x1a9b   : > { %v12037_v60 = vpop.f32.mrb[34].mxu0 }
0x1a9c   : > { %v13958_v51 = vpop.f32.mrb[35].mxu0 }
0x1a9f   : > { %v11694_v55 = vpop.f32.mrb[36].mxu1 }
0x1aa0   : > { %v11695_v1 = vadd.f32 %v11694_v55, %v11584_v53  ;;  %v13882_v56 = vpop.f32.mrb[37].mxu1 }
0x1aaf   : > { %v11782_v57 = vpop.f32.mrb[38].mxu1 }
0x1ab0   : > { %v11783_v58 = vadd.f32 %v11782_v57, %v11695_v1  ;;  %v13901_v59 = vpop.f32.mrb[39].mxu1 }
0x1ab2   : > { %v11864_v61 = vadd.f32 %v11863_v15, %v11783_v58 }
0x1abf   : > { %v11958_v62 = vpop.f32.mrb[40].mxu1 }
0x1ac0   : > { %v11959_v27 = vadd.f32 %v11958_v62, %v11864_v61  ;;  %v13939_v0 = vpop.f32.mrb[41].mxu1 }
0x1ac2   : > { %v12038_v63 = vadd.f32 %v12037_v60, %v11959_v27 }
0x1ac4   : > { %v12041_v2 = vadd.f32 %v12038_v63, %v16897_v26  ;;  %v12059_v26 = vrot.slane %v12042_v38, %v16573_v52 }
0x1ac6   : > { %v12043_v3 = vsel %vm898_vm1, %v12041_v2, 0.0 }
0x1ac7   : > { %12044 = vadd.xlane.f32.xlu0 %v12043_v3 }
0x1b54   : > { %v12045_v7 = vpop.xlane.xlu0 %12044 }
0x1b55   : > { %v12046_v4 = vmul.f32 0.03125, %v12045_v7 }
0x1b57   : > { %v12047_v5 = vsub.f32 %v12041_v2, %v12046_v4 }
0x1b59   : > { %v12048_v44 = vmul.f32 %v12047_v5, %v12047_v5 }
0x1b5b   : > { %v12049_v6 = vsel %vm898_vm1, %v12048_v44, 0.0 }
0x1b5c   : > { %12050 = vadd.xlane.f32.xlu0 %v12049_v6 }
0x1be9   : > { %v12051_v8 = vpop.xlane.xlu0 %12050 }
0x1bea   : > { %v12052_v10 = vmul.f32 0.03125, %v12051_v8 }
0x1bec   : > { %v12053_v11 = vadd.f32 1e-05, %v12052_v10 }
0x1bee   : > { %14884 = vrsqrt.f32 %v12053_v11 }
0x1bf8   : > { %v14885_v12 = vpop.eup %14884 }
0x1bf9   : > { %v12055_v13 = vmul.f32 %v14885_v12, %v12047_v5 }
0x1bfb   : > { %v12060_v14 = vmul.f32 %v12059_v26, %v12055_v13 }
0x1bfd   : > { %v12065_v18 = vadd.f32 %v12064_v9, %v12060_v14 }
0x1bff   : > { %12066 = vst.msk [vmem:[%s883_s21] sm:$0xff] %vm898_vm1, %v12065_v18 }
0x1c00   : > { %15436 = shalt.err (!%p15433_p9)
}
0x1c01   : > { %s15437_s6 = scalar_lea.hbm %s17020_s11, 128  ;;  %s15441_s4 = scalar_lea.hbm %s17184_s25, 256 }
0x1c02   : > { %p15438_p4 = scmp.ne.s32.totalorder %s17020_s11, %s15437_s6  ;;  %p15442_p0 = scmp.lt.u32.totalorder %s17020_s11, %s17184_s25 }
0x1c03   : > { %p15443_p12 = scmp.lt.u32.totalorder %s15441_s4, %s15437_s6  ;;  %p15445_p1 = scmp.lt.u32.totalorder %s15437_s6, %s17020_s11 }
0x1c04   : > { %p15439_p8 = pnand %p15438_p4, %p17185_p3 }
0x1c05   : > { %p15444_p13 = por %p15443_p12, %p15442_p0 }
0x1c06   : > { %p15440_p11 = pneg %p15439_p8 }
0x1c07   : > { %p15446_p7 = por %p15445_p1, %p15444_p13 }
0x1c09   : > { %p15447_p2 = pnand %p15446_p7, %p15440_p11 }
0x1c0b   : > { %15450 = shalt.err (!%p15447_p2)
}
0x1c0c   : > { %14679 = dma.vmem_to_hbm [thread:$0]  (%p17185_p3), %s17022_s22, 128, %s17020_s11, %s12068_s23  }
0x1c0d PF: > { %s17186_s21 = sld [smem:[#allocation45_spill]]  ;;  %s17187_s8 = sld [smem:[#allocation48_spill]] }
0x1c0e   : > { %p17188_p6 = scmp.ne.s32.totalorder %s17156_s19, 0 }
0x1c13   : > { %s12093_s30 = sand.u32 1, %s17186_s21   ;;  %p17189_p10 = scmp.ge.s32.totalorder %s17187_s8, 2 }
0x1c14   : > { %s12094_s20 = scalar_lea.sflag [#allocation4], %s12093_s30 }
0x1c15   : > { %p14741_p5 = pnand %p17189_p10, %p17188_p6 }
0x1c17   : > { %15512 = dma.done.wait (!%p14741_p5), %s12094_s20, 128  }
0x1c18   : > { %15514 = vsyncadd (!%p14741_p5), %s12094_s20, 4294967168  ;;  %s17190_s0 = sld [smem:[#allocation46_spill]]  ;;  %s17191_s30 = sld [smem:[#allocation47_spill]] }
0x1c19   : > { %p43_p9 = scmp.ge.s32.totalorder %s16067_s3, 4   ;;  %s17192_s20 = smov %s16079_s27 }
0x1c1a   : > { %s17193_s21 = smov %s16067_s3 }
0x1c1b   :  { %45 = sbr.rel (!%p43_p9) target bundleno = 32 (0x20), region = 222 }
0x1c22   :  { %12099 = vsyncpa [#allocation3], 1 }
0x1c23   :  { %12101 = vsyncpa [#allocation3 + $0x1], 1 }
0x1c24   :  { %12102 = vsyncpa [#allocation6], 1 }
0x1c25   :  { %12104 = vsyncpa [#allocation6 + $0x1], 1 }
0x1c26   :  { %12105 = vsyncpa [#allocation9], 1 }
0x1c27   :  { %12106 = vsyncpa [#allocation12], 1 }
0x1c28   :  { %12107 = vsyncpa [#allocation15], 1 }
0x1c29   :  { %12108 = vsyncpa [#allocation18], 1 }
0x1c2a   :  { %12109 = vsyncpa [#allocation21], 1 }
0x1c2b   :  { %12110 = vsyncpa [#allocation24], 1 }
0x1c2c   :  { %12111 = vsyncpa [#allocation27], 1 }
0x1c2d   :  { %12112 = vsyncpa [#allocation30], 1 }
0x1c2e   :  { %12113 = vsyncpa [#allocation4], 1 }
0x1c2f   :  { %12115 = vsyncpa [#allocation4 + $0x1], 1 }

</bundles_post_ra>
